<compile_context>
chip_gen: v7x
topology: tpu7x:2x2x1
jax: 0.10.0
libtpu: 0.0.40
codegen_flags: <defaults>
</compile_context>

<pallas_src>
import jax
import jax.numpy as jnp
from jax import lax
from jax.experimental import pallas as pl
from jax.experimental.pallas import tpu as pltpu


_LANE = 128     # TPU lane width: keep feature (last) dims lane-dense
_SUBLANE = 8    # token-tile rows must be a multiple of 8


def _round_up(x, m):
    return ((x + m - 1) // m) * m


def _pad_2d(a, rows, cols):
    r, c = a.shape
    if r == rows and c == cols:
        return a
    return jnp.pad(a, ((0, rows - r), (0, cols - c)))


def _make_vae_kernel(n_enc, n_dec):
    """Fused VAE kernel for one (Tm, *) token tile.

    Ref order (must match the operand order built by the wrapper):
      x, [w,b]*n_enc, wm, bm, wv, bv, eps, [w,b]*n_dec,  y, z_mean, z_logvar
    """
    prec = lax.Precision.HIGHEST  # exact f32 matmuls (see bf16 TODO above)

    def kernel(*refs):
        idx = 0
        x_ref = refs[idx]; idx += 1
        h = x_ref[...]

        # Encoder MLP: Linear + ReLU after every layer (incl. latent proj).
        for _ in range(n_enc):
            w_ref, b_ref = refs[idx], refs[idx + 1]; idx += 2
            h = jnp.maximum(
                jnp.dot(h, w_ref[...], preferred_element_type=jnp.float32,
                        precision=prec) + b_ref[...], 0.0)

        # Latent heads (no activation).
        wm_ref, bm_ref, wv_ref, bv_ref = refs[idx:idx + 4]; idx += 4
        z_mean = jnp.dot(h, wm_ref[...], preferred_element_type=jnp.float32,
                         precision=prec) + bm_ref[...]
        z_logvar = jnp.dot(h, wv_ref[...], preferred_element_type=jnp.float32,
                           precision=prec) + bv_ref[...]

        # Reparameterization trick (exp runs on the EUP slot -> nearly free).
        eps_ref = refs[idx]; idx += 1
        y = z_mean + jnp.exp(z_logvar) * eps_ref[...]

        # Decoder MLP: Linear + ReLU after every layer (incl. final ReLU).
        for _ in range(n_dec):
            w_ref, b_ref = refs[idx], refs[idx + 1]; idx += 2
            y = jnp.maximum(
                jnp.dot(y, w_ref[...], preferred_element_type=jnp.float32,
                        precision=prec) + b_ref[...], 0.0)

        y_ref, zmean_ref, zlogvar_ref = refs[idx:idx + 3]
        y_ref[...] = y.astype(y_ref.dtype)
        zmean_ref[...] = z_mean.astype(zmean_ref.dtype)
        zlogvar_ref[...] = z_logvar.astype(zlogvar_ref.dtype)

    return kernel


def vae_embedding_mapper_forward(x, enc_params, wm, bm, wv, bv, dec_params,
                                 *, training, rng_key=None, tm=512):
    """Faithful VAEEmbeddingMapper.forward.

    x: (B, S, E) input embeddings.
    enc_params / dec_params: lists of (W[in,out], b[out]); every layer is
      Linear+ReLU (MLPEmbeddingMapper with final_activation='relu').
    wm/bm, wv/bv: encoder_mean / encoder_logvar Linear(latent, latent).
    Returns (y, z_mean, z_logvar): (B,S,E), (B,S,L), (B,S,L).
    """
    B, S, E = x.shape
    L = wm.shape[0]
    T0 = B * S
    f32 = jnp.float32

    # Layout glue: flatten (B, S) -> token axis; features on the lane axis.
    x2 = x.reshape(T0, E).astype(f32)

    # Gaussian sample generated host-side (keeps the kernel deterministic);
    # zeros at inference, matching torch.zeros_like.
    if training:
        eps2 = jax.random.normal(rng_key, (T0, L), dtype=f32)
    else:
        eps2 = jnp.zeros((T0, L), dtype=f32)

    # --- padding: token axis -> multiple of Tm (itself a multiple of 8);
    #     feature dims -> multiples of 128 (lane-dense, MXU-native). ---------
    tm = max(_SUBLANE,
             _round_up(min(tm, _round_up(T0, _SUBLANE)), _SUBLANE))
    T = _round_up(T0, tm)
    Ep = _round_up(E, _LANE)
    Lp = _round_up(L, _LANE)

    x2p = _pad_2d(x2, T, Ep)
    eps2p = _pad_2d(eps2, T, Lp)

    def pad_layer(w, b):
        i, o = w.shape
        ip, op = _round_up(i, _LANE), _round_up(o, _LANE)
        return (_pad_2d(w.astype(f32), ip, op),
                _pad_2d(b.astype(f32).reshape(1, o), 1, op))

    enc_p = [pad_layer(w, b) for (w, b) in enc_params]
    dec_p = [pad_layer(w, b) for (w, b) in dec_params]
    wmp, bmp = pad_layer(wm, bm)
    wvp, bvp = pad_layer(wv, bv)
    n_enc, n_dec = len(enc_p), len(dec_p)

    # --- specs ---------------------------------------------------------------
    grid = (T // tm,)
    const = lambda i: (0, 0)     # weights / biases: resident across grid steps
    tokmap = lambda i: (i, 0)    # token-tiled arrays

    in_specs = [pl.BlockSpec((tm, Ep), tokmap)]
    operands = [x2p]
    for w, b in enc_p:
        in_specs += [pl.BlockSpec(w.shape, const), pl.BlockSpec(b.shape, const)]
        operands += [w, b]
    for w, b in ((wmp, bmp), (wvp, bvp)):
        in_specs += [pl.BlockSpec(w.shape, const), pl.BlockSpec(b.shape, const)]
        operands += [w, b]
    in_specs.append(pl.BlockSpec((tm, Lp), tokmap))
    operands.append(eps2p)
    for w, b in dec_p:
        in_specs += [pl.BlockSpec(w.shape, const), pl.BlockSpec(b.shape, const)]
        operands += [w, b]

    out_specs = [pl.BlockSpec((tm, Ep), tokmap),
                 pl.BlockSpec((tm, Lp), tokmap),
                 pl.BlockSpec((tm, Lp), tokmap)]
    out_shape = (jax.ShapeDtypeStruct((T, Ep), f32),
                 jax.ShapeDtypeStruct((T, Lp), f32),
                 jax.ShapeDtypeStruct((T, Lp), f32))

    # Advisory cost estimate for the XLA scheduler.
    all_mats = [w for w, _ in enc_p] + [wmp, wvp] + [w for w, _ in dec_p]
    all_biases = [b for _, b in enc_p] + [bmp, bvp] + [b for _, b in dec_p]
    flops = int(sum(2 * T * w.shape[0] * w.shape[1] for w in all_mats))
    bytes_accessed = int(4 * (x2p.size + eps2p.size
                              + sum(w.size for w in all_mats)
                              + sum(b.size for b in all_biases)
                              + T * Ep + 2 * T * Lp))
    transcendentals = int(T * Lp)

    y2, zm2, zlv2 = pl.pallas_call(
        _make_vae_kernel(n_enc, n_dec),
        out_shape=out_shape,
        grid_spec=pltpu.PrefetchScalarGridSpec(
            num_scalar_prefetch=0,
            grid=grid,
            in_specs=in_specs,
            out_specs=out_specs),
        compiler_params=pltpu.CompilerParams(
            dimension_semantics=("parallel",),        # megacore on v7x
            vmem_limit_bytes=64 * 1024 * 1024),
        cost_estimate=pl.CostEstimate(
            flops=flops,
            transcendentals=transcendentals,
            bytes_accessed=bytes_accessed),
    )(*operands)

    y = y2[:T0, :E].reshape(B, S, E)
    z_mean = zm2[:T0, :L].reshape(B, S, L)
    z_logvar = zlv2[:T0, :L].reshape(B, S, L)
    return y, z_mean, z_logvar


if __name__ == "__main__":
    # Small demo shapes consistent with the module.
    B, S, E = 2, 8, 32            # batch, seq, embed_dim
    mlp_sizes = (24, 16, 24)      # odd length: encoder=[24], latent=16, decoder=[24]
    n_half = len(mlp_sizes) // 2
    enc_sizes = mlp_sizes[:n_half]
    L = mlp_sizes[n_half]
    dec_sizes = mlp_sizes[n_half + 1:]

    key = jax.random.PRNGKey(0)
    key, kx, keps = jax.random.split(key, 3)
    x = jax.random.normal(kx, (B, S, E), dtype=jnp.float32)

    def init_linear(k, fan_in, fan_out):
        kw, kb = jax.random.split(k)
        w = jax.random.normal(kw, (fan_in, fan_out), jnp.float32) / jnp.sqrt(fan_in)
        b = jax.random.normal(kb, (fan_out,), jnp.float32) * 0.01
        return w, b

    enc_dims = [E] + list(enc_sizes) + [L]
    dec_dims = [L] + list(dec_sizes) + [E]
    enc_params, dec_params = [], []
    for i in range(len(enc_dims) - 1):
        key, k = jax.random.split(key)
        enc_params.append(init_linear(k, enc_dims[i], enc_dims[i + 1]))
    key, km = jax.random.split(key)
    wm, bm = init_linear(km, L, L)
    key, kv = jax.random.split(key)
    wv, bv = init_linear(kv, L, L)
    for i in range(len(dec_dims) - 1):
        key, k = jax.random.split(key)
        dec_params.append(init_linear(k, dec_dims[i], dec_dims[i + 1]))

    # tm=8 so even the tiny demo exercises a multi-step pipelined grid (grid=(2,)).
    y, z_mean, z_logvar = vae_embedding_mapper_forward(
        x, enc_params, wm, bm, wv, bv, dec_params,
        training=True, rng_key=keps, tm=8)
    jax.block_until_ready((y, z_mean, z_logvar))

    # Plain-JAX reference (same semantics as the torch module, same eps).
    HIGH = lax.Precision.HIGHEST

    def dense(h, w, b):
        return jnp.dot(h, w, precision=HIGH) + b

    h = x.reshape(B * S, E)
    for w, b in enc_params:
        h = jnp.maximum(dense(h, w, b), 0.0)
    zm_r = dense(h, wm, bm)
    zlv_r = dense(h, wv, bv)
    eps_r = jax.random.normal(keps, (B * S, L), dtype=jnp.float32)
    yr = zm_r + jnp.exp(zlv_r) * eps_r
    for w, b in dec_params:
        yr = jnp.maximum(dense(yr, w, b), 0.0)
    yr = yr.reshape(B, S, E)
    zm_r = zm_r.reshape(B, S, L)
    zlv_r = zlv_r.reshape(B, S, L)

    assert y.shape == (B, S, E)
    assert z_mean.shape == (B, S, L) and z_logvar.shape == (B, S, L)
    assert jnp.allclose(y, yr, atol=1e-4, rtol=1e-4)
    assert jnp.allclose(z_mean, zm_r, atol=1e-4, rtol=1e-4)
    assert jnp.allclose(z_logvar, zlv_r, atol=1e-4, rtol=1e-4)

    print("KERNEL_OK")
</pallas_src>

<mosaic_0001>
module attributes {stable_mosaic.version = 11 : i64} {
  func.func @kernel(%arg0: i32, %arg1: memref<8x128xf32, #tpu.memory_space<vmem>>, %arg2: memref<128x128xf32, #tpu.memory_space<vmem>>, %arg3: memref<1x128xf32, #tpu.memory_space<vmem>>, %arg4: memref<128x128xf32, #tpu.memory_space<vmem>>, %arg5: memref<1x128xf32, #tpu.memory_space<vmem>>, %arg6: memref<128x128xf32, #tpu.memory_space<vmem>>, %arg7: memref<1x128xf32, #tpu.memory_space<vmem>>, %arg8: memref<128x128xf32, #tpu.memory_space<vmem>>, %arg9: memref<1x128xf32, #tpu.memory_space<vmem>>, %arg10: memref<8x128xf32, #tpu.memory_space<vmem>>, %arg11: memref<128x128xf32, #tpu.memory_space<vmem>>, %arg12: memref<1x128xf32, #tpu.memory_space<vmem>>, %arg13: memref<128x128xf32, #tpu.memory_space<vmem>>, %arg14: memref<1x128xf32, #tpu.memory_space<vmem>>, %arg15: memref<8x128xf32, #tpu.memory_space<vmem>>, %arg16: memref<8x128xf32, #tpu.memory_space<vmem>>, %arg17: memref<8x128xf32, #tpu.memory_space<vmem>>) attributes {dimension_semantics = [#tpu.dimension_semantics<parallel>], iteration_bounds = array<i64: 2>, scalar_prefetch = 0 : i64, scratch_operands = 0 : i64, tpu.core_type = #tpu.core_type<tc>, window_params = [{transform_indices = @transform_0, window_bounds = array<i64: 8, 128>}, {pipeline_mode = #tpu.pipeline_mode<synchronous>, transform_indices = @transform_1, window_bounds = array<i64: 128, 128>}, {pipeline_mode = #tpu.pipeline_mode<synchronous>, transform_indices = @transform_2, window_bounds = array<i64: 1, 128>}, {pipeline_mode = #tpu.pipeline_mode<synchronous>, transform_indices = @transform_3, window_bounds = array<i64: 128, 128>}, {pipeline_mode = #tpu.pipeline_mode<synchronous>, transform_indices = @transform_4, window_bounds = array<i64: 1, 128>}, {pipeline_mode = #tpu.pipeline_mode<synchronous>, transform_indices = @transform_5, window_bounds = array<i64: 128, 128>}, {pipeline_mode = #tpu.pipeline_mode<synchronous>, transform_indices = @transform_6, window_bounds = array<i64: 1, 128>}, {pipeline_mode = #tpu.pipeline_mode<synchronous>, transform_indices = @transform_7, window_bounds = array<i64: 128, 128>}, {pipeline_mode = #tpu.pipeline_mode<synchronous>, transform_indices = @transform_8, window_bounds = array<i64: 1, 128>}, {transform_indices = @transform_9, window_bounds = array<i64: 8, 128>}, {pipeline_mode = #tpu.pipeline_mode<synchronous>, transform_indices = @transform_10, window_bounds = array<i64: 128, 128>}, {pipeline_mode = #tpu.pipeline_mode<synchronous>, transform_indices = @transform_11, window_bounds = array<i64: 1, 128>}, {pipeline_mode = #tpu.pipeline_mode<synchronous>, transform_indices = @transform_12, window_bounds = array<i64: 128, 128>}, {pipeline_mode = #tpu.pipeline_mode<synchronous>, transform_indices = @transform_13, window_bounds = array<i64: 1, 128>}, {transform_indices = @transform_14, window_bounds = array<i64: 8, 128>}, {transform_indices = @transform_15, window_bounds = array<i64: 8, 128>}, {transform_indices = @transform_16, window_bounds = array<i64: 8, 128>}]} {
    %c0 = arith.constant 0 : index
    %c0_0 = arith.constant 0 : index
    %0 = vector.load %arg1[%c0, %c0_0] : memref<8x128xf32, #tpu.memory_space<vmem>>, vector<8x128xf32>
    %c0_1 = arith.constant 0 : index
    %c0_2 = arith.constant 0 : index
    %1 = vector.load %arg2[%c0_1, %c0_2] : memref<128x128xf32, #tpu.memory_space<vmem>>, vector<128x128xf32>
    %cst = arith.constant dense<0.000000e+00> : vector<8x128xf32>
    %2 = tpu.matmul %0, %1, %cst {dimension_numbers = #tpu.dot_dimension_numbers<[1], [0], [0], [1], [0, 0, 1, 1], [], []>, precision = #tpu.contract_precision<fp32>} : vector<8x128xf32>, vector<128x128xf32>, vector<8x128xf32> -> vector<8x128xf32>
    %c0_3 = arith.constant 0 : index
    %c0_4 = arith.constant 0 : index
    %3 = vector.load %arg3[%c0_3, %c0_4] : memref<1x128xf32, #tpu.memory_space<vmem>>, vector<1x128xf32>
    %4 = vector.broadcast %3 : vector<1x128xf32> to vector<8x128xf32>
    %5 = arith.addf %2, %4 : vector<8x128xf32>
    %cst_5 = arith.constant 0.000000e+00 : f32
    %6 = vector.broadcast %cst_5 : f32 to vector<8x128xf32>
    %7 = arith.maximumf %5, %6 : vector<8x128xf32>
    %c0_6 = arith.constant 0 : index
    %c0_7 = arith.constant 0 : index
    %8 = vector.load %arg4[%c0_6, %c0_7] : memref<128x128xf32, #tpu.memory_space<vmem>>, vector<128x128xf32>
    %cst_8 = arith.constant dense<0.000000e+00> : vector<8x128xf32>
    %9 = tpu.matmul %7, %8, %cst_8 {dimension_numbers = #tpu.dot_dimension_numbers<[1], [0], [0], [1], [0, 0, 1, 1], [], []>, precision = #tpu.contract_precision<fp32>} : vector<8x128xf32>, vector<128x128xf32>, vector<8x128xf32> -> vector<8x128xf32>
    %c0_9 = arith.constant 0 : index
    %c0_10 = arith.constant 0 : index
    %10 = vector.load %arg5[%c0_9, %c0_10] : memref<1x128xf32, #tpu.memory_space<vmem>>, vector<1x128xf32>
    %11 = vector.broadcast %10 : vector<1x128xf32> to vector<8x128xf32>
    %12 = arith.addf %9, %11 : vector<8x128xf32>
    %cst_11 = arith.constant 0.000000e+00 : f32
    %13 = vector.broadcast %cst_11 : f32 to vector<8x128xf32>
    %14 = arith.maximumf %12, %13 : vector<8x128xf32>
    %c0_12 = arith.constant 0 : index
    %c0_13 = arith.constant 0 : index
    %15 = vector.load %arg6[%c0_12, %c0_13] : memref<128x128xf32, #tpu.memory_space<vmem>>, vector<128x128xf32>
    %cst_14 = arith.constant dense<0.000000e+00> : vector<8x128xf32>
    %16 = tpu.matmul %14, %15, %cst_14 {dimension_numbers = #tpu.dot_dimension_numbers<[1], [0], [0], [1], [0, 0, 1, 1], [], []>, precision = #tpu.contract_precision<fp32>} : vector<8x128xf32>, vector<128x128xf32>, vector<8x128xf32> -> vector<8x128xf32>
    %c0_15 = arith.constant 0 : index
    %c0_16 = arith.constant 0 : index
    %17 = vector.load %arg7[%c0_15, %c0_16] : memref<1x128xf32, #tpu.memory_space<vmem>>, vector<1x128xf32>
    %18 = vector.broadcast %17 : vector<1x128xf32> to vector<8x128xf32>
    %19 = arith.addf %16, %18 : vector<8x128xf32>
    %c0_17 = arith.constant 0 : index
    %c0_18 = arith.constant 0 : index
    %20 = vector.load %arg8[%c0_17, %c0_18] : memref<128x128xf32, #tpu.memory_space<vmem>>, vector<128x128xf32>
    %cst_19 = arith.constant dense<0.000000e+00> : vector<8x128xf32>
    %21 = tpu.matmul %14, %20, %cst_19 {dimension_numbers = #tpu.dot_dimension_numbers<[1], [0], [0], [1], [0, 0, 1, 1], [], []>, precision = #tpu.contract_precision<fp32>} : vector<8x128xf32>, vector<128x128xf32>, vector<8x128xf32> -> vector<8x128xf32>
    %c0_20 = arith.constant 0 : index
    %c0_21 = arith.constant 0 : index
    %22 = vector.load %arg9[%c0_20, %c0_21] : memref<1x128xf32, #tpu.memory_space<vmem>>, vector<1x128xf32>
    %23 = vector.broadcast %22 : vector<1x128xf32> to vector<8x128xf32>
    %24 = arith.addf %21, %23 : vector<8x128xf32>
    %25 = math.exp %24 : vector<8x128xf32>
    %c0_22 = arith.constant 0 : index
    %c0_23 = arith.constant 0 : index
    %26 = vector.load %arg10[%c0_22, %c0_23] : memref<8x128xf32, #tpu.memory_space<vmem>>, vector<8x128xf32>
    %27 = arith.mulf %25, %26 : vector<8x128xf32>
    %28 = arith.addf %19, %27 : vector<8x128xf32>
    %c0_24 = arith.constant 0 : index
    %c0_25 = arith.constant 0 : index
    %29 = vector.load %arg11[%c0_24, %c0_25] : memref<128x128xf32, #tpu.memory_space<vmem>>, vector<128x128xf32>
    %cst_26 = arith.constant dense<0.000000e+00> : vector<8x128xf32>
    %30 = tpu.matmul %28, %29, %cst_26 {dimension_numbers = #tpu.dot_dimension_numbers<[1], [0], [0], [1], [0, 0, 1, 1], [], []>, precision = #tpu.contract_precision<fp32>} : vector<8x128xf32>, vector<128x128xf32>, vector<8x128xf32> -> vector<8x128xf32>
    %c0_27 = arith.constant 0 : index
    %c0_28 = arith.constant 0 : index
    %31 = vector.load %arg12[%c0_27, %c0_28] : memref<1x128xf32, #tpu.memory_space<vmem>>, vector<1x128xf32>
    %32 = vector.broadcast %31 : vector<1x128xf32> to vector<8x128xf32>
    %33 = arith.addf %30, %32 : vector<8x128xf32>
    %cst_29 = arith.constant 0.000000e+00 : f32
    %34 = vector.broadcast %cst_29 : f32 to vector<8x128xf32>
    %35 = arith.maximumf %33, %34 : vector<8x128xf32>
    %c0_30 = arith.constant 0 : index
    %c0_31 = arith.constant 0 : index
    %36 = vector.load %arg13[%c0_30, %c0_31] : memref<128x128xf32, #tpu.memory_space<vmem>>, vector<128x128xf32>
    %cst_32 = arith.constant dense<0.000000e+00> : vector<8x128xf32>
    %37 = tpu.matmul %35, %36, %cst_32 {dimension_numbers = #tpu.dot_dimension_numbers<[1], [0], [0], [1], [0, 0, 1, 1], [], []>, precision = #tpu.contract_precision<fp32>} : vector<8x128xf32>, vector<128x128xf32>, vector<8x128xf32> -> vector<8x128xf32>
    %c0_33 = arith.constant 0 : index
    %c0_34 = arith.constant 0 : index
    %38 = vector.load %arg14[%c0_33, %c0_34] : memref<1x128xf32, #tpu.memory_space<vmem>>, vector<1x128xf32>
    %39 = vector.broadcast %38 : vector<1x128xf32> to vector<8x128xf32>
    %40 = arith.addf %37, %39 : vector<8x128xf32>
    %cst_35 = arith.constant 0.000000e+00 : f32
    %41 = vector.broadcast %cst_35 : f32 to vector<8x128xf32>
    %42 = arith.maximumf %40, %41 : vector<8x128xf32>
    %c0_36 = arith.constant 0 : index
    %c0_37 = arith.constant 0 : index
    %43 = vector.load %arg15[%c0_36, %c0_37] : memref<8x128xf32, #tpu.memory_space<vmem>>, vector<8x128xf32>
    tpu.vector_store %arg15[%c0_36, %c0_37], %42 {strides = array<i32>} : memref<8x128xf32, #tpu.memory_space<vmem>>, vector<8x128xf32>,
    %c0_38 = arith.constant 0 : index
    %c0_39 = arith.constant 0 : index
    %44 = vector.load %arg16[%c0_38, %c0_39] : memref<8x128xf32, #tpu.memory_space<vmem>>, vector<8x128xf32>
    tpu.vector_store %arg16[%c0_38, %c0_39], %19 {strides = array<i32>} : memref<8x128xf32, #tpu.memory_space<vmem>>, vector<8x128xf32>,
    %c0_40 = arith.constant 0 : index
    %c0_41 = arith.constant 0 : index
    %45 = vector.load %arg17[%c0_40, %c0_41] : memref<8x128xf32, #tpu.memory_space<vmem>>, vector<8x128xf32>
    tpu.vector_store %arg17[%c0_40, %c0_41], %24 {strides = array<i32>} : memref<8x128xf32, #tpu.memory_space<vmem>>, vector<8x128xf32>,
    return
  }
  func.func @transform_0(%arg0: i32) -> (i32, i32) {
    %c0_i32 = arith.constant 0 : i32
    %c0_i32_0 = arith.constant 0 : i32
    return %arg0, %c0_i32 : i32, i32
  }
  func.func @transform_1(%arg0: i32) -> (i32, i32) {
    %c0_i32 = arith.constant 0 : i32
    %c0_i32_0 = arith.constant 0 : i32
    %c0_i32_1 = arith.constant 0 : i32
    return %c0_i32, %c0_i32_0 : i32, i32
  }
  func.func @transform_2(%arg0: i32) -> (i32, i32) {
    %c0_i32 = arith.constant 0 : i32
    %c0_i32_0 = arith.constant 0 : i32
    %c0_i32_1 = arith.constant 0 : i32
    return %c0_i32, %c0_i32_0 : i32, i32
  }
  func.func @transform_3(%arg0: i32) -> (i32, i32) {
    %c0_i32 = arith.constant 0 : i32
    %c0_i32_0 = arith.constant 0 : i32
    %c0_i32_1 = arith.constant 0 : i32
    return %c0_i32, %c0_i32_0 : i32, i32
  }
  func.func @transform_4(%arg0: i32) -> (i32, i32) {
    %c0_i32 = arith.constant 0 : i32
    %c0_i32_0 = arith.constant 0 : i32
    %c0_i32_1 = arith.constant 0 : i32
    return %c0_i32, %c0_i32_0 : i32, i32
  }
  func.func @transform_5(%arg0: i32) -> (i32, i32) {
    %c0_i32 = arith.constant 0 : i32
    %c0_i32_0 = arith.constant 0 : i32
    %c0_i32_1 = arith.constant 0 : i32
    return %c0_i32, %c0_i32_0 : i32, i32
  }
  func.func @transform_6(%arg0: i32) -> (i32, i32) {
    %c0_i32 = arith.constant 0 : i32
    %c0_i32_0 = arith.constant 0 : i32
    %c0_i32_1 = arith.constant 0 : i32
    return %c0_i32, %c0_i32_0 : i32, i32
  }
  func.func @transform_7(%arg0: i32) -> (i32, i32) {
    %c0_i32 = arith.constant 0 : i32
    %c0_i32_0 = arith.constant 0 : i32
    %c0_i32_1 = arith.constant 0 : i32
    return %c0_i32, %c0_i32_0 : i32, i32
  }
  func.func @transform_8(%arg0: i32) -> (i32, i32) {
    %c0_i32 = arith.constant 0 : i32
    %c0_i32_0 = arith.constant 0 : i32
    %c0_i32_1 = arith.constant 0 : i32
    return %c0_i32, %c0_i32_0 : i32, i32
  }
  func.func @transform_9(%arg0: i32) -> (i32, i32) {
    %c0_i32 = arith.constant 0 : i32
    %c0_i32_0 = arith.constant 0 : i32
    return %arg0, %c0_i32 : i32, i32
  }
  func.func @transform_10(%arg0: i32) -> (i32, i32) {
    %c0_i32 = arith.constant 0 : i32
    %c0_i32_0 = arith.constant 0 : i32
    %c0_i32_1 = arith.constant 0 : i32
    return %c0_i32, %c0_i32_0 : i32, i32
  }
  func.func @transform_11(%arg0: i32) -> (i32, i32) {
    %c0_i32 = arith.constant 0 : i32
    %c0_i32_0 = arith.constant 0 : i32
    %c0_i32_1 = arith.constant 0 : i32
    return %c0_i32, %c0_i32_0 : i32, i32
  }
  func.func @transform_12(%arg0: i32) -> (i32, i32) {
    %c0_i32 = arith.constant 0 : i32
    %c0_i32_0 = arith.constant 0 : i32
    %c0_i32_1 = arith.constant 0 : i32
    return %c0_i32, %c0_i32_0 : i32, i32
  }
  func.func @transform_13(%arg0: i32) -> (i32, i32) {
    %c0_i32 = arith.constant 0 : i32
    %c0_i32_0 = arith.constant 0 : i32
    %c0_i32_1 = arith.constant 0 : i32
    return %c0_i32, %c0_i32_0 : i32, i32
  }
  func.func @transform_14(%arg0: i32) -> (i32, i32) {
    %c0_i32 = arith.constant 0 : i32
    %c0_i32_0 = arith.constant 0 : i32
    return %arg0, %c0_i32 : i32, i32
  }
  func.func @transform_15(%arg0: i32) -> (i32, i32) {
    %c0_i32 = arith.constant 0 : i32
    %c0_i32_0 = arith.constant 0 : i32
    return %arg0, %c0_i32 : i32, i32
  }
  func.func @transform_16(%arg0: i32) -> (i32, i32) {
    %c0_i32 = arith.constant 0 : i32
    %c0_i32_0 = arith.constant 0 : i32
    return %arg0, %c0_i32 : i32, i32
  }
}

</mosaic_0001>

<bundles_post_ra>
// kernel: tpu_custom_call.1
= control target key start
LH: loop header
LB: loop body
LE: loop exit
PB: predicated region body
PF: predicated region fallthrough
CT: control target
= control target key end

     0   :  { %s11083_s0 = inlined_call_operand.hbm [shape: f32[16,128], index: 0, kind: input, shape index: {}]   ;;  %s11084_s1 = inlined_call_operand.hbm [shape: f32[128,128], index: 1, kind: input, shape index: {}]   ;;  %s11085_s2 = inlined_call_operand.hbm [shape: f32[1,128], index: 2, kind: input, shape index: {}]   ;;  %s11086_s3 = inlined_call_operand.hbm [shape: f32[128,128], index: 3, kind: input, shape index: {}]   ;;  %s11087_s4 = inlined_call_operand.hbm [shape: f32[1,128], index: 4, kind: input, shape index: {}]   ;;  %s11088_s5 = inlined_call_operand.hbm [shape: f32[128,128], index: 5, kind: input, shape index: {}]   ;;  %s11089_s6 = inlined_call_operand.hbm [shape: f32[1,128], index: 6, kind: input, shape index: {}]   ;;  %s11090_s7 = inlined_call_operand.hbm [shape: f32[128,128], index: 7, kind: input, shape index: {}]   ;;  %s11091_s8 = inlined_call_operand.hbm [shape: f32[1,128], index: 8, kind: input, shape index: {}]   ;;  %s11092_s9 = inlined_call_operand.hbm [shape: f32[16,128], index: 9, kind: input, shape index: {}]   ;;  %s11093_s10 = inlined_call_operand.hbm [shape: f32[128,128], index: 10, kind: input, shape index: {}]   ;;  %s11094_s11 = inlined_call_operand.hbm [shape: f32[1,128], index: 11, kind: input, shape index: {}]   ;;  %s11095_s12 = inlined_call_operand.hbm [shape: f32[128,128], index: 12, kind: input, shape index: {}]   ;;  %s11096_s13 = inlined_call_operand.hbm [shape: f32[1,128], index: 13, kind: input, shape index: {}]   ;;  %s11097_s14 = inlined_call_operand.hbm [shape: f32[16,128], index: 14, kind: output, shape index: {0}]   ;;  %s11098_s15 = inlined_call_operand.hbm [shape: f32[16,128], index: 15, kind: output, shape index: {1}]   ;;  %s11099_s16 = inlined_call_operand.hbm [shape: f32[16,128], index: 16, kind: output, shape index: {2}]  }
   0x1   :  { %11223 = sst [smem:[#allocation60_spill]] %s11083_s0 }
   0x2   :  { %11224 = sst [smem:[#allocation61_spill]] %s11084_s1 }
   0x3   :  { %11225 = sst [smem:[#allocation62_spill]] %s11085_s2 }
   0x4   :  { %11226 = sst [smem:[#allocation63_spill]] %s11086_s3 }
   0x5   :  { %11227 = sst [smem:[#allocation64_spill]] %s11087_s4 }
   0x6   :  { %11228 = sst [smem:[#allocation65_spill]] %s11088_s5 }
   0x7   :  { %11229 = sst [smem:[#allocation66_spill]] %s11089_s6 }
   0x8   :  { %11230 = sst [smem:[#allocation67_spill]] %s11090_s7 }
   0x9   :  { %11231 = sst [smem:[#allocation68_spill]] %s11092_s9 }
   0xa   :  { %11232 = sst [smem:[#allocation69_spill]] %s11097_s14 }
   0xb   :  { %11233 = sst [smem:[#allocation70_spill]] %s11098_s15 }
   0xc   :  { %11234 = sst [smem:[#allocation71_spill]] %s11099_s16 }
   0xd   :  { %22 = vsyncpa [#allocation3], 0 }
   0xe   :  { %24 = vsyncpa [#allocation3 + $0x1], 0 }
   0xf   :  { %25 = vsyncpa [#allocation6], 0 }
  0x10   :  { %26 = vsyncpa [#allocation9], 0 }
  0x11   :  { %27 = vsyncpa [#allocation12], 0 }
  0x12   :  { %28 = vsyncpa [#allocation15], 0 }
  0x13   :  { %29 = vsyncpa [#allocation18], 0 }
  0x14   :  { %31 = vsyncpa [#allocation18 + $0x1], 0 }
  0x15   :  { %32 = vsyncpa [#allocation21], 0 }
  0x16   :  { %33 = vsyncpa [#allocation24], 0 }
  0x17   :  { %34 = vsyncpa [#allocation4], 0 }
  0x18   :  { %36 = vsyncpa [#allocation4 + $0x1], 0 }
  0x19   :  { %37 = vsyncpa [#allocation27], 0 }
  0x1a   :  { %39 = vsyncpa [#allocation27 + $0x1], 0  ;;  %s8774_s21 = smov 0   ;;  %s8776_s22 = smov 0  }
  0x1b   :  { %s8778_s23 = smov 0   ;;  %s8780_s24 = smov 0  }
  0x1c LB: > { %11235 = sst [smem:[#allocation40_spill]] %s8653_s21  ;;  %s8667_s25 = smov [#allocation5]   ;;  %s8665_s24 = sphi %s8780_s24, %s11419_s24   ;;  %s8661_s23 = sphi %s8778_s23, %s11418_s23   ;;  %s8657_s22 = sphi %s8776_s22, %s11417_s22   ;;  %s8653_s21 = sphi %s8774_s21, %s11416_s21  }
  0x1d   : > { %s444_s26 = sshll.u32 %s8667_s25, 4  ;;  %s8795_s27 = sadd.s32 4294967295, %s8665_s24   ;;  %s8800_s26 = int_to_ptr.vmem [resolvable:$true] %s444_s26 }
  0x1e   : > { %11236 = sst [smem:[#allocation41_spill]] %s8795_s27  ;;  %p5070_p0 = scmp.ge.s32.totalorder %s8665_s24, 1 }
  0x1f   : > { %p11109_p1 = scmp.eq.s32.totalorder %s8795_s27, 0  ;;  %p432_p2 = scmp.lt.s32.totalorder %s8665_s24, 3 }
  0x20   : > { %s8668_s29 = smov [#allocation8]   ;;  %s8669_s17 = smov [#allocation11]  }
  0x21   : > { %p8802_p3 = pnand %p5070_p0, %p432_p2  ;;  %s468_s30 = sshll.u32 %s8668_s29, 4  ;;  %s8815_s30 = int_to_ptr.vmem [resolvable:$true] %s468_s30 }
  0x22   : > { %s492_s18 = sshll.u32 %s8669_s17, 4  ;;  %s11240_s1 = sld [smem:[#allocation61_spill]]  ;;  %s8817_s18 = int_to_ptr.vmem [resolvable:$true] %s492_s18 }
  0x23   : > { %s11237_s28 = scalar_select %p8802_p3, 1, 0 }
  0x24   : > { %p7980_p5 = pneg %p8802_p3 }
  0x25   : > { %11238 = sst [smem:[#allocation42_spill]] %s11237_s28 }
  0x26   : > { %p8811_p6 = pnand %p7980_p5, %p11109_p1 }
  0x28   : > { %s8111_s25 = scalar_lea.hbm %s11240_s1, 2048  ;;  %p8827_p8 = pneg %p8811_p6 }
  0x29   : > { %p8112_p7 = scmp.ne.s32.totalorder %s11240_s1, %s8111_s25  ;;  %p8118_p11 = scmp.lt.u32.totalorder %s8111_s25, %s11240_s1 }
  0x2b   : > { %p8114_p9 = pnand %p8827_p8, %p8112_p7 }
  0x2d   : > { %p8115_p10 = pneg %p8114_p9 }
  0x2f   : > { %p8120_p12 = pnand %p8118_p11, %p8115_p10 }
  0x31   : > { %8123 = shalt.err (!%p8120_p12)
}
  0x32   : > { %s8124_s14 = scalar_lea.vmem %s8800_s26, 2048  ;;  %p8132_p5 = scmp.lt.s32.totalorder %s8800_s26, %s8800_s26 }
  0x33   : > { %p8125_p13 = scmp.ne.s32.totalorder %s8800_s26, %s8124_s14  ;;  %p8133_p4 = scmp.lt.s32.totalorder %s8124_s14, %s8124_s14 }
  0x35   : > { %p8127_p0 = pnand %p8125_p13, %p8827_p8  ;;  %p8134_p7 = por %p8133_p4, %p8132_p5 }
  0x37   : > { %p8128_p2 = pneg %p8127_p0 }
  0x39   : > { %p8135_p9 = pnand %p8134_p7, %p8128_p2 }
  0x3b   : > { %8138 = shalt.err (!%p8135_p9)
}
  0x3c   : > { %s8670_s16 = smov 128   ;;  %s8671_s15 = smov 8  }
  0x3d   : > { %7983 = dma.hbm_to_vmem [thread:$0]  (!%p8811_p6), %s11240_s1, 2048, %s8800_s26, [#allocation6], %s8670_s16, %s8670_s16, %s8671_s15  }
  0x3e   : > { %s11242_s3 = sld [smem:[#allocation63_spill]] }
  0x44   : > { %s8139_s14 = scalar_lea.hbm %s11242_s3, 2048 }
  0x45   : > { %p8140_p4 = scmp.ne.s32.totalorder %s11242_s3, %s8139_s14  ;;  %p8146_p12 = scmp.lt.u32.totalorder %s8139_s14, %s11242_s3 }
  0x47   : > { %p8142_p10 = pnand %p8140_p4, %p8827_p8 }
  0x49   : > { %p8143_p11 = pneg %p8142_p10 }
  0x4b   : > { %p8148_p13 = pnand %p8146_p12, %p8143_p11 }
  0x4d   : > { %8151 = shalt.err (!%p8148_p13)
}
  0x4e   : > { %s8152_s26 = scalar_lea.vmem %s8815_s30, 2048  ;;  %p8160_p7 = scmp.lt.s32.totalorder %s8815_s30, %s8815_s30 }
  0x4f   : > { %p8153_p0 = scmp.ne.s32.totalorder %s8815_s30, %s8152_s26  ;;  %p8161_p9 = scmp.lt.s32.totalorder %s8152_s26, %s8152_s26 }
  0x51   : > { %p8155_p2 = pnand %p8153_p0, %p8827_p8  ;;  %p8162_p4 = por %p8161_p9, %p8160_p7 }
  0x53   : > { %p8156_p5 = pneg %p8155_p2 }
  0x55   : > { %p8163_p10 = pnand %p8162_p4, %p8156_p5 }
  0x57   : > { %8166 = shalt.err (!%p8163_p10)
}
  0x58   : > { %7989 = dma.hbm_to_vmem [thread:$0]  (!%p8811_p6), %s11242_s3, 2048, %s8815_s30, [#allocation9], %s8670_s16, %s8670_s16, %s8671_s15  }
  0x59   : > { %s11243_s5 = sld [smem:[#allocation65_spill]] }
  0x5f   : > { %s8167_s19 = scalar_lea.hbm %s11243_s5, 2048 }
  0x60   : > { %p8168_p11 = scmp.ne.s32.totalorder %s11243_s5, %s8167_s19  ;;  %p8174_p0 = scmp.lt.u32.totalorder %s8167_s19, %s11243_s5 }
  0x62   : > { %p8170_p12 = pnand %p8168_p11, %p8827_p8 }
  0x64   : > { %p8171_p13 = pneg %p8170_p12 }
  0x66   : > { %p8176_p2 = pnand %p8174_p0, %p8171_p13 }
  0x68   : > { %8179 = shalt.err (!%p8176_p2)
}
  0x69   : > { %s8180_s30 = scalar_lea.vmem %s8817_s18, 2048  ;;  %p8188_p4 = scmp.lt.s32.totalorder %s8817_s18, %s8817_s18 }
  0x6a   : > { %p8181_p5 = scmp.ne.s32.totalorder %s8817_s18, %s8180_s30  ;;  %p8189_p10 = scmp.lt.s32.totalorder %s8180_s30, %s8180_s30 }
  0x6c   : > { %p8183_p7 = pnand %p8181_p5, %p8827_p8  ;;  %p8190_p11 = por %p8189_p10, %p8188_p4 }
  0x6e   : > { %p8184_p9 = pneg %p8183_p7 }
  0x70   : > { %p8191_p12 = pnand %p8190_p11, %p8184_p9 }
  0x72   : > { %8194 = shalt.err (!%p8191_p12)
}
  0x73   : > { %7995 = dma.hbm_to_vmem [thread:$0]  (!%p8811_p6), %s11243_s5, 2048, %s8817_s18, [#allocation12], %s8670_s16, %s8670_s16, %s8671_s15  }
  0x74   : > { %s8672_s21 = smov [#allocation14]   ;;  %s8673_s28 = smov [#allocation19]  }
  0x75   : > { %s516_s27 = sshll.u32 %s8672_s21, 4  ;;  %s540_s19 = sshll.u32 %s8673_s28, 4  ;;  %s517_s27 = int_to_ptr.vmem [resolvable:$true] %s516_s27  ;;  %s541_s19 = int_to_ptr.vmem [resolvable:$true] %s540_s19 }
  0x76   : > { %s11244_s7 = sld [smem:[#allocation67_spill]] }
  0x7c   : > { %s8195_s17 = scalar_lea.hbm %s11244_s7, 2048 }
  0x7d   : > { %p8196_p13 = scmp.ne.s32.totalorder %s11244_s7, %s8195_s17  ;;  %p8202_p5 = scmp.lt.u32.totalorder %s8195_s17, %s11244_s7 }
  0x7f   : > { %p8198_p0 = pnand %p8196_p13, %p8827_p8 }
  0x81   : > { %p8199_p2 = pneg %p8198_p0 }
  0x83   : > { %p8204_p7 = pnand %p8202_p5, %p8199_p2 }
  0x85   : > { %8207 = shalt.err (!%p8204_p7)
}
  0x86   : > { %s8208_s18 = scalar_lea.vmem %s517_s27, 2048  ;;  %p8216_p11 = scmp.lt.s32.totalorder %s517_s27, %s517_s27 }
  0x87   : > { %p8209_p9 = scmp.ne.s32.totalorder %s517_s27, %s8208_s18  ;;  %p8217_p12 = scmp.lt.s32.totalorder %s8208_s18, %s8208_s18 }
  0x89   : > { %p8211_p4 = pnand %p8209_p9, %p8827_p8  ;;  %p8218_p1 = por %p8217_p12, %p8216_p11 }
  0x8b   : > { %p8212_p10 = pneg %p8211_p4 }
  0x8d   : > { %p8219_p3 = pnand %p8218_p1, %p8212_p10 }
  0x8f   : > { %8222 = shalt.err (!%p8219_p3)
}
  0x90   : > { %8001 = dma.hbm_to_vmem [thread:$0]  (!%p8811_p6), %s11244_s7, 2048, %s517_s27, [#allocation15], %s8670_s16, %s8670_s16, %s8671_s15  }
  0x91   : > { %s8223_s20 = scalar_lea.hbm %s11093_s10, 2048 }
  0x92   : > { %p8224_p1 = scmp.ne.s32.totalorder %s11093_s10, %s8223_s20  ;;  %p8230_p0 = scmp.lt.u32.totalorder %s8223_s20, %s11093_s10 }
  0x94   : > { %p8226_p3 = pnand %p8224_p1, %p8827_p8 }
  0x96   : > { %p8227_p13 = pneg %p8226_p3 }
  0x98   : > { %p8232_p2 = pnand %p8230_p0, %p8227_p13 }
  0x9a   : > { %8235 = shalt.err (!%p8232_p2)
}
  0x9b   : > { %s8236_s26 = scalar_lea.vmem %s541_s19, 2048  ;;  %p8244_p4 = scmp.lt.s32.totalorder %s541_s19, %s541_s19 }
  0x9c   : > { %p8237_p5 = scmp.ne.s32.totalorder %s541_s19, %s8236_s26  ;;  %p8245_p10 = scmp.lt.s32.totalorder %s8236_s26, %s8236_s26 }
  0x9e   : > { %p8239_p7 = pnand %p8237_p5, %p8827_p8  ;;  %p8246_p11 = por %p8245_p10, %p8244_p4 }
  0xa0   : > { %p8240_p9 = pneg %p8239_p7 }
  0xa2   : > { %p8247_p12 = pnand %p8246_p11, %p8240_p9 }
  0xa4   : > { %8250 = shalt.err (!%p8247_p12)
}
  0xa5   : > { %8007 = dma.hbm_to_vmem [thread:$0]  (!%p8811_p6), %s11093_s10, 2048, %s541_s19, [#allocation18], %s8670_s16, %s8670_s16, %s8671_s15  }
  0xa6   : > { %s8674_s1 = smov [#allocation20]   ;;  %s8675_s21 = smov [#allocation7]  }
  0xa7   : > { %s554_s9 = sshll.u32 %s8674_s1, 4  ;;  %s458_s28 = sshll.u32 %s8675_s21, 4  ;;  %s555_s9 = int_to_ptr.vmem [resolvable:$true] %s554_s9  ;;  %s459_s28 = int_to_ptr.vmem [resolvable:$true] %s458_s28 }
  0xa8   : > { %s8251_s17 = scalar_lea.hbm %s11094_s11, 16 }
  0xa9   : > { %p8252_p1 = scmp.ne.s32.totalorder %s11094_s11, %s8251_s17  ;;  %p8258_p0 = scmp.lt.u32.totalorder %s8251_s17, %s11094_s11 }
  0xab   : > { %p8254_p3 = pnand %p8252_p1, %p8827_p8 }
  0xad   : > { %p8255_p13 = pneg %p8254_p3 }
  0xaf   : > { %p8260_p2 = pnand %p8258_p0, %p8255_p13 }
  0xb1   : > { %8263 = shalt.err (!%p8260_p2)
}
  0xb2   : > { %s8264_s19 = scalar_lea.vmem %s555_s9, 16  ;;  %s8271_s18 = scalar_lea.vmem %s555_s9, 32 }
  0xb3   : > { %p8265_p5 = scmp.ne.s32.totalorder %s555_s9, %s8264_s19  ;;  %p8272_p4 = scmp.lt.s32.totalorder %s555_s9, %s555_s9 }
  0xb4   : > { %p8273_p10 = scmp.lt.s32.totalorder %s8271_s18, %s8264_s19 }
  0xb5   : > { %p8267_p7 = pnand %p8265_p5, %p8827_p8 }
  0xb6   : > { %p8274_p11 = por %p8273_p10, %p8272_p4 }
  0xb7   : > { %p8268_p9 = pneg %p8267_p7 }
  0xb9   : > { %p8275_p12 = pnand %p8274_p11, %p8268_p9 }
  0xbb   : > { %8278 = shalt.err (!%p8275_p12)
}
  0xbc   : > { %8010 = dma.hbm_to_vmem [thread:$0]  (!%p8811_p6), %s11094_s11, 16, %s555_s9, [#allocation21]  }
  0xbd   : > { %s11245_s2 = sld [smem:[#allocation62_spill]] }
  0xc3   : > { %s8279_s17 = scalar_lea.hbm %s11245_s2, 16 }
  0xc4   : > { %p8280_p1 = scmp.ne.s32.totalorder %s11245_s2, %s8279_s17  ;;  %p8286_p0 = scmp.lt.u32.totalorder %s8279_s17, %s11245_s2 }
  0xc6   : > { %p8282_p3 = pnand %p8280_p1, %p8827_p8 }
  0xc8   : > { %p8283_p13 = pneg %p8282_p3 }
  0xca   : > { %p8288_p2 = pnand %p8286_p0, %p8283_p13 }
  0xcc   : > { %8291 = shalt.err (!%p8288_p2)
}
  0xcd   : > { %s8292_s19 = scalar_lea.vmem %s459_s28, 16  ;;  %s8299_s9 = scalar_lea.vmem %s459_s28, 32 }
  0xce   : > { %p8293_p5 = scmp.ne.s32.totalorder %s459_s28, %s8292_s19  ;;  %p8300_p4 = scmp.lt.s32.totalorder %s459_s28, %s459_s28 }
  0xcf   : > { %p8301_p10 = scmp.lt.s32.totalorder %s8299_s9, %s8292_s19 }
  0xd0   : > { %p8295_p7 = pnand %p8293_p5, %p8827_p8 }
  0xd1   : > { %p8302_p11 = por %p8301_p10, %p8300_p4 }
  0xd2   : > { %p8296_p9 = pneg %p8295_p7 }
  0xd4   : > { %p8303_p12 = pnand %p8302_p11, %p8296_p9 }
  0xd6   : > { %8306 = shalt.err (!%p8303_p12)
}
  0xd7   : > { %7986 = dma.hbm_to_vmem [thread:$0]  (!%p8811_p6), %s11245_s2, 16, %s459_s28, [#allocation6]  }
  0xd8   : > { %s8676_s21 = smov [#allocation10]   ;;  %s8677_s25 = smov [#allocation13]  }
  0xd9   : > { %s482_s20 = sshll.u32 %s8676_s21, 4  ;;  %s506_s17 = sshll.u32 %s8677_s25, 4  ;;  %s483_s20 = int_to_ptr.vmem [resolvable:$true] %s482_s20  ;;  %s507_s17 = int_to_ptr.vmem [resolvable:$true] %s506_s17 }
  0xda   : > { %s11246_s4 = sld [smem:[#allocation64_spill]] }
  0xe0   : > { %s8307_s26 = scalar_lea.hbm %s11246_s4, 16 }
  0xe1   : > { %p8308_p1 = scmp.ne.s32.totalorder %s11246_s4, %s8307_s26  ;;  %p8314_p0 = scmp.lt.u32.totalorder %s8307_s26, %s11246_s4 }
  0xe3   : > { %p8310_p3 = pnand %p8308_p1, %p8827_p8 }
  0xe5   : > { %p8311_p13 = pneg %p8310_p3 }
  0xe7   : > { %p8316_p2 = pnand %p8314_p0, %p8311_p13 }
  0xe9   : > { %8319 = shalt.err (!%p8316_p2)
}
  0xea   : > { %s8320_s28 = scalar_lea.vmem %s483_s20, 16  ;;  %s8327_s1 = scalar_lea.vmem %s483_s20, 32 }
  0xeb   : > { %p8321_p5 = scmp.ne.s32.totalorder %s483_s20, %s8320_s28  ;;  %p8328_p4 = scmp.lt.s32.totalorder %s483_s20, %s483_s20 }
  0xec   : > { %p8329_p10 = scmp.lt.s32.totalorder %s8327_s1, %s8320_s28 }
  0xed   : > { %p8323_p7 = pnand %p8321_p5, %p8827_p8 }
  0xee   : > { %p8330_p11 = por %p8329_p10, %p8328_p4 }
  0xef   : > { %p8324_p9 = pneg %p8323_p7 }
  0xf1   : > { %p8331_p12 = pnand %p8330_p11, %p8324_p9 }
  0xf3   : > { %8334 = shalt.err (!%p8331_p12)
}
  0xf4   : > { %7992 = dma.hbm_to_vmem [thread:$0]  (!%p8811_p6), %s11246_s4, 16, %s483_s20, [#allocation9]  }
  0xf5   : > { %s11247_s6 = sld [smem:[#allocation66_spill]] }
  0xfb   : > { %s8335_s26 = scalar_lea.hbm %s11247_s6, 16 }
  0xfc   : > { %p8336_p1 = scmp.ne.s32.totalorder %s11247_s6, %s8335_s26  ;;  %p8342_p0 = scmp.lt.u32.totalorder %s8335_s26, %s11247_s6 }
  0xfe   : > { %p8338_p3 = pnand %p8336_p1, %p8827_p8 }
 0x100   : > { %p8339_p13 = pneg %p8338_p3 }
 0x102   : > { %p8344_p2 = pnand %p8342_p0, %p8339_p13 }
 0x104   : > { %8347 = shalt.err (!%p8344_p2)
}
 0x105   : > { %s8348_s28 = scalar_lea.vmem %s507_s17, 16  ;;  %s8355_s20 = scalar_lea.vmem %s507_s17, 32 }
 0x106   : > { %p8349_p5 = scmp.ne.s32.totalorder %s507_s17, %s8348_s28  ;;  %p8356_p4 = scmp.lt.s32.totalorder %s507_s17, %s507_s17 }
 0x107   : > { %p8357_p10 = scmp.lt.s32.totalorder %s8355_s20, %s8348_s28 }
 0x108   : > { %p8351_p7 = pnand %p8349_p5, %p8827_p8 }
 0x109   : > { %p8358_p11 = por %p8357_p10, %p8356_p4 }
 0x10a   : > { %p8352_p9 = pneg %p8351_p7 }
 0x10c   : > { %p8359_p12 = pnand %p8358_p11, %p8352_p9 }
 0x10e   : > { %8362 = shalt.err (!%p8359_p12)
}
 0x10f   : > { %7998 = dma.hbm_to_vmem [thread:$0]  (!%p8811_p6), %s11247_s6, 16, %s507_s17, [#allocation12]  }
 0x110   : > { %s8678_s25 = smov [#allocation16]   ;;  %s8679_s30 = smov [#allocation22]  }
 0x111   : > { %s530_s14 = sshll.u32 %s8678_s25, 4  ;;  %s564_s26 = sshll.u32 %s8679_s30, 4  ;;  %s531_s14 = int_to_ptr.vmem [resolvable:$true] %s530_s14  ;;  %s565_s26 = int_to_ptr.vmem [resolvable:$true] %s564_s26 }
 0x112   : > { %s8363_s9 = scalar_lea.hbm %s11091_s8, 16 }
 0x113   : > { %p8364_p1 = scmp.ne.s32.totalorder %s11091_s8, %s8363_s9  ;;  %p8370_p0 = scmp.lt.u32.totalorder %s8363_s9, %s11091_s8 }
 0x115   : > { %p8366_p3 = pnand %p8364_p1, %p8827_p8 }
 0x117   : > { %p8367_p13 = pneg %p8366_p3 }
 0x119   : > { %p8372_p2 = pnand %p8370_p0, %p8367_p13 }
 0x11b   : > { %8375 = shalt.err (!%p8372_p2)
}
 0x11c   : > { %s8376_s17 = scalar_lea.vmem %s531_s14, 16  ;;  %s8383_s21 = scalar_lea.vmem %s531_s14, 32 }
 0x11d   : > { %p8377_p5 = scmp.ne.s32.totalorder %s531_s14, %s8376_s17  ;;  %p8384_p4 = scmp.lt.s32.totalorder %s531_s14, %s531_s14 }
 0x11e   : > { %p8385_p10 = scmp.lt.s32.totalorder %s8383_s21, %s8376_s17 }
 0x11f   : > { %p8379_p7 = pnand %p8377_p5, %p8827_p8 }
 0x120   : > { %p8386_p11 = por %p8385_p10, %p8384_p4 }
 0x121   : > { %p8380_p9 = pneg %p8379_p7 }
 0x123   : > { %p8387_p12 = pnand %p8386_p11, %p8380_p9 }
 0x125   : > { %8390 = shalt.err (!%p8387_p12)
}
 0x126   : > { %8004 = dma.hbm_to_vmem [thread:$0]  (!%p8811_p6), %s11091_s8, 16, %s531_s14, [#allocation15]  }
 0x127   : > { %s8391_s9 = scalar_lea.hbm %s11095_s12, 2048 }
 0x128   : > { %p8392_p1 = scmp.ne.s32.totalorder %s11095_s12, %s8391_s9  ;;  %p8398_p0 = scmp.lt.u32.totalorder %s8391_s9, %s11095_s12 }
 0x12a   : > { %p8394_p3 = pnand %p8392_p1, %p8827_p8 }
 0x12c   : > { %p8395_p13 = pneg %p8394_p3 }
 0x12e   : > { %p8400_p2 = pnand %p8398_p0, %p8395_p13 }
 0x130   : > { %8403 = shalt.err (!%p8400_p2)
}
 0x131   : > { %s8404_s17 = scalar_lea.vmem %s565_s26, 2048  ;;  %p8412_p4 = scmp.lt.s32.totalorder %s565_s26, %s565_s26 }
 0x132   : > { %p8405_p5 = scmp.ne.s32.totalorder %s565_s26, %s8404_s17  ;;  %p8413_p10 = scmp.lt.s32.totalorder %s8404_s17, %s8404_s17 }
 0x134   : > { %p8407_p7 = pnand %p8405_p5, %p8827_p8  ;;  %p8414_p11 = por %p8413_p10, %p8412_p4 }
 0x136   : > { %p8408_p9 = pneg %p8407_p7 }
 0x138   : > { %p8415_p12 = pnand %p8414_p11, %p8408_p9 }
 0x13a   : > { %8418 = shalt.err (!%p8415_p12)
}
 0x13b   : > { %8013 = dma.hbm_to_vmem [thread:$0]  (!%p8811_p6), %s11095_s12, 2048, %s565_s26, [#allocation21], %s8670_s16, %s8670_s16, %s8671_s15  }
 0x13c   : > { %s8680_s25 = smov [#allocation23]   ;;  %s8419_s9 = scalar_lea.hbm %s11096_s13, 16 }
 0x13d   : > { %s578_s30 = sshll.u32 %s8680_s25, 4  ;;  %p8420_p1 = scmp.ne.s32.totalorder %s11096_s13, %s8419_s9  ;;  %s579_s30 = int_to_ptr.vmem [resolvable:$true] %s578_s30 }
 0x13e   : > { %p8426_p0 = scmp.lt.u32.totalorder %s8419_s9, %s11096_s13 }
 0x13f   : > { %p8422_p3 = pnand %p8420_p1, %p8827_p8 }
 0x141   : > { %p8423_p13 = pneg %p8422_p3 }
 0x143   : > { %p8428_p2 = pnand %p8426_p0, %p8423_p13 }
 0x145   : > { %8431 = shalt.err (!%p8428_p2)
}
 0x146   : > { %s8432_s16 = scalar_lea.vmem %s579_s30, 16  ;;  %s8439_s15 = scalar_lea.vmem %s579_s30, 32 }
 0x147   : > { %p8433_p5 = scmp.ne.s32.totalorder %s579_s30, %s8432_s16  ;;  %p8440_p4 = scmp.lt.s32.totalorder %s579_s30, %s579_s30 }
 0x148   : > { %p8441_p10 = scmp.lt.s32.totalorder %s8439_s15, %s8432_s16 }
 0x149   : > { %p8435_p7 = pnand %p8433_p5, %p8827_p8 }
 0x14a   : > { %p8442_p11 = por %p8441_p10, %p8440_p4 }
 0x14b   : > { %p8436_p9 = pneg %p8435_p7 }
 0x14d   : > { %p8443_p12 = pnand %p8442_p11, %p8436_p9 }
 0x14f   : > { %8446 = shalt.err (!%p8443_p12)
}
 0x150   : > { %s11248_s29 = sld [smem:[#allocation40_spill]]  ;;  %s11249_s14 = sld [smem:[#allocation41_spill]] }
 0x151   : > { %8016 = dma.hbm_to_vmem [thread:$0]  (!%p8811_p6), %s11096_s13, 16, %s579_s30, [#allocation24]  }
 0x152   : > { %s11111_s0 = sadd.s32 4294967294, %s8665_s24   ;;  %s9076_s21 = sadd.s32 1, %s8665_s24  }
 0x153   : > { %s49_s25 = ssub.s32 %s8665_s24, %s9076_s21  ;;  %s52_s27 = sadd.s32 1, %s8661_s23 }
 0x154   : > { %p50_p8 = scmp.eq.s32.totalorder %s49_s25, 0  ;;  %p59_p1 = scmp.ne.s32.totalorder %s8661_s23, %s8657_s22 }
 0x155   : > { %p60_p3 = scmp.eq.s32.totalorder %s8665_s24, 0  ;;  %p373_p7 = scmp.eq.s32.totalorder %s11111_s0, 1 }
 0x156   : > { %p65_p13 = scmp.ne.s32.totalorder %s8657_s22, %s11248_s29  ;;  %p11251_p2 = scmp.eq.s32.totalorder %s11249_s14, 0 }
 0x157   : > { %s9087_s19 = scalar_select %p50_p8, %s8661_s23, %s52_s27  }
 0x158   : > { %p9089_p0 = por %p60_p3, %p59_p1  ;;  %p9095_p6 = por %p11251_p2, %p65_p13 }
 0x159   : > { %p367_p5 = scmp.eq.s32.totalorder %s11249_s14, 1  ;;  %p8046_p9 = scmp.lt.s32.totalorder %s8665_s24, 2 }
 0x15a   : > { %s11252_s30 = scalar_select %p9095_p6, 1, 0 }
 0x15b   : > { %s589_s18 = sand.u32 1, %s8661_s23   ;;  %p9104_p4 = por %p367_p5, %p59_p1 }
 0x15c   : > { %p9108_p10 = por %p373_p7, %p65_p13  ;;  %s9112_s1 = sshll.u32 %s589_s18, 3 }
 0x15d   : > { %s11253_s28 = scalar_select %p9104_p4, 1, 0 }
 0x15e   : > { %s11254_s20 = scalar_select %p9108_p10, 1, 0 }
 0x15f   : > { %s5085_s16 = sshll.u32 %s8665_s24, 7  ;;  %s11255_s17 = sld [smem:[#allocation60_spill]] }
 0x160   : > { %s593_s14 = scalar_lea.vmem [#allocation2], %s9112_s1  ;;  %p9125_p11 = pnand %p8046_p9, %p9089_p0 }
 0x161   : > { %s600_s25 = sshll.u32 %s593_s14, 4  ;;  %s11257_s3 = sld [smem:[#allocation68_spill]]  ;;  %s9121_s25 = int_to_ptr.vmem [resolvable:$true] %s600_s25 }
 0x162   : > { %s607_s26 = sand.u32 1, %s8665_s24   ;;  %s590_s4 = scalar_lea.sflag [#allocation3], %s589_s18 }
 0x163   : > { %p8449_p8 = pneg %p9125_p11 }
 0x165   : > { %s9118_s29 = scalar_lea.hbm %s11255_s17, %s5085_s16  ;;  %s8452_s6 = scalar_lea.hbm %s11255_s17, 256 }
 0x166   : > { %s8447_s5 = scalar_lea.hbm %s9118_s29, 128  ;;  %p8453_p13 = scmp.lt.u32.totalorder %s9118_s29, %s11255_s17 }
 0x167   : > { %s9132_s15 = scalar_lea.hbm %s11257_s3, %s5085_s16  ;;  %p8448_p12 = scmp.ne.s32.totalorder %s9118_s29, %s8447_s5 }
 0x168   : > { %p8454_p0 = scmp.lt.u32.totalorder %s8452_s6, %s8447_s5  ;;  %p8456_p5 = scmp.lt.u32.totalorder %s8447_s5, %s9118_s29 }
 0x169   : > { %p8450_p1 = pnand %p8449_p8, %p8448_p12 }
 0x16a   : > { %p8455_p2 = por %p8454_p0, %p8453_p13 }
 0x16b   : > { %p8451_p3 = pneg %p8450_p1 }
 0x16c   : > { %p8457_p7 = por %p8456_p5, %p8455_p2 }
 0x16e   : > { %p8458_p9 = pnand %p8457_p7, %p8451_p3 }
 0x170   : > { %8461 = shalt.err (!%p8458_p9)
}
 0x171   : > { %s8462_s0 = scalar_lea.vmem %s9121_s25, 128  ;;  %s8681_s18 = smov [#allocation2]  }
 0x172   : > { %p8463_p12 = scmp.ne.s32.totalorder %s9121_s25, %s8462_s0  ;;  %s8467_s16 = sshll.u32 %s8681_s18, 4  ;;  %s8468_s16 = int_to_ptr.vmem [resolvable:$false] %s8467_s16 }
 0x173   : > { %s8469_s7 = scalar_lea.vmem %s8468_s16, 256  ;;  %p8470_p4 = scmp.lt.s32.totalorder %s9121_s25, %s8468_s16 }
 0x174   : > { %p8465_p1 = pnand %p8463_p12, %p8449_p8  ;;  %p8471_p13 = scmp.lt.s32.totalorder %s8469_s7, %s8462_s0 }
 0x176   : > { %p8466_p10 = pneg %p8465_p1  ;;  %p8472_p0 = por %p8471_p13, %p8470_p4 }
 0x178   : > { %p8473_p2 = pnand %p8472_p0, %p8466_p10 }
 0x17a   : > { %8476 = shalt.err (!%p8473_p2)
}
 0x17b   : > { %8020 = dma.hbm_to_vmem [thread:$0]  (!%p9125_p11), %s9118_s29, 128, %s9121_s25, %s590_s4  }
 0x17c   : > { %s611_s5 = scalar_lea.vmem [#allocation17], %s9112_s1  ;;  %s608_s9 = scalar_lea.sflag [#allocation18], %s607_s26 }
 0x17d   : > { %s618_s6 = sshll.u32 %s611_s5, 4  ;;  %s8477_s14 = scalar_lea.hbm %s9132_s15, 128  ;;  %s619_s6 = int_to_ptr.vmem [resolvable:$true] %s618_s6 }
 0x17e   : > { %p8478_p4 = scmp.ne.s32.totalorder %s9132_s15, %s8477_s14  ;;  %s8482_s18 = scalar_lea.hbm %s11257_s3, 256 }
 0x17f   : > { %p8483_p5 = scmp.lt.u32.totalorder %s9132_s15, %s11257_s3  ;;  %p8484_p7 = scmp.lt.u32.totalorder %s8482_s18, %s8477_s14 }
 0x180   : > { %p8480_p10 = pnand %p8478_p4, %p8449_p8  ;;  %p8486_p12 = scmp.lt.u32.totalorder %s8477_s14, %s9132_s15 }
 0x181   : > { %p8485_p9 = por %p8484_p7, %p8483_p5 }
 0x182   : > { %p8481_p3 = pneg %p8480_p10 }
 0x183   : > { %p8487_p1 = por %p8486_p12, %p8485_p9 }
 0x185   : > { %p8488_p13 = pnand %p8487_p1, %p8481_p3 }
 0x187   : > { %8491 = shalt.err (!%p8488_p13)
}
 0x188   : > { %s8492_s4 = scalar_lea.vmem %s619_s6, 128  ;;  %s8682_s1 = smov [#allocation17]  }
 0x189   : > { %p8493_p0 = scmp.ne.s32.totalorder %s619_s6, %s8492_s4  ;;  %s8497_s29 = sshll.u32 %s8682_s1, 4  ;;  %s8498_s29 = int_to_ptr.vmem [resolvable:$false] %s8497_s29 }
 0x18a   : > { %s8499_s25 = scalar_lea.vmem %s8498_s29, 256  ;;  %p8500_p10 = scmp.lt.s32.totalorder %s619_s6, %s8498_s29 }
 0x18b   : > { %p8495_p2 = pnand %p8493_p0, %p8449_p8  ;;  %p8501_p6 = scmp.lt.s32.totalorder %s8499_s25, %s8492_s4 }
 0x18d   : > { %p8496_p4 = pneg %p8495_p2  ;;  %p8502_p5 = por %p8501_p6, %p8500_p10 }
 0x18f   : > { %p8503_p7 = pnand %p8502_p5, %p8496_p4 }
 0x191   : > { %8506 = shalt.err (!%p8503_p7)
}
 0x192   : > { %8023 = dma.hbm_to_vmem [thread:$0]  (!%p9125_p11), %s9132_s15, 128, %s619_s6, %s608_s9  }
 0x193   : > { %s11258_s26 = sld [smem:[#allocation42_spill]] }
 0x199   : > { %p11259_p3 = scmp.ne.s32.totalorder %s11258_s26, 0 }
 0x19b   : > { %627 = sbr.rel (%p11259_p3) target bundleno = 2439 (0x987), region = 76 }
 0x1a2   : > { %s9185_s5 = sand.u32 1, %s8657_s22   ;;  %p11260_p6 = scmp.ne.s32.totalorder %s11252_s30, 0 }
 0x1a3   : > { %s9188_s14 = sshll.u32 %s9185_s5, 3  ;;  %s630_s2 = scalar_lea.sflag [#allocation3], %s9185_s5 }
 0x1a4   : > { %s633_s0 = scalar_lea.vmem [#allocation2], %s9188_s14 }
 0x1a5   : > { %8608 = dma.done.wait (%p11260_p6), %s630_s2, 128  }
 0x1a6   : > { %8610 = vsyncadd (%p11260_p6), %s630_s2, 4294967168  ;;  %s11261_s27 = sld [smem:[#allocation41_spill]] }
 0x1ac   : > { %p11262_p11 = scmp.eq.s32.totalorder %s11261_s27, 0 }
 0x1ae   : > { %8612 = dma.done.wait (%p11262_p11), [#allocation6], 2064   ;;  %p11263_p8 = pmov %p11262_p11 }
 0x1b0   : > { %8614 = vsyncadd (%p11263_p8), [#allocation6], 4294965232  ;;  %p11264_p9 = pmov %p11263_p8 }
 0x1b1   : > { %p11265_p12 = pmov %p11263_p8 }
 0x1b2   : > { %8616 = dma.done.wait (%p11264_p9), [#allocation9], 2064  }
 0x1b3   : > { %8618 = vsyncadd (%p11265_p12), [#allocation9], 4294965232  ;;  %p11266_p1 = pmov %p11263_p8 }
 0x1b5   : > { %8620 = dma.done.wait (%p11266_p1), [#allocation12], 2064   ;;  %p11267_p13 = pmov %p11266_p1 }
 0x1b6   : > { %p11268_p0 = pmov %p11266_p1 }
 0x1b7   : > { %8622 = vsyncadd (%p11267_p13), [#allocation12], 4294965232 }
 0x1b8   : > { %8624 = dma.done.wait (%p11268_p0), [#allocation15], 2064   ;;  %p11269_p2 = pmov %p11268_p0 }
 0x1b9   : > { %s670_s15 = sand.u32 1, %s11261_s27   ;;  %s674_s9 = scalar_lea.vmem [#allocation17], %s9188_s14 }
 0x1ba   : > { %8626 = vsyncadd (%p11269_p2), [#allocation15], 4294965232  ;;  %s671_s6 = scalar_lea.sflag [#allocation18], %s670_s15 }
 0x1bb   : > { %8628 = dma.done.wait (%p11260_p6), %s671_s6, 128  }
 0x1bc   : > { %8630 = vsyncadd (%p11260_p6), %s671_s6, 4294967168  ;;  %p11270_p4 = pmov %p11268_p0 }
 0x1bd   : > { %p11271_p10 = pmov %p11268_p0 }
 0x1be   : > { %8632 = dma.done.wait (%p11270_p4), [#allocation18], 2048  }
 0x1bf   : > { %8634 = vsyncadd (%p11271_p10), [#allocation18], 4294965248  ;;  %p11272_p5 = pmov %p11268_p0 }
 0x1c0   : > { %p11273_p7 = pmov %p11268_p0 }
 0x1c1   : > { %8636 = dma.done.wait (%p11272_p5), [#allocation21], 2064  }
 0x1c2   : > { %8638 = vsyncadd (%p11273_p7), [#allocation21], 4294965232  ;;  %p11274_p3 = pmov %p11268_p0 }
 0x1c3   : > { %p11275_p11 = pmov %p11268_p0 }
 0x1c4   : > { %8640 = dma.done.wait (%p11274_p3), [#allocation24], 16  }
 0x1c5   : > { %8642 = vsyncadd (%p11275_p11), [#allocation24], 4294967280  ;;  %v11139_v0 = vmov 0.0|0.0   ;;  %vm8684_vm0 = vmmov 0   ;;  %v11136_v1 = vmov 0.0   ;;  %v755_v2 = vld [vmem:[#allocation5] sm:$0xff] }
 0x1c6   : > { %6992 = vmatprep.subr.bf16.mxu0 %v11139_v0  ;;  %5764 = vmatprep.mubr.msk.f32.mxu0 %vm8684_vm0, %v11136_v1  ;;  %v756_v3 = vld [vmem:[#allocation5 + $0x8] sm:$0xff]  ;;  %v757_v4 = vld [vmem:[#allocation5 + $0x10] sm:$0xff]  ;;  %v779_v5 = vand.u32 4294901760, %v755_v2  ;;  %v758_v7 = vld [vmem:[#allocation5 + $0x18] sm:$0xff]  ;;  %s746_s30 = scalar_lea.vmem [#allocation26], %s9188_s14  ;;  %s753_s18 = scalar_lea.vmem [#allocation28], %s9188_s14 }
 0x1c7   : > { %7136 = vmatprep.subr.bf16.mxu1 %v11139_v0  ;;  %5974 = vmatprep.mubr.msk.f32.mxu1 %vm8684_vm0, %v11136_v1  ;;  %v782_v6 = vand.u32 4294901760, %v756_v3  ;;  %v785_v8 = vand.u32 4294901760, %v757_v4  ;;  %v788_v9 = vand.u32 4294901760, %v758_v7  ;;  %v759_v10 = vld [vmem:[#allocation5 + $0x20] sm:$0xff]  ;;  %v760_v11 = vld [vmem:[#allocation5 + $0x28] sm:$0xff]  ;;  %v761_v16 = vld [vmem:[#allocation5 + $0x30] sm:$0xff] }
 0x1c8   : > { %v791_v14 = vand.u32 4294901760, %v759_v10  ;;  %v794_v15 = vand.u32 4294901760, %v760_v11  ;;  %v762_v17 = vld [vmem:[#allocation5 + $0x38] sm:$0xff]  ;;  %v797_v19 = vand.u32 4294901760, %v761_v16  ;;  %v763_v21 = vld [vmem:[#allocation5 + $0x40] sm:$0xff]  ;;  %v764_v22 = vld [vmem:[#allocation5 + $0x48] sm:$0xff]  ;;  %v9250_v24 = vsub.f32 %v755_v2, %v779_v5 }
 0x1c9   : > { %v9238_v12 = vpack.c.bf16 %v782_v6, %v779_v5  ;;  %v9241_v13 = vpack.c.bf16 %v788_v9, %v785_v8  ;;  %v800_v20 = vand.u32 4294901760, %v762_v17  ;;  %v754_v23 = vld [vmem:[%s633_s0] sm:$0xff]  ;;  %v9252_v25 = vsub.f32 %v756_v3, %v782_v6  ;;  %v767_v32 = vld [vmem:[#allocation5 + $0x60] sm:$0xff]  ;;  %v768_v35 = vld [vmem:[#allocation5 + $0x68] sm:$0xff]  ;;  %s10978_s16 = sshll.u32 %s11261_s27, 7  ;;  %s4788_s7 = sshll.u32 %s746_s30, 4  ;;  %s4789_s7 = int_to_ptr.vmem [resolvable:$true] %s4788_s7 }
 0x1ca   : > { %v9245_v18 = vpack.c.bf16 %v794_v15, %v791_v14  ;;  %v803_v27 = vand.u32 4294901760, %v763_v21  ;;  %v806_v28 = vand.u32 4294901760, %v764_v22  ;;  %v765_v29 = vld [vmem:[#allocation5 + $0x50] sm:$0xff]  ;;  %v766_v30 = vld [vmem:[#allocation5 + $0x58] sm:$0xff]  ;;  %v9258_v31 = vand.u32 4294901760, %v754_v23  ;;  %s11407_s29 = sld [smem:[#allocation70_spill]] }
 0x1cb   : > { %6994 = vmatpush3.bf16.msra.mxu0 %v9238_v12  ;;  %v9255_v26 = vpack.c.bf16 %v800_v20, %v797_v19  ;;  %v9260_v33 = vsub.f32 %v757_v4, %v785_v8  ;;  %v809_v34 = vand.u32 4294901760, %v765_v29  ;;  %v769_v36 = vld [vmem:[#allocation5 + $0x70] sm:$0xff]  ;;  %v770_v37 = vld [vmem:[#allocation5 + $0x78] sm:$0xff]  ;;  %v812_v39 = vand.u32 4294901760, %v766_v30  ;;  %s10990_s26 = sshll.u32 %s753_s18, 4  ;;  %s10994_s2 = scalar_lea.sflag [#allocation27], %s670_s15  ;;  %s4802_s26 = int_to_ptr.vmem [resolvable:$true] %s10990_s26 }
 0x1cc   : > { %6995 = vmatprep.subr.bf16.mxu0 %v11139_v0  ;;  %v9263_v38 = vpack.c.bf16 %v806_v28, %v803_v27  ;;  %v872_v40 = vand.u32 4294901760, %v9250_v24  ;;  %v879_v41 = vand.u32 4294901760, %v9252_v25  ;;  %v9267_v42 = vsub.f32 %v758_v7, %v788_v9  ;;  %s8507_s0 = scalar_lea.vmem %s4789_s7, 128  ;;  %p11408_p8 = scmp.ne.s32.totalorder %s11253_s28, 0 }
 0x1cd   : > { %v9269_v43 = vsub.f32 %v759_v10, %v791_v14  ;;  %v9271_v44 = vsub.f32 %v760_v11, %v794_v15  ;;  %v9275_v45 = vsub.f32 %v754_v23, %v9258_v31  ;;  %v815_v46 = vand.u32 4294901760, %v767_v32  ;;  %p8508_p6 = scmp.ne.s32.totalorder %s4789_s7, %s8507_s0  ;;  %s8686_s6 = smov [#allocation26]  }
 0x1ce   : > { %v818_v47 = vand.u32 4294901760, %v768_v35  ;;  %v821_v48 = vand.u32 4294901760, %v769_v36  ;;  %v824_v49 = vand.u32 4294901760, %v770_v37  ;;  %v9277_v50 = vsub.f32 %v761_v16, %v797_v19 }
 0x1cf   : > { %6997 = vmatpush3.bf16.msra.mxu0 %v9241_v13  ;;  %v9279_v51 = vsub.f32 %v762_v17, %v800_v20  ;;  %v9281_v52 = vsub.f32 %v763_v21, %v803_v27  ;;  %v886_v53 = vand.u32 4294901760, %v9260_v33  ;;  %v9285_v54 = vsub.f32 %v764_v22, %v806_v28  ;;  %p8509_p9 = pnand %p8508_p6, %p11408_p8 }
 0x1d0   : > { %6998 = vmatprep.subr.bf16.mxu0 %v11139_v0  ;;  %v9287_v55 = vpack.c.bf16 %v812_v39, %v809_v34  ;;  %v873_v56 = vsub.f32 %v9250_v24, %v872_v40  ;;  %v880_v57 = vsub.f32 %v9252_v25, %v879_v41  ;;  %v9292_v58 = vsub.f32 %v765_v29, %v809_v34  ;;  %s10986_s25 = scalar_lea.hbm %s11407_s29, %s10978_s16 }
 0x1d1   : > { %v9294_v59 = vsub.f32 %v766_v30, %v812_v39  ;;  %v9296_v60 = vsub.f32 %v767_v32, %v815_v46  ;;  %v861_v61 = vand.u32 4294901760, %v9275_v45  ;;  %v9299_v62 = vpack.c.bf16 %v818_v47, %v815_v46  ;;  %p8510_p12 = pneg %p8509_p9 }
 0x1d2   : > { %v9301_v63 = vsub.f32 %v768_v35, %v818_v47  ;;  %v9303_v2 = vpack.c.bf16 %v824_v49, %v821_v48  ;;  %v9305_v3 = vsub.f32 %v769_v36, %v821_v48  ;;  %v9307_v4 = vsub.f32 %v770_v37, %v824_v49 }
 0x1d3   : > { %7000 = vmatpush3.bf16.msra.mxu0 %v9245_v18  ;;  %v887_v5 = vsub.f32 %v9260_v33, %v886_v53  ;;  %v893_v6 = vand.u32 4294901760, %v9267_v42  ;;  %v900_v7 = vand.u32 4294901760, %v9269_v43  ;;  %v874_v8 = vand.u32 4294901760, %v873_v56 }
 0x1d4   : > { %7001 = vmatprep.subr.bf16.mxu0 %v11139_v0  ;;  %v881_v9 = vand.u32 4294901760, %v880_v57  ;;  %v907_v10 = vand.u32 4294901760, %v9271_v44  ;;  %v914_v11 = vand.u32 4294901760, %v9277_v50  ;;  %v862_v14 = vsub.f32 %v9275_v45, %v861_v61 }
 0x1d5   : > { %v921_v15 = vand.u32 4294901760, %v9279_v51  ;;  %v928_v16 = vand.u32 4294901760, %v9281_v52  ;;  %v935_v17 = vand.u32 4294901760, %v9285_v54  ;;  %v942_v19 = vand.u32 4294901760, %v9292_v58 }
 0x1d6   : > { %v949_v20 = vand.u32 4294901760, %v9294_v59  ;;  %v956_v21 = vand.u32 4294901760, %v9296_v60  ;;  %v963_v22 = vand.u32 4294901760, %v9301_v63  ;;  %v970_v23 = vand.u32 4294901760, %v9305_v3 }
 0x1d7   : > { %7003 = vmatpush3.bf16.msra.mxu0 %v9255_v26  ;;  %v977_v27 = vand.u32 4294901760, %v9307_v4  ;;  %v9328_v28 = vpack.c.bf16 %v879_v41, %v872_v40  ;;  %v9330_v29 = vpack.c.bf16 %v893_v6, %v886_v53  ;;  %v894_v30 = vsub.f32 %v9267_v42, %v893_v6 }
 0x1d8   : > { %7004 = vmatprep.subr.bf16.mxu0 %v11139_v0  ;;  %v9334_v32 = vpack.c.bf16 %v907_v10, %v900_v7  ;;  %v9336_v34 = vpack.c.bf16 %v921_v15, %v914_v11  ;;  %v9338_v35 = vpack.c.bf16 %v935_v17, %v928_v16  ;;  %v9341_v36 = vpack.c.bf16 %v949_v20, %v942_v19 }
 0x1d9   : > { %v9343_v37 = vpack.c.bf16 %v963_v22, %v956_v21  ;;  %v9345_v39 = vpack.c.bf16 %v977_v27, %v970_v23  ;;  %v863_v40 = vand.u32 4294901760, %v862_v14  ;;  %v888_v41 = vand.u32 4294901760, %v887_v5 }
 0x1da   : > { %v7017_v46 = vpack.c.bf16 %v881_v9, %v874_v8  ;;  %v895_v47 = vand.u32 4294901760, %v894_v30  ;;  %v901_v48 = vsub.f32 %v9269_v43, %v900_v7  ;;  %v908_v49 = vsub.f32 %v9271_v44, %v907_v10 }
 0x1db   : > { %7006 = vmatpush3.bf16.msra.mxu0 %v9263_v38  ;;  %v915_v53 = vsub.f32 %v9277_v50, %v914_v11  ;;  %v922_v14 = vsub.f32 %v9279_v51, %v921_v15  ;;  %v929_v5 = vsub.f32 %v9281_v52, %v928_v16  ;;  %v936_v10 = vsub.f32 %v9285_v54, %v935_v17 }
 0x1dc   : > { %7007 = vmatprep.subr.bf16.mxu0 %v11139_v0  ;;  %v7020_v56 = vpack.c.bf16 %v895_v47, %v888_v41  ;;  %v902_v57 = vand.u32 4294901760, %v901_v48  ;;  %v909_v6 = vand.u32 4294901760, %v908_v49  ;;  %v943_v15 = vsub.f32 %v9292_v58, %v942_v19 }
 0x1dd   : > { %v916_v8 = vand.u32 4294901760, %v915_v53  ;;  %v923_v9 = vand.u32 4294901760, %v922_v14  ;;  %v930_v11 = vand.u32 4294901760, %v929_v5  ;;  %v950_v41 = vsub.f32 %v9294_v59, %v949_v20  ;;  %v1422_v5 = vld [vmem:[#allocation8 + $0x10] sm:$0xff] }
 0x1de   : > { %v7023_v7 = vpack.c.bf16 %v909_v6, %v902_v57  ;;  %v957_v16 = vsub.f32 %v9296_v60, %v956_v21  ;;  %v944_v47 = vand.u32 4294901760, %v943_v15  ;;  %v964_v17 = vsub.f32 %v9301_v63, %v963_v22 }
 0x1df   : > { %7009 = vmatpush3.bf16.msra.mxu0 %v9287_v55  ;;  %v7026_v30 = vpack.c.bf16 %v923_v9, %v916_v8  ;;  %v951_v48 = vand.u32 4294901760, %v950_v41  ;;  %v971_v19 = vsub.f32 %v9305_v3, %v970_v23  ;;  %v978_v20 = vsub.f32 %v9307_v4, %v977_v27  ;;  %v1420_v23 = vld [vmem:[#allocation8] sm:$0xff]  ;;  %v1421_v27 = vld [vmem:[#allocation8 + $0x8] sm:$0xff]  ;;  %v1426_v41 = vld [vmem:[#allocation8 + $0x30] sm:$0xff] }
 0x1e0   : > { %7010 = vmatprep.subr.bf16.mxu0 %v11139_v0  ;;  %v958_v49 = vand.u32 4294901760, %v957_v16  ;;  %v7041_v14 = vpack.c.bf16 %v9252_v25, %v9250_v24  ;;  %v1444_v8 = vand.u32 4294901760, %v1420_v23  ;;  %v1447_v9 = vand.u32 4294901760, %v1421_v27  ;;  %v1425_v24 = vld [vmem:[#allocation8 + $0x28] sm:$0xff]  ;;  %v1427_v16 = vld [vmem:[#allocation8 + $0x38] sm:$0xff] }
 0x1e1   : > { %v7032_v53 = vpack.c.bf16 %v951_v48, %v944_v47  ;;  %v972_v57 = vand.u32 4294901760, %v971_v19  ;;  %v979_v6 = vand.u32 4294901760, %v978_v20  ;;  %v1459_v15 = vand.u32 4294901760, %v1425_v24 }
 0x1e2   : > { %v9379_v47 = vpack.c.bf16 %v1447_v9, %v1444_v8 }
 0x1e3   : > { %7012 = vmatpush3.bf16.msra.mxu0 %v9299_v62  ;;  %v7038_v22 = vpack.c.bf16 %v979_v6, %v972_v57  ;;  %v9396_v20 = vsub.f32 %v1425_v24, %v1459_v15  ;;  %v1465_v57 = vand.u32 4294901760, %v1427_v16 }
 0x1e4   : > { %7013 = vmatprep.subr.bf16.mxu0 %v11139_v0  ;;  %7138 = vmatpush3.bf16.msra.mxu1 %v9379_v47 }
 0x1e5   : > { %7139 = vmatprep.subr.bf16.mxu1 %v11139_v0 }
 0x1e7   : > { %7015 = vmatpush3.bf16.msra.mxu0 %v9303_v2 }
 0x1e8   : > { %7016 = vmatprep.subr.bf16.mxu0 %v11139_v0 }
 0x1ea   : > { %5765 = vmatmul.mubr.f32.vlgmr.msra.gmra.mrb[0].mxu0 %v863_v40  ;;  %v937_v40 = vand.u32 4294901760, %v936_v10  ;;  %v1423_v10 = vld [vmem:[#allocation8 + $0x18] sm:$0xff] }
 0x1eb   : > { %7018 = vmatpush3.bf16.msra.mxu0 %v7017_v46  ;;  %5799 = vmatprep.mubr.msk.f32.mxu0 %vm8684_vm0, %v11136_v1  ;;  %v1453_v25 = vand.u32 4294901760, %v1423_v10 }
 0x1ec   : > { %7019 = vmatprep.subr.bf16.mxu0 %v11139_v0  ;;  %v7029_v46 = vpack.c.bf16 %v937_v40, %v930_v11  ;;  %v1450_v11 = vand.u32 4294901760, %v1422_v5 }
 0x1ee   : > { %v9385_v48 = vsub.f32 %v1422_v5, %v1450_v11 }
 0x1ef   : > { %7021 = vmatpush3.bf16.msra.mxu0 %v7020_v56  ;;  %v965_v56 = vand.u32 4294901760, %v964_v17  ;;  %v1429_v17 = vld [vmem:[#allocation8 + $0x48] sm:$0xff] }
 0x1f0   : > { %7022 = vmatprep.subr.bf16.mxu0 %v11139_v0 }
 0x1f1   : > { %v7035_v21 = vpack.c.bf16 %v965_v56, %v958_v49  ;;  %v7047_v49 = vpack.c.bf16 %v9271_v44, %v9269_v43  ;;  %v9391_v56 = vsub.f32 %v1423_v10, %v1453_v25  ;;  %v9402_v44 = vsub.f32 %v1427_v16, %v1465_v57 }
 0x1f2   : > { %v11131_v10 = vand.u32 4294901760, %v9385_v48 }
 0x1f3   : > { %7024 = vmatpush3.bf16.msra.mxu0 %v7023_v7  ;;  %v7044_v7 = vpack.c.bf16 %v9267_v42, %v9260_v33  ;;  %v9381_v33 = vsub.f32 %v1420_v23, %v1444_v8  ;;  %v9383_v42 = vsub.f32 %v1421_v27, %v1447_v9  ;;  %v7050_v27 = vpack.c.bf16 %v9279_v51, %v9277_v50 }
 0x1f4   : > { %7025 = vmatprep.subr.bf16.mxu0 %v11139_v0  ;;  %v7056_v50 = vpack.c.bf16 %v9294_v59, %v9292_v58  ;;  %v1552_v24 = vsub.f32 %v9385_v48, %v11131_v10  ;;  %v2092_v10 = vld [vmem:[#allocation11 + $0x38] sm:$0xff] }
 0x1f7   : > { %7027 = vmatpush3.bf16.msra.mxu0 %v7026_v30  ;;  %v1424_v30 = vld [vmem:[#allocation8 + $0x20] sm:$0xff] }
 0x1f8   : > { %7028 = vmatprep.subr.bf16.mxu0 %v11139_v0  ;;  %v1456_v40 = vand.u32 4294901760, %v1424_v30 }
 0x1fa   : > { %v9393_v19 = vsub.f32 %v1424_v30, %v1456_v40  ;;  %v9411_v5 = vpack.c.bf16 %v1459_v15, %v1456_v40  ;;  %v1553_v15 = vand.u32 4294901760, %v1552_v24 }
 0x1fb   : > { %7030 = vmatpush3.bf16.msra.mxu0 %v7029_v46  ;;  %v1428_v46 = vld [vmem:[#allocation8 + $0x40] sm:$0xff] }
 0x1fc   : > { %7031 = vmatprep.subr.bf16.mxu0 %v11139_v0  ;;  %v1468_v6 = vand.u32 4294901760, %v1428_v46  ;;  %v11127_v16 = vand.u32 4294901760, %v9393_v19 }
 0x1ff   : > { %7033 = vmatpush3.bf16.msra.mxu0 %v7032_v53  ;;  %v9389_v53 = vpack.c.bf16 %v1453_v25, %v1450_v11  ;;  %v11130_v11 = vand.u32 4294901760, %v9391_v56 }
 0x200   : > { %7034 = vmatprep.subr.bf16.mxu0 %v11139_v0 }
 0x201   : > { %7141 = vmatpush3.bf16.msra.mxu1 %v9389_v53  ;;  %v1559_v25 = vsub.f32 %v9391_v56, %v11130_v11  ;;  %v2091_v11 = vld [vmem:[#allocation11 + $0x30] sm:$0xff] }
 0x202   : > { %7142 = vmatprep.subr.bf16.mxu1 %v11139_v0 }
 0x203   : > { %7036 = vmatpush3.bf16.msra.mxu0 %v7035_v21  ;;  %v1462_v21 = vand.u32 4294901760, %v1426_v41 }
 0x204   : > { %7037 = vmatprep.subr.bf16.mxu0 %v11139_v0 }
 0x205   : > { %v9400_v43 = vsub.f32 %v1426_v41, %v1462_v21  ;;  %7144 = vmatpush3.bf16.msra.mxu1 %v9411_v5  ;;  %v9418_v8 = vpack.c.bf16 %v1465_v57, %v1462_v21  ;;  %v1560_v41 = vand.u32 4294901760, %v1559_v25 }
 0x206   : > { %7145 = vmatprep.subr.bf16.mxu1 %v11139_v0 }
 0x207   : > { %7039 = vmatpush3.bf16.msra.mxu0 %v7038_v22  ;;  %v1471_v22 = vand.u32 4294901760, %v1429_v17 }
 0x208   : > { %7040 = vmatprep.subr.bf16.mxu0 %v11139_v0 }
 0x209   : > { %v9406_v23 = vsub.f32 %v1429_v17, %v1471_v22  ;;  %7147 = vmatpush3.bf16.msra.mxu1 %v9418_v8  ;;  %v9425_v51 = vpack.c.bf16 %v1471_v22, %v1468_v6  ;;  %v7164_v17 = vpack.c.bf16 %v1560_v41, %v1553_v15  ;;  %v11125_v22 = vand.u32 4294901760, %v9400_v43 }
 0x20a   : > { %5800 = vmatmul.mubr.f32.vlgmr.msra.gmra.mrb[0].mxu0 %v9258_v31  ;;  %7148 = vmatprep.subr.bf16.mxu1 %v11139_v0 }
 0x20b   : > { %7042 = vmatpush3.bf16.msra.mxu0 %v7041_v14  ;;  %5834 = vmatprep.mubr.msk.f32.mxu0 %vm8684_vm0, %v11136_v1  ;;  %v9404_v14 = vsub.f32 %v1428_v46, %v1468_v6  ;;  %v11126_v46 = vand.u32 4294901760, %v9396_v20 }
 0x20c   : > { %7043 = vmatprep.subr.bf16.mxu0 %v11139_v0 }
 0x20d   : > { %7150 = vmatpush3.bf16.msra.mxu1 %v9425_v51  ;;  %v1573_v21 = vsub.f32 %v9396_v20, %v11126_v46 }
 0x20e   : > { %7151 = vmatprep.subr.bf16.mxu1 %v11139_v0 }
 0x20f   : > { %7045 = vmatpush3.bf16.msra.mxu0 %v7044_v7  ;;  %v7053_v7 = vpack.c.bf16 %v9285_v54, %v9281_v52  ;;  %v7059_v52 = vpack.c.bf16 %v9301_v63, %v9296_v60  ;;  %v7062_v54 = vpack.c.bf16 %v9307_v4, %v9305_v3  ;;  %v1574_v6 = vand.u32 4294901760, %v1573_v21 }
 0x210   : > { %7046 = vmatprep.subr.bf16.mxu0 %v11139_v0 }
 0x213   : > { %7048 = vmatpush3.bf16.msra.mxu0 %v7047_v49  ;;  %v1566_v49 = vsub.f32 %v9393_v19, %v11127_v16  ;;  %v9678_v16 = vld [vmem:[#allocation14 + $0x28] sm:$0xff] }
 0x214   : > { %7049 = vmatprep.subr.bf16.mxu0 %v11139_v0 }
 0x215   : > { %v1567_v57 = vand.u32 4294901760, %v1566_v49 }
 0x217   : > { %7051 = vmatpush3.bf16.msra.mxu0 %v7050_v27  ;;  %v11124_v27 = vand.u32 4294901760, %v9402_v44 }
 0x218   : > { %7052 = vmatprep.subr.bf16.mxu0 %v11139_v0 }
 0x21b   : > { %7054 = vmatpush3.bf16.msra.mxu0 %v7053_v7  ;;  %v7167_v7 = vpack.c.bf16 %v1574_v6, %v1567_v57 }
 0x21c   : > { %7055 = vmatprep.subr.bf16.mxu0 %v11139_v0 }
 0x21f   : > { %7057 = vmatpush3.bf16.msra.mxu0 %v7056_v50  ;;  %v1580_v50 = vsub.f32 %v9400_v43, %v11125_v22 }
 0x220   : > { %7058 = vmatprep.subr.bf16.mxu0 %v11139_v0 }
 0x223   : > { %7060 = vmatpush3.bf16.msra.mxu0 %v7059_v52  ;;  %v1587_v52 = vsub.f32 %v9402_v44, %v11124_v27  ;;  %v9666_v27 = vld [vmem:[#allocation14 + $0x20] sm:$0xff] }
 0x224   : > { %7061 = vmatprep.subr.bf16.mxu0 %v11139_v0 }
 0x227   : > { %7063 = vmatpush3.bf16.msra.mxu0 %v7062_v54  ;;  %v1581_v54 = vand.u32 4294901760, %v1580_v50 }
 0x228   : > { %7064 = vmatprep.subr.bf16.mxu0 %v11139_v0 }
 0x22a   : > { %5835 = vmatmul.mubr.f32.vlgmr.msra.gmra.mrb[0].mxu0 %v9275_v45  ;;  %v1432_v45 = vld [vmem:[#allocation8 + $0x60] sm:$0xff] }
 0x22b   : > { %7066 = vmatpush3.bf16.msra.mxu0 %v9238_v12  ;;  %5869 = vmatprep.mubr.msk.f32.mxu0 %vm8684_vm0, %v11136_v1  ;;  %v1480_v58 = vand.u32 4294901760, %v1432_v45 }
 0x22c   : > { %7067 = vmatprep.subr.bf16.mxu0 %v11139_v0 }
 0x22f   : > { %7069 = vmatpush3.bf16.msra.mxu0 %v9241_v13 }
 0x230   : > { %7070 = vmatprep.subr.bf16.mxu0 %v11139_v0 }
 0x233   : > { %7072 = vmatpush3.bf16.msra.mxu0 %v9245_v18 }
 0x234   : > { %7073 = vmatprep.subr.bf16.mxu0 %v11139_v0 }
 0x237   : > { %7075 = vmatpush3.bf16.msra.mxu0 %v9255_v26 }
 0x238   : > { %7076 = vmatprep.subr.bf16.mxu0 %v11139_v0 }
 0x23b   : > { %7078 = vmatpush3.bf16.msra.mxu0 %v9263_v38 }
 0x23c   : > { %7079 = vmatprep.subr.bf16.mxu0 %v11139_v0 }
 0x23f   : > { %7081 = vmatpush3.bf16.msra.mxu0 %v9287_v55 }
 0x240   : > { %7082 = vmatprep.subr.bf16.mxu0 %v11139_v0 }
 0x243   : > { %7084 = vmatpush3.bf16.msra.mxu0 %v9299_v62 }
 0x244   : > { %7085 = vmatprep.subr.bf16.mxu0 %v11139_v0 }
 0x247   : > { %7087 = vmatpush3.bf16.msra.mxu0 %v9303_v2 }
 0x248   : > { %7088 = vmatprep.subr.bf16.mxu0 %v11139_v0 }
 0x24a   : > { %5870 = vmatmul.mubr.f32.vlgmr.msra.gmra.mrb[0].mxu0 %v861_v61  ;;  %v1435_v61 = vld [vmem:[#allocation8 + $0x78] sm:$0xff] }
 0x24b   : > { %7090 = vmatpush3.bf16.msra.mxu0 %v9328_v28  ;;  %5904 = vmatprep.mubr.msk.f32.mxu0 %vm8684_vm0, %v11136_v1  ;;  %v1489_v28 = vand.u32 4294901760, %v1435_v61 }
 0x24c   : > { %7091 = vmatprep.subr.bf16.mxu0 %v11139_v0 }
 0x24f   : > { %7093 = vmatpush3.bf16.msra.mxu0 %v9330_v29  ;;  %v11134_v29 = vand.u32 4294901760, %v9381_v33 }
 0x250   : > { %7094 = vmatprep.subr.bf16.mxu0 %v11139_v0 }
 0x253   : > { %7096 = vmatpush3.bf16.msra.mxu0 %v9334_v32  ;;  %v11133_v32 = vand.u32 4294901760, %v9383_v42 }
 0x254   : > { %7097 = vmatprep.subr.bf16.mxu0 %v11139_v0 }
 0x257   : > { %7099 = vmatpush3.bf16.msra.mxu0 %v9336_v34 }
 0x258   : > { %7100 = vmatprep.subr.bf16.mxu0 %v11139_v0 }
 0x25b   : > { %7102 = vmatpush3.bf16.msra.mxu0 %v9338_v35 }
 0x25c   : > { %7103 = vmatprep.subr.bf16.mxu0 %v11139_v0 }
 0x25f   : > { %7105 = vmatpush3.bf16.msra.mxu0 %v9341_v36  ;;  %v9521_v36 = vsub.f32 %v1435_v61, %v1489_v28 }
 0x260   : > { %7106 = vmatprep.subr.bf16.mxu0 %v11139_v0 }
 0x261   : > { %v11114_v6 = vand.u32 4294901760, %v9521_v36 }
 0x263   : > { %7108 = vmatpush3.bf16.msra.mxu0 %v9343_v37  ;;  %v1538_v37 = vsub.f32 %v9381_v33, %v11134_v29  ;;  %v2130_v29 = vand.u32 4294901760, %v2092_v10 }
 0x264   : > { %7109 = vmatprep.subr.bf16.mxu0 %v11139_v0 }
 0x265   : > { %v1539_v9 = vand.u32 4294901760, %v1538_v37 }
 0x267   : > { %7111 = vmatpush3.bf16.msra.mxu0 %v9345_v39  ;;  %v1545_v39 = vsub.f32 %v9383_v42, %v11133_v32  ;;  %v2127_v32 = vand.u32 4294901760, %v2091_v11 }
 0x268   : > { %7112 = vmatprep.subr.bf16.mxu0 %v11139_v0 }
 0x269   : > { %v1546_v30 = vand.u32 4294901760, %v1545_v39 }
 0x26a   : > { %5905 = vmatmul.mubr.f32.vlgmr.msra.gmra.mrb[0].mxu0 %v9258_v31 }
 0x26b   : > { %7114 = vmatpush3.bf16.msra.mxu0 %v9238_v12  ;;  %5939 = vmatprep.mubr.msk.f32.mxu0 %vm8684_vm0, %v11136_v1  ;;  %v1430_v12 = vld [vmem:[#allocation8 + $0x50] sm:$0xff]  ;;  %v9539_v40 = vpack.c.bf16 %v1546_v30, %v1539_v9 }
 0x26c   : > { %7115 = vmatprep.subr.bf16.mxu0 %v11139_v0 }
 0x26f   : > { %7117 = vmatpush3.bf16.msra.mxu0 %v9241_v13  ;;  %v1431_v13 = vld [vmem:[#allocation8 + $0x58] sm:$0xff] }
 0x270   : > { %7118 = vmatprep.subr.bf16.mxu0 %v11139_v0 }
 0x273   : > { %7120 = vmatpush3.bf16.msra.mxu0 %v9245_v18  ;;  %v1474_v18 = vand.u32 4294901760, %v1430_v12 }
 0x274   : > { %7121 = vmatprep.subr.bf16.mxu0 %v11139_v0 }
 0x277   : > { %7123 = vmatpush3.bf16.msra.mxu0 %v9255_v26  ;;  %v1477_v26 = vand.u32 4294901760, %v1431_v13 }
 0x278   : > { %7124 = vmatprep.subr.bf16.mxu0 %v11139_v0 }
 0x279   : > { %v9507_v63 = vsub.f32 %v1431_v13, %v1477_v26  ;;  %v11123_v13 = vand.u32 4294901760, %v9404_v14 }
 0x27b   : > { %7126 = vmatpush3.bf16.msra.mxu0 %v9263_v38  ;;  %v9499_v38 = vpack.c.bf16 %v1477_v26, %v1474_v18  ;;  %v11118_v61 = vand.u32 4294901760, %v9507_v63 }
 0x27c   : > { %7127 = vmatprep.subr.bf16.mxu0 %v11139_v0 }
 0x27d   : > { %7153 = vmatpush3.bf16.msra.mxu1 %v9499_v38  ;;  %v1615_v37 = vsub.f32 %v9507_v63, %v11118_v61 }
 0x27e   : > { %7154 = vmatprep.subr.bf16.mxu1 %v11139_v0 }
 0x27f   : > { %7129 = vmatpush3.bf16.msra.mxu0 %v9287_v55  ;;  %v1433_v55 = vld [vmem:[#allocation8 + $0x68] sm:$0xff]  ;;  %v1616_v9 = vand.u32 4294901760, %v1615_v37  ;;  %v7194_v37 = vpack.c.bf16 %v9402_v44, %v9400_v43 }
 0x280   : > { %7130 = vmatprep.subr.bf16.mxu0 %v11139_v0  ;;  %v1483_v59 = vand.u32 4294901760, %v1433_v55 }
 0x282   : > { %v9503_v60 = vpack.c.bf16 %v1483_v59, %v1480_v58  ;;  %v9512_v3 = vsub.f32 %v1433_v55, %v1483_v59 }
 0x283   : > { %7132 = vmatpush3.bf16.msra.mxu0 %v9299_v62  ;;  %v9505_v62 = vsub.f32 %v1430_v12, %v1474_v18  ;;  %v1588_v12 = vand.u32 4294901760, %v1587_v52  ;;  %v11120_v18 = vand.u32 4294901760, %v9406_v23 }
 0x284   : > { %7133 = vmatprep.subr.bf16.mxu0 %v11139_v0  ;;  %7156 = vmatpush3.bf16.msra.mxu1 %v9503_v60  ;;  %v11116_v24 = vand.u32 4294901760, %v9512_v3 }
 0x285   : > { %7157 = vmatprep.subr.bf16.mxu1 %v11139_v0  ;;  %v7170_v26 = vpack.c.bf16 %v1588_v12, %v1581_v54  ;;  %v1601_v55 = vsub.f32 %v9406_v23, %v11120_v18  ;;  %v1643_v54 = vsub.f32 %v9521_v36, %v11114_v6 }
 0x286   : > { %v1629_v41 = vsub.f32 %v9512_v3, %v11116_v24 }
 0x287   : > { %7135 = vmatpush3.bf16.msra.mxu0 %v9303_v2  ;;  %v9510_v2 = vsub.f32 %v1432_v45, %v1480_v58  ;;  %v1594_v45 = vsub.f32 %v9404_v14, %v11123_v13  ;;  %v1602_v59 = vand.u32 4294901760, %v1601_v55  ;;  %v2090_v13 = vld [vmem:[#allocation11 + $0x28] sm:$0xff] }
 0x288   : > { %7280 = vmatprep.subr.bf16.mxu0 %v11139_v0  ;;  %v1630_v21 = vand.u32 4294901760, %v1629_v41 }
 0x289   : > { %v1595_v58 = vand.u32 4294901760, %v1594_v45  ;;  %v11117_v30 = vand.u32 4294901760, %v9510_v2  ;;  %v1644_v45 = vand.u32 4294901760, %v1643_v54 }
 0x28a   : > { %5940 = vmatmul.mubr.f32.vlgmr.msra.gmra.mrb[0].mxu0 %v9258_v31  ;;  %v1434_v31 = vld [vmem:[#allocation8 + $0x70] sm:$0xff] }
 0x28b   : > { %6184 = vmatprep.mubr.msk.f32.mxu0 %vm8684_vm0, %v11136_v1  ;;  %v1486_v4 = vand.u32 4294901760, %v1434_v31  ;;  %v1622_v15 = vsub.f32 %v9510_v2, %v11117_v30 }
 0x28d   : > { %v9517_v34 = vpack.c.bf16 %v1489_v28, %v1486_v4  ;;  %v9519_v35 = vsub.f32 %v1434_v31, %v1486_v4  ;;  %v11119_v31 = vand.u32 4294901760, %v9505_v62  ;;  %v7173_v4 = vpack.c.bf16 %v1602_v59, %v1595_v58 }
 0x28e   : > { %v1623_v49 = vand.u32 4294901760, %v1622_v15  ;;  %v7185_v58 = vpack.c.bf16 %v9383_v42, %v9381_v33  ;;  %v7188_v59 = vpack.c.bf16 %v9391_v56, %v9385_v48  ;;  %v2093_v15 = vld [vmem:[#allocation11 + $0x40] sm:$0xff] }
 0x28f   : > { %7159 = vmatpush3.bf16.msra.mxu1 %v9517_v34  ;;  %v1608_v28 = vsub.f32 %v9505_v62, %v11119_v31  ;;  %v11115_v57 = vand.u32 4294901760, %v9519_v35 }
 0x290   : > { %7160 = vmatprep.subr.bf16.mxu1 %v11139_v0  ;;  %v7179_v50 = vpack.c.bf16 %v1630_v21, %v1623_v49  ;;  %v5106_v49 = vld [vmem:[#allocation7] ss:$0 sm:$0xff] }
 0x291   : > { %v1609_v39 = vand.u32 4294901760, %v1608_v28  ;;  %v1636_v52 = vsub.f32 %v9519_v35, %v11115_v57  ;;  %v7191_v28 = vpack.c.bf16 %v9396_v20, %v9393_v19 }
 0x293   : > { %v7176_v25 = vpack.c.bf16 %v1616_v9, %v1609_v39  ;;  %v1637_v12 = vand.u32 4294901760, %v1636_v52  ;;  %v2094_v9 = vld [vmem:[#allocation11 + $0x48] sm:$0xff] }
 0x295   : > { %v7182_v55 = vpack.c.bf16 %v1644_v45, %v1637_v12 }
 0x35d   : > { %v1415_v21 = vpop.f32.mrb[0].mxu0 }
 0x35e   : > { %v7856_v52 = vadd.f32 %v5106_v49, %v1415_v21  ;;  %v5941_v54 = vpop.f32.mrb[1].mxu0  ;;  %v9635_v49 = vld [vmem:[#allocation14 + $0x10] sm:$0xff] }
 0x360   : > { %v1419_v12 = vmax.f32 %v7856_v52, 0.0 }
 0x362   : > { %v9605_v45 = vand.u32 4294901760, %v1419_v12 }
 0x364   : > { %v9608_v6 = vsub.f32 %v1419_v12, %v9605_v45  ;;  %v9648_v12 = vld [vmem:[#allocation14 + $0x18] sm:$0xff] }
 0x366   : > { %v11132_v57 = vand.u32 4294901760, %v9608_v6 }
 0x368   : > { %v1527_v24 = vsub.f32 %v9608_v6, %v11132_v57  ;;  %v9694_v57 = vld [vmem:[#allocation14 + $0x30] sm:$0xff] }
 0x36a   : > { %v1528_v30 = vand.u32 4294901760, %v1527_v24 }
 0x36c   : > { %5975 = vmatmul.mubr.f32.vlgmr.msra.gmra.mrb[0].mxu1 %v1528_v30  ;;  %v9630_v30 = vld [vmem:[#allocation14 + $0x8] sm:$0xff] }
 0x36d   : > { %7162 = vmatpush3.bf16.msra.mxu1 %v9539_v40  ;;  %6009 = vmatprep.mubr.msk.f32.mxu1 %vm8684_vm0, %v11136_v1  ;;  %v2085_v40 = vld [vmem:[#allocation11] sm:$0xff] }
 0x36e   : > { %7163 = vmatprep.subr.bf16.mxu1 %v11139_v0 }
 0x371   : > { %7165 = vmatpush3.bf16.msra.mxu1 %v7164_v17  ;;  %v2086_v17 = vld [vmem:[#allocation11 + $0x8] sm:$0xff] }
 0x372   : > { %7166 = vmatprep.subr.bf16.mxu1 %v11139_v0 }
 0x375   : > { %7168 = vmatpush3.bf16.msra.mxu1 %v7167_v7  ;;  %v9626_v7 = vld [vmem:[#allocation14] sm:$0xff] }
 0x376   : > { %7169 = vmatprep.subr.bf16.mxu1 %v11139_v0  ;;  %v11121_v24 = vand.u32 4294901760, %v9626_v7 }
 0x378   : > { %v9646_v54 = vsub.f32 %v9626_v7, %v11121_v24 }
 0x379   : > { %7171 = vmatpush3.bf16.msra.mxu1 %v7170_v26  ;;  %v2109_v26 = vand.u32 4294901760, %v2085_v40 }
 0x37a   : > { %7172 = vmatprep.subr.bf16.mxu1 %v11139_v0 }
 0x37d   : > { %7174 = vmatpush3.bf16.msra.mxu1 %v7173_v4  ;;  %v2112_v4 = vand.u32 4294901760, %v2086_v17 }
 0x37e   : > { %7175 = vmatprep.subr.bf16.mxu1 %v11139_v0 }
 0x37f   : > { %v9637_v21 = vpack.c.bf16 %v2112_v4, %v2109_v26  ;;  %v9641_v52 = vsub.f32 %v2086_v17, %v2112_v4  ;;  %v11128_v17 = vand.u32 4294901760, %v9648_v12 }
 0x381   : > { %7177 = vmatpush3.bf16.msra.mxu1 %v7176_v25  ;;  %v11122_v25 = vand.u32 4294901760, %v9630_v30  ;;  %11276 = vst [vmem:[#allocation43_spill] sm:$0xff] %v9637_v21  ;;  %7282 = vmatpush3.bf16.msra.mxu0 %v9637_v21  ;;  %v9676_v22 = vsub.f32 %v9648_v12, %v11128_v17  ;;  %v11283_v21 = vmov 0.0|0.0  }
 0x382   : > { %7178 = vmatprep.subr.bf16.mxu1 %v11139_v0  ;;  %7283 = vmatprep.subr.bf16.mxu0 %v11139_v0 }
 0x383   : > { %v9653_v61 = vsub.f32 %v9630_v30, %v11122_v25  ;;  %v2089_v25 = vld [vmem:[#allocation11 + $0x20] sm:$0xff] }
 0x384   : > { %v2121_v46 = vand.u32 4294901760, %v2089_v25 }
 0x385   : > { %7180 = vmatpush3.bf16.msra.mxu1 %v7179_v50  ;;  %v2087_v50 = vld [vmem:[#allocation11 + $0x10] sm:$0xff] }
 0x386   : > { %7181 = vmatprep.subr.bf16.mxu1 %v11139_v0  ;;  %v2115_v31 = vand.u32 4294901760, %v2087_v50 }
 0x388   : > { %v9662_v4 = vsub.f32 %v2087_v50, %v2115_v31  ;;  %v11135_v50 = vand.u32 4294901760, %v9666_v27 }
 0x389   : > { %7183 = vmatpush3.bf16.msra.mxu1 %v7182_v55  ;;  %v2088_v55 = vld [vmem:[#allocation11 + $0x18] sm:$0xff] }
 0x38a   : > { %7184 = vmatprep.subr.bf16.mxu1 %v11139_v0  ;;  %v2118_v18 = vand.u32 4294901760, %v2088_v55 }
 0x38c   : > { %6010 = vmatmul.mubr.f32.vlgmr.msra.gmra.mrb[0].mxu1 %v9605_v45  ;;  %v9664_v24 = vsub.f32 %v2088_v55, %v2118_v18  ;;  %v11138_v55 = vand.u32 4294901760, %v9678_v16 }
 0x38d   : > { %7186 = vmatpush3.bf16.msra.mxu1 %v7185_v58  ;;  %6044 = vmatprep.mubr.msk.f32.mxu1 %vm8684_vm0, %v11136_v1  ;;  %v9639_v58 = vsub.f32 %v2085_v40, %v2109_v26  ;;  %v11129_v40 = vand.u32 4294901760, %v9635_v49  ;;  %v9660_v26 = vpack.c.bf16 %v2118_v18, %v2115_v31  ;;  %v2124_v31 = vand.u32 4294901760, %v2090_v13 }
 0x38e   : > { %7187 = vmatprep.subr.bf16.mxu1 %v11139_v0  ;;  %v9684_v18 = vsub.f32 %v2089_v25, %v2121_v46  ;;  %v9704_v25 = vsub.f32 %v9678_v16, %v11138_v55  ;;  %v9716_v1 = vsub.f32 %v2091_v11, %v2127_v32  ;;  %v9718_v55 = vsub.f32 %v2092_v10, %v2130_v29  ;;  %v9734_v11 = vld [vmem:[#allocation14 + $0x48] sm:$0xff] }
 0x38f   : > { %11277 = vst [vmem:[#allocation44_spill] sm:$0xff] %v9660_v26  ;;  %7285 = vmatpush3.bf16.msra.mxu0 %v9660_v26  ;;  %v9690_v17 = vpack.c.bf16 %v2124_v31, %v2121_v46  ;;  %v9706_v46 = vld [vmem:[#allocation14 + $0x38] sm:$0xff]  ;;  %v2136_v10 = vand.u32 4294901760, %v2094_v9 }
 0x390   : > { %7286 = vmatprep.subr.bf16.mxu0 %v11139_v0 }
 0x391   : > { %7189 = vmatpush3.bf16.msra.mxu1 %v7188_v59  ;;  %v9671_v59 = vsub.f32 %v9635_v49, %v11129_v40  ;;  %11278 = vst [vmem:[#allocation45_spill] sm:$0xff] %v9690_v17  ;;  %v9692_v40 = vsub.f32 %v2090_v13, %v2124_v31  ;;  %v11141_v13 = vand.u32 4294901760, %v9694_v57  ;;  %v11142_v31 = vand.u32 4294901760, %v9706_v46 }
 0x392   : > { %7190 = vmatprep.subr.bf16.mxu1 %v11139_v0  ;;  %v9746_v26 = vsub.f32 %v2094_v9, %v2136_v10  ;;  %v11286_v9 = vpack.c.bf16 %v9512_v3, %v9510_v2 }
 0x393   : > { %7288 = vmatpush3.bf16.msra.mxu0 %v9690_v17  ;;  %v9725_v41 = vsub.f32 %v9694_v57, %v11141_v13  ;;  %v11281_v13 = vpack.c.bf16 %v9406_v23, %v9404_v14 }
 0x394   : > { %7289 = vmatprep.subr.bf16.mxu0 %v11139_v0 }
 0x395   : > { %7192 = vmatpush3.bf16.msra.mxu1 %v7191_v28  ;;  %v9699_v28 = vsub.f32 %v9666_v27, %v11135_v50  ;;  %v9714_v50 = vpack.c.bf16 %v2130_v29, %v2127_v32  ;;  %v9732_v32 = vld [vmem:[#allocation14 + $0x40] sm:$0xff]  ;;  %v2133_v29 = vand.u32 4294901760, %v2093_v15 }
 0x396   : > { %7193 = vmatprep.subr.bf16.mxu1 %v11139_v0 }
 0x397   : > { %11279 = vst [vmem:[#allocation46_spill] sm:$0xff] %v9714_v50  ;;  %7291 = vmatpush3.bf16.msra.mxu0 %v9714_v50  ;;  %v9744_v17 = vsub.f32 %v2093_v15, %v2133_v29  ;;  %v11285_v15 = vpack.c.bf16 %v9507_v63, %v9505_v62 }
 0x398   : > { %7292 = vmatprep.subr.bf16.mxu0 %v11283_v21 }
 0x399   : > { %7195 = vmatpush3.bf16.msra.mxu1 %v7194_v37  ;;  %v9730_v37 = vsub.f32 %v9706_v46, %v11142_v31  ;;  %v9742_v31 = vpack.c.bf16 %v2136_v10, %v2133_v29  ;;  %v11288_v29 = vmov 0.0   ;;  %v11289_v10 = vand.u32 4294901760, %v9381_v33 }
 0x39a   : > { %7196 = vmatprep.subr.bf16.mxu1 %v11139_v0  ;;  %v11150_v0 = vand.u32 4294901760, %v9732_v32  ;;  %v11294_v33 = vand.u32 4294901760, %v9393_v19  ;;  %v11300_v19 = vand.u32 4294901760, %v9505_v62  ;;  %v11313_v62 = vand.u32 4294901760, %v9678_v16 }
 0x39b   : > { %11280 = vst [vmem:[#allocation47_spill] sm:$0xff] %v9730_v37  ;;  %11282 = vst [vmem:[#allocation48_spill] sm:$0xff] %v9742_v31  ;;  %v11284_v37 = vand.u32 4294901760, %v9734_v11  ;;  %7294 = vmatpush3.bf16.msra.mxu0 %v9742_v31  ;;  %v11293_v31 = vand.u32 4294901760, %v9391_v56 }
 0x39c   : > { %v9753_v39 = vsub.f32 %v9732_v32, %v11150_v0  ;;  %7295 = vmatprep.subr.bf16.mxu0 %v11283_v21  ;;  %v11292_v0 = vand.u32 4294901760, %v9385_v48  ;;  %v11297_v48 = vand.u32 4294901760, %v9402_v44  ;;  %v11303_v44 = vand.u32 4294901760, %v9512_v3 }
 0x39d   : > { %7198 = vmatpush3.bf16.msra.mxu1 %v11281_v13  ;;  %v9758_v13 = vsub.f32 %v9734_v11, %v11284_v37  ;;  %v11287_v37 = vpack.c.bf16 %v9521_v36, %v9519_v35  ;;  %v11316_v3 = vand.u32 4294901760, %v9706_v46 }
 0x39e   : > { %7199 = vmatprep.subr.bf16.mxu1 %v11283_v21  ;;  %v7236_v50 = vpack.c.bf16 %v11293_v31, %v11292_v0  ;;  %v11298_v0 = vand.u32 4294901760, %v9404_v14  ;;  %v11304_v14 = vand.u32 4294901760, %v9519_v35  ;;  %v11318_v35 = vand.u32 4294901760, %v9732_v32 }
 0x3a1   : > { %7201 = vmatpush3.bf16.msra.mxu1 %v11285_v15  ;;  %v11290_v15 = vand.u32 4294901760, %v9383_v42  ;;  %v11295_v42 = vand.u32 4294901760, %v9396_v20  ;;  %v11301_v20 = vand.u32 4294901760, %v9507_v63 }
 0x3a2   : > { %7202 = vmatprep.subr.bf16.mxu1 %v11283_v21 }
 0x3a5   : > { %7204 = vmatpush3.bf16.msra.mxu1 %v11286_v9  ;;  %v7233_v9 = vpack.c.bf16 %v11290_v15, %v11289_v10  ;;  %v7239_v10 = vpack.c.bf16 %v11295_v42, %v11294_v33  ;;  %v7248_v15 = vpack.c.bf16 %v11301_v20, %v11300_v19  ;;  %v2098_v42 = vld [vmem:[#allocation11 + $0x68] sm:$0xff]  ;;  %v2099_v20 = vld [vmem:[#allocation11 + $0x70] sm:$0xff] }
 0x3a6   : > { %7205 = vmatprep.subr.bf16.mxu1 %v11283_v21 }
 0x3a9   : > { %7207 = vmatpush3.bf16.msra.mxu1 %v11287_v37  ;;  %v11291_v37 = vand.u32 4294901760, %v9608_v6 }
 0x3aa   : > { %7208 = vmatprep.subr.bf16.mxu1 %v11283_v21 }
 0x3ac   : > { %6045 = vmatmul.mubr.f32.vlgmr.msra.gmra.mrb[0].mxu1 %v9608_v6  ;;  %v11296_v6 = vand.u32 4294901760, %v9400_v43  ;;  %v11302_v43 = vand.u32 4294901760, %v9510_v2  ;;  %v11315_v2 = vand.u32 4294901760, %v9694_v57  ;;  %v2096_v57 = vld [vmem:[#allocation11 + $0x58] sm:$0xff] }
 0x3ad   : > { %7210 = vmatpush3.bf16.msra.mxu1 %v9379_v47  ;;  %6079 = vmatprep.mubr.msk.f32.mxu1 %vm8684_vm0, %v11288_v29 }
 0x3ae   : > { %7211 = vmatprep.subr.bf16.mxu1 %v11283_v21  ;;  %v7242_v56 = vpack.c.bf16 %v11297_v48, %v11296_v6  ;;  %v2148_v48 = vand.u32 4294901760, %v2098_v42 }
 0x3b1   : > { %7213 = vmatpush3.bf16.msra.mxu1 %v9389_v53 }
 0x3b2   : > { %7214 = vmatprep.subr.bf16.mxu1 %v11283_v21 }
 0x3b5   : > { %7216 = vmatpush3.bf16.msra.mxu1 %v9411_v5 }
 0x3b6   : > { %7217 = vmatprep.subr.bf16.mxu1 %v11283_v21 }
 0x3b9   : > { %7219 = vmatpush3.bf16.msra.mxu1 %v9418_v8 }
 0x3ba   : > { %7220 = vmatprep.subr.bf16.mxu1 %v11283_v21 }
 0x3bd   : > { %7222 = vmatpush3.bf16.msra.mxu1 %v9425_v51 }
 0x3be   : > { %7223 = vmatprep.subr.bf16.mxu1 %v11283_v21 }
 0x3c1   : > { %7225 = vmatpush3.bf16.msra.mxu1 %v9499_v38 }
 0x3c2   : > { %7226 = vmatprep.subr.bf16.mxu1 %v11283_v21 }
 0x3c5   : > { %7228 = vmatpush3.bf16.msra.mxu1 %v9503_v60 }
 0x3c6   : > { %7229 = vmatprep.subr.bf16.mxu1 %v11283_v21 }
 0x3c9   : > { %7231 = vmatpush3.bf16.msra.mxu1 %v9517_v34 }
 0x3ca   : > { %7232 = vmatprep.subr.bf16.mxu1 %v11283_v21 }
 0x3cc   : > { %6080 = vmatmul.mubr.f32.vlgmr.msra.gmra.mrb[0].mxu1 %v11291_v37 }
 0x3cd   : > { %7234 = vmatpush3.bf16.msra.mxu1 %v7233_v9  ;;  %6114 = vmatprep.mubr.msk.f32.mxu1 %vm8684_vm0, %v11288_v29  ;;  %v7251_v9 = vpack.c.bf16 %v11303_v44, %v11302_v43  ;;  %v2763_v43 = vld [vmem:[#allocation14 + $0x70] sm:$0xff]  ;;  %v2151_v44 = vand.u32 4294901760, %v2099_v20 }
 0x3ce   : > { %7235 = vmatprep.subr.bf16.mxu1 %v11283_v21 }
 0x3d1   : > { %7237 = vmatpush3.bf16.msra.mxu1 %v7236_v50  ;;  %v11299_v50 = vand.u32 4294901760, %v9406_v23  ;;  %v11305_v23 = vand.u32 4294901760, %v9521_v36  ;;  %v11319_v36 = vand.u32 4294901760, %v9734_v11  ;;  %v2097_v11 = vld [vmem:[#allocation11 + $0x60] sm:$0xff] }
 0x3d2   : > { %7238 = vmatprep.subr.bf16.mxu1 %v11283_v21  ;;  %v2145_v6 = vand.u32 4294901760, %v2097_v11 }
 0x3d3   : > { %v7245_v31 = vpack.c.bf16 %v11299_v50, %v11298_v0  ;;  %v7254_v37 = vpack.c.bf16 %v11305_v23, %v11304_v14  ;;  %v9894_v16 = vpack.c.bf16 %v11319_v36, %v11318_v35  ;;  %v2764_v14 = vld [vmem:[#allocation14 + $0x78] sm:$0xff]  ;;  %v2815_v23 = vand.u32 4294901760, %v2763_v43 }
 0x3d4   : > { %v9927_v35 = vsub.f32 %v2097_v11, %v2145_v6  ;;  %v9929_v36 = vsub.f32 %v2098_v42, %v2148_v48  ;;  %v11329_v42 = vand.u32 4294901760, %v9646_v54 }
 0x3d5   : > { %7240 = vmatpush3.bf16.msra.mxu1 %v7239_v10  ;;  %11320 = vst [vmem:[#allocation53_spill] sm:$0xff] %v9894_v16  ;;  %v2761_v10 = vld [vmem:[#allocation14 + $0x60] sm:$0xff] }
 0x3d6   : > { %7241 = vmatprep.subr.bf16.mxu1 %v11283_v21  ;;  %v2809_v0 = vand.u32 4294901760, %v2761_v10 }
 0x3d9   : > { %7243 = vmatpush3.bf16.msra.mxu1 %v7242_v56  ;;  %v2762_v56 = vld [vmem:[#allocation14 + $0x68] sm:$0xff] }
 0x3da   : > { %7244 = vmatprep.subr.bf16.mxu1 %v11283_v21  ;;  %v2812_v50 = vand.u32 4294901760, %v2762_v56 }
 0x3dc   : > { %v9909_v19 = vpack.c.bf16 %v2812_v50, %v2809_v0 }
 0x3dd   : > { %7246 = vmatpush3.bf16.msra.mxu1 %v7245_v31  ;;  %v9907_v31 = vpack.c.bf16 %v2148_v48, %v2145_v6  ;;  %v11160_v48 = vand.u32 4294901760, %v9662_v4 }
 0x3de   : > { %7247 = vmatprep.subr.bf16.mxu1 %v11283_v21  ;;  %11324 = vst [vmem:[#allocation57_spill] sm:$0xff] %v9909_v19 }
 0x3df   : > { %11323 = vst [vmem:[#allocation56_spill] sm:$0xff] %v9907_v31 }
 0x3e1   : > { %7249 = vmatpush3.bf16.msra.mxu1 %v7248_v15  ;;  %v2100_v15 = vld [vmem:[#allocation11 + $0x78] sm:$0xff] }
 0x3e2   : > { %7250 = vmatprep.subr.bf16.mxu1 %v11283_v21 }
 0x3e5   : > { %7252 = vmatpush3.bf16.msra.mxu1 %v7251_v9  ;;  %v2154_v9 = vand.u32 4294901760, %v2100_v15 }
 0x3e6   : > { %7253 = vmatprep.subr.bf16.mxu1 %v11283_v21 }
 0x3e9   : > { %7255 = vmatpush3.bf16.msra.mxu1 %v7254_v37  ;;  %v9931_v37 = vsub.f32 %v2761_v10, %v2809_v0  ;;  %v2867_v10 = vsub.f32 %v9646_v54, %v11329_v42 }
 0x3ea   : > { %7256 = vmatprep.subr.bf16.mxu1 %v11283_v21 }
 0x3ec   : > { %6115 = vmatmul.mubr.f32.vlgmr.msra.gmra.mrb[0].mxu1 %v9605_v45 }
 0x3ed   : > { %7258 = vmatpush3.bf16.msra.mxu1 %v9379_v47  ;;  %6149 = vmatprep.mubr.msk.f32.mxu1 %vm8684_vm0, %v11288_v29  ;;  %v11306_v47 = vand.u32 4294901760, %v9626_v7 }
 0x3ee   : > { %7259 = vmatprep.subr.bf16.mxu1 %v11283_v21 }
 0x3f1   : > { %7261 = vmatpush3.bf16.msra.mxu1 %v9389_v53  ;;  %v11307_v53 = vand.u32 4294901760, %v9630_v30  ;;  %v2142_v30 = vand.u32 4294901760, %v2096_v57 }
 0x3f2   : > { %7262 = vmatprep.subr.bf16.mxu1 %v11283_v21 }
 0x3f5   : > { %7264 = vmatpush3.bf16.msra.mxu1 %v9411_v5  ;;  %v9859_v5 = vpack.c.bf16 %v11307_v53, %v11306_v47  ;;  %v2818_v47 = vand.u32 4294901760, %v2764_v14  ;;  %v9933_v53 = vsub.f32 %v2762_v56, %v2812_v50  ;;  %v11155_v56 = vand.u32 4294901760, %v9664_v24 }
 0x3f6   : > { %7265 = vmatprep.subr.bf16.mxu1 %v11283_v21 }
 0x3f7   : > { %11308 = vst [vmem:[#allocation49_spill] sm:$0xff] %v9859_v5 }
 0x3f9   : > { %7267 = vmatpush3.bf16.msra.mxu1 %v9418_v8  ;;  %v11309_v8 = vand.u32 4294901760, %v9635_v49  ;;  %v2760_v49 = vld [vmem:[#allocation14 + $0x58] sm:$0xff] }
 0x3fa   : > { %7268 = vmatprep.subr.bf16.mxu1 %v11283_v21  ;;  %v2806_v46 = vand.u32 4294901760, %v2760_v49 }
 0x3fd   : > { %7270 = vmatpush3.bf16.msra.mxu1 %v9425_v51  ;;  %v11310_v51 = vand.u32 4294901760, %v9648_v12 }
 0x3fe   : > { %7271 = vmatprep.subr.bf16.mxu1 %v11283_v21 }
 0x401   : > { %7273 = vmatpush3.bf16.msra.mxu1 %v9499_v38  ;;  %v9868_v38 = vpack.c.bf16 %v11310_v51, %v11309_v8  ;;  %v11163_v51 = vand.u32 4294901760, %v9653_v61  ;;  %v9935_v8 = vpack.c.bf16 %v2154_v9, %v2151_v44 }
 0x402   : > { %7274 = vmatprep.subr.bf16.mxu1 %v11283_v21 }
 0x403   : > { %11311 = vst [vmem:[#allocation50_spill] sm:$0xff] %v9868_v38  ;;  %11325 = vst [vmem:[#allocation58_spill] sm:$0xff] %v9935_v8  ;;  %v2874_v6 = vsub.f32 %v9653_v61, %v11163_v51 }
 0x405   : > { %7276 = vmatpush3.bf16.msra.mxu1 %v9503_v60  ;;  %v11312_v60 = vand.u32 4294901760, %v9666_v27  ;;  %v2095_v27 = vld [vmem:[#allocation11 + $0x50] sm:$0xff] }
 0x406   : > { %7277 = vmatprep.subr.bf16.mxu1 %v11283_v21  ;;  %v2139_v7 = vand.u32 4294901760, %v2095_v27 }
 0x407   : > { %v9878_v63 = vpack.c.bf16 %v11313_v62, %v11312_v60  ;;  %v9920_v62 = vsub.f32 %v2096_v57, %v2142_v30  ;;  %v9939_v57 = vsub.f32 %v2100_v15, %v2154_v9  ;;  %v11157_v15 = vand.u32 4294901760, %v9676_v22 }
 0x408   : > { %v9899_v33 = vpack.c.bf16 %v2142_v30, %v2139_v7  ;;  %v9918_v60 = vsub.f32 %v2095_v27, %v2139_v7  ;;  %v9937_v27 = vsub.f32 %v2099_v20, %v2151_v44  ;;  %v9943_v7 = vsub.f32 %v2763_v43, %v2815_v23 }
 0x409   : > { %7279 = vmatpush3.bf16.msra.mxu1 %v9517_v34  ;;  %11314 = vst [vmem:[#allocation51_spill] sm:$0xff] %v9878_v63  ;;  %v9886_v34 = vpack.c.bf16 %v11316_v3, %v11315_v2  ;;  %v9924_v3 = vsub.f32 %v2760_v49, %v2806_v46  ;;  %v9945_v30 = vsub.f32 %v2764_v14, %v2818_v47  ;;  %v11327_v49 = vand.u32 4294901760, %v9639_v58 }
 0x40a   : > { %7424 = vmatprep.subr.bf16.mxu1 %v11283_v21  ;;  %11321 = vst [vmem:[#allocation54_spill] sm:$0xff] %v9899_v33  ;;  %7297 = vmatpush3.bf16.msra.mxu0 %v9899_v33  ;;  %v11156_v20 = vand.u32 4294901760, %v9671_v59  ;;  %v2868_v43 = vand.u32 4294901760, %v2867_v10  ;;  %v2875_v44 = vand.u32 4294901760, %v2874_v6  ;;  %v2217_v9 = vsub.f32 %v9662_v4, %v11160_v48 }
 0x40b   : > { %11317 = vst [vmem:[#allocation52_spill] sm:$0xff] %v9886_v34  ;;  %7298 = vmatprep.subr.bf16.mxu0 %v11283_v21  ;;  %v2224_v14 = vsub.f32 %v9664_v24, %v11155_v56  ;;  %v11158_v10 = vand.u32 4294901760, %v9692_v40  ;;  %v11196_v33 = vand.u32 4294901760, %v9931_v37 }
 0x40c   : > { %6150 = vmatmul.mubr.f32.vlgmr.msra.gmra.mrb[0].mxu1 %v9605_v45  ;;  %v2759_v45 = vld [vmem:[#allocation14 + $0x50] sm:$0xff] }
 0x40d   : > { %7426 = vmatpush3.bf16.msra.mxu1 %v9859_v5  ;;  %6394 = vmatprep.mubr.msk.f32.mxu1 %vm8684_vm0, %v11288_v29  ;;  %v2803_v12 = vand.u32 4294901760, %v2759_v45  ;;  %v2225_v42 = vand.u32 4294901760, %v2224_v14 }
 0x40e   : > { %7427 = vmatprep.subr.bf16.mxu1 %v11283_v21  ;;  %7300 = vmatpush3.bf16.msra.mxu0 %v9907_v31  ;;  %v11181_v31 = vand.u32 4294901760, %v9918_v60 }
 0x40f   : > { %v9901_v32 = vpack.c.bf16 %v2806_v46, %v2803_v12  ;;  %7301 = vmatprep.subr.bf16.mxu0 %v11283_v21  ;;  %v9922_v2 = vsub.f32 %v2759_v45, %v2803_v12  ;;  %v9941_v45 = vpack.c.bf16 %v2818_v47, %v2815_v23  ;;  %v2203_v12 = vsub.f32 %v9639_v58, %v11327_v49 }
 0x410   : > { %v11328_v46 = vand.u32 4294901760, %v9641_v52  ;;  %v2881_v47 = vsub.f32 %v9671_v59, %v11156_v20  ;;  %v2888_v49 = vsub.f32 %v9676_v22, %v11157_v15  ;;  %v2238_v15 = vsub.f32 %v9692_v40, %v11158_v10 }
 0x411   : > { %7429 = vmatpush3.bf16.msra.mxu1 %v9868_v38  ;;  %11322 = vst [vmem:[#allocation55_spill] sm:$0xff] %v9901_v32  ;;  %11326 = vst [vmem:[#allocation59_spill] sm:$0xff] %v9941_v45  ;;  %v2204_v0 = vand.u32 4294901760, %v2203_v12  ;;  %v11159_v12 = vand.u32 4294901760, %v9684_v18  ;;  %v11170_v10 = vand.u32 4294901760, %v9725_v41 }
 0x412   : > { %7430 = vmatprep.subr.bf16.mxu1 %v11283_v21  ;;  %v2210_v11 = vsub.f32 %v9641_v52, %v11328_v46  ;;  %7303 = vmatpush3.bf16.msra.mxu0 %v9935_v8  ;;  %v9982_v46 = vpack.c.bf16 %v2875_v44, %v2868_v43  ;;  %v2882_v6 = vand.u32 4294901760, %v2881_v47  ;;  %v2889_v56 = vand.u32 4294901760, %v2888_v49 }
 0x413   : > { %7304 = vmatprep.subr.bf16.mxu0 %v11283_v21  ;;  %v11162_v43 = vand.u32 4294901760, %v9704_v25  ;;  %v11164_v47 = vand.u32 4294901760, %v9716_v1  ;;  %v2239_v49 = vand.u32 4294901760, %v2238_v15  ;;  %v11180_v8 = vand.u32 4294901760, %v9753_v39 }
 0x414   : > { %v2211_v50 = vand.u32 4294901760, %v2210_v11  ;;  %v2218_v11 = vand.u32 4294901760, %v2217_v9  ;;  %v9995_v44 = vpack.c.bf16 %v2889_v56, %v2882_v6  ;;  %v11330_v6 = vld [vmem:[#allocation47_spill] sm:$0xff] }
 0x415   : > { %7432 = vmatpush3.bf16.msra.mxu1 %v9878_v63  ;;  %v2245_v56 = vsub.f32 %v9716_v1, %v11164_v47  ;;  %v11174_v47 = vand.u32 4294901760, %v9744_v17 }
 0x416   : > { %7433 = vmatprep.subr.bf16.mxu1 %v11283_v21  ;;  %v9973_v23 = vpack.c.bf16 %v2211_v50, %v2204_v0  ;;  %v2231_v0 = vsub.f32 %v9684_v18, %v11159_v12  ;;  %v11161_v50 = vand.u32 4294901760, %v9699_v28  ;;  %v9989_v20 = vpack.c.bf16 %v2225_v42, %v2218_v11 }
 0x417   : > { %v2902_v11 = vsub.f32 %v9704_v25, %v11162_v43  ;;  %v11169_v42 = vand.u32 4294901760, %v9718_v55  ;;  %v2909_v43 = vsub.f32 %v9725_v41, %v11170_v10  ;;  %v2246_v51 = vand.u32 4294901760, %v2245_v56 }
 0x418   : > { %v2232_v9 = vand.u32 4294901760, %v2231_v0  ;;  %v2895_v14 = vsub.f32 %v9699_v28, %v11161_v50  ;;  %v11171_v0 = vand.u32 4294901760, %v11330_v6  ;;  %v2259_v10 = vsub.f32 %v9744_v17, %v11174_v47 }
 0x419   : > { %7435 = vmatpush3.bf16.msra.mxu1 %v9886_v34  ;;  %v2903_v50 = vand.u32 4294901760, %v2902_v11  ;;  %v2252_v15 = vsub.f32 %v9718_v55, %v11169_v42  ;;  %v2910_v11 = vand.u32 4294901760, %v2909_v43  ;;  %v11202_v34 = vand.u32 4294901760, %v9937_v27 }
 0x41a   : > { %7436 = vmatprep.subr.bf16.mxu1 %v11283_v21  ;;  %v2896_v12 = vand.u32 4294901760, %v2895_v14  ;;  %v10010_v48 = vpack.c.bf16 %v2239_v49, %v2232_v9  ;;  %v2916_v14 = vsub.f32 %v11330_v6, %v11171_v0  ;;  %v11182_v0 = vand.u32 4294901760, %v9758_v13 }
 0x41b   : > { %v2253_v49 = vand.u32 4294901760, %v2252_v15  ;;  %v2260_v43 = vand.u32 4294901760, %v2259_v10  ;;  %v2273_v10 = vsub.f32 %v9918_v60, %v11181_v31 }
 0x41c   : > { %v10023_v9 = vpack.c.bf16 %v2903_v50, %v2896_v12  ;;  %v2917_v42 = vand.u32 4294901760, %v2916_v14  ;;  %v2923_v12 = vsub.f32 %v9753_v39, %v11180_v8  ;;  %v2930_v14 = vsub.f32 %v9758_v13, %v11182_v0 }
 0x41d   : > { %7438 = vmatpush3.bf16.msra.mxu1 %v9894_v16  ;;  %v11187_v8 = vand.u32 4294901760, %v9924_v3 }
 0x41e   : > { %7439 = vmatprep.subr.bf16.mxu1 %v11283_v21  ;;  %v10038_v50 = vpack.c.bf16 %v2917_v42, %v2910_v11  ;;  %v2924_v47 = vand.u32 4294901760, %v2923_v12 }
 0x41f   : > { %v2944_v12 = vsub.f32 %v9924_v3, %v11187_v8 }
 0x421   : > { %7441 = vmatpush3.bf16.msra.mxu1 %v9901_v32  ;;  %v2931_v32 = vand.u32 4294901760, %v2930_v14  ;;  %v2274_v14 = vand.u32 4294901760, %v2273_v10  ;;  %v2951_v10 = vsub.f32 %v9931_v37, %v11196_v33  ;;  %v11205_v33 = vand.u32 4294901760, %v9945_v30 }
 0x422   : > { %7442 = vmatprep.subr.bf16.mxu1 %v11283_v21 }
 0x423   : > { %v2952_v16 = vand.u32 4294901760, %v2951_v10  ;;  %v2972_v10 = vsub.f32 %v9945_v30, %v11205_v33 }
 0x425   : > { %7444 = vmatpush3.bf16.msra.mxu1 %v9909_v19  ;;  %v10033_v19 = vpack.c.bf16 %v2253_v49, %v2246_v51  ;;  %v11186_v51 = vand.u32 4294901760, %v9922_v2 }
 0x426   : > { %7445 = vmatprep.subr.bf16.mxu1 %v11283_v21 }
 0x427   : > { %v2937_v11 = vsub.f32 %v9922_v2, %v11186_v51 }
 0x429   : > { %7447 = vmatpush3.bf16.msra.mxu1 %v9941_v45  ;;  %v11177_v45 = vand.u32 4294901760, %v9746_v26  ;;  %v2938_v0 = vand.u32 4294901760, %v2937_v11 }
 0x42a   : > { %7448 = vmatprep.subr.bf16.mxu1 %v11283_v21 }
 0x42b   : > { %v2266_v56 = vsub.f32 %v9746_v26, %v11177_v45  ;;  %v11185_v45 = vand.u32 4294901760, %v9920_v62 }
 0x42d   : > { %v2267_v15 = vand.u32 4294901760, %v2266_v56  ;;  %v2280_v42 = vsub.f32 %v9920_v62, %v11185_v45  ;;  %v10058_v56 = vpack.c.bf16 %v2931_v32, %v2924_v47  ;;  %v2945_v45 = vand.u32 4294901760, %v2944_v12 }
 0x42e   : > { %v11197_v47 = vand.u32 4294901760, %v9933_v53 }
 0x42f   : > { %v10046_v49 = vpack.c.bf16 %v2267_v15, %v2260_v43  ;;  %v11188_v43 = vand.u32 4294901760, %v9927_v35  ;;  %v11193_v15 = vand.u32 4294901760, %v9929_v36  ;;  %v2281_v31 = vand.u32 4294901760, %v2280_v42 }
 0x430   : > { %v10078_v42 = vpack.c.bf16 %v2945_v45, %v2938_v0  ;;  %v2301_v45 = vsub.f32 %v9937_v27, %v11202_v34  ;;  %v7329_v34 = vpack.c.bf16 %v9641_v52, %v9639_v58 }
 0x431   : > { %v2287_v51 = vsub.f32 %v9927_v35, %v11188_v43  ;;  %v2294_v32 = vsub.f32 %v9929_v36, %v11193_v15  ;;  %v10073_v8 = vpack.c.bf16 %v2281_v31, %v2274_v14  ;;  %v2958_v43 = vsub.f32 %v9933_v53, %v11197_v47 }
 0x432   : > { %v11203_v15 = vand.u32 4294901760, %v9939_v57  ;;  %v11204_v31 = vand.u32 4294901760, %v9943_v7  ;;  %v2973_v47 = vand.u32 4294901760, %v2972_v10 }
 0x433   : > { %v2288_v11 = vand.u32 4294901760, %v2287_v51  ;;  %v2295_v12 = vand.u32 4294901760, %v2294_v32  ;;  %v2959_v63 = vand.u32 4294901760, %v2958_v43  ;;  %v2302_v43 = vand.u32 4294901760, %v2301_v45 }
 0x434   : > { %v2308_v0 = vsub.f32 %v9939_v57, %v11203_v15  ;;  %v2965_v51 = vsub.f32 %v9943_v7, %v11204_v31  ;;  %v7473_v15 = vpack.c.bf16 %v9653_v61, %v9646_v54  ;;  %v7332_v31 = vpack.c.bf16 %v9664_v24, %v9662_v4 }
 0x435   : > { %v10086_v14 = vpack.c.bf16 %v2295_v12, %v2288_v11  ;;  %v7467_v32 = vpack.c.bf16 %v2959_v63, %v2952_v16 }
 0x436   : > { %v2309_v11 = vand.u32 4294901760, %v2308_v0  ;;  %v2966_v12 = vand.u32 4294901760, %v2965_v51  ;;  %v7494_v51 = vpack.c.bf16 %v9945_v30, %v9943_v7 }
 0x438   : > { %v7326_v38 = vpack.c.bf16 %v2309_v11, %v2302_v43  ;;  %v7470_v5 = vpack.c.bf16 %v2973_v47, %v2966_v12  ;;  %v5107_v47 = vld [vmem:[#allocation10] ss:$0 sm:$0xff] }
 0x4df   : > { %v2080_v10 = vpop.f32.mrb[0].mxu1 }
 0x4e0   : > { %v7857_v45 = vadd.f32 %v5107_v47, %v2080_v10  ;;  %v6151_v16 = vpop.f32.mrb[1].mxu1  ;;  %v11347_v47 = vld [vmem:[#allocation45_spill] sm:$0xff]  ;;  %v11350_v10 = vld [vmem:[#allocation52_spill] sm:$0xff] }
 0x4e1   : > { %v11345_v16 = vld [vmem:[#allocation44_spill] sm:$0xff] }
 0x4e2   : > { %v2084_v43 = vmax.f32 %v7857_v45, 0.0  ;;  %v11346_v45 = vld [vmem:[#allocation50_spill] sm:$0xff] }
 0x4e4   : > { %v10133_v63 = vand.u32 4294901760, %v2084_v43 }
 0x4e6   : > { %v10136_v11 = vsub.f32 %v2084_v43, %v10133_v63  ;;  %v11351_v43 = vld [vmem:[#allocation48_spill] sm:$0xff] }
 0x4e8   : > { %v10139_v12 = vand.u32 4294901760, %v10136_v11 }
 0x4ea   : > { %v2192_v33 = vsub.f32 %v10136_v11, %v10139_v12 }
 0x4ec   : > { %v2193_v0 = vand.u32 4294901760, %v2192_v33  ;;  %v10178_v33 = vld [vmem:[#allocation19] sm:$0xff] }
 0x4ee   : > { %6185 = vmatmul.mubr.f32.vlgmr.msra.gmra.mrb[2].mxu0 %v2193_v0  ;;  %6395 = vmatmul.mubr.f32.vlgmr.msra.gmra.mrb[2].mxu1 %v2193_v0  ;;  %v11348_v0 = vld [vmem:[#allocation51_spill] sm:$0xff] }
 0x4ef   : > { %7306 = vmatpush3.bf16.msra.mxu0 %v9973_v23  ;;  %7450 = vmatpush3.bf16.msra.mxu1 %v9982_v46  ;;  %v11333_v23 = vpack.c.bf16 %v9704_v25, %v9699_v28  ;;  %v11334_v46 = vpack.c.bf16 %v9718_v55, %v9716_v1 }
 0x4f0   : > { %7307 = vmatprep.subr.bf16.mxu0 %v11283_v21  ;;  %7451 = vmatprep.subr.bf16.mxu1 %v11283_v21 }
 0x4f1   : > { %6219 = vmatprep.mubr.msk.f32.mxu0 %vm8684_vm0, %v11288_v29  ;;  %6429 = vmatprep.mubr.msk.f32.mxu1 %vm8684_vm0, %v11288_v29 }
 0x4f3   : > { %7309 = vmatpush3.bf16.msra.mxu0 %v9989_v20  ;;  %7453 = vmatpush3.bf16.msra.mxu1 %v9995_v44  ;;  %v11332_v20 = vpack.c.bf16 %v9692_v40, %v9684_v18  ;;  %v11335_v44 = vpack.c.bf16 %v11330_v6, %v9725_v41 }
 0x4f4   : > { %7310 = vmatprep.subr.bf16.mxu0 %v11283_v21  ;;  %7454 = vmatprep.subr.bf16.mxu1 %v11283_v21 }
 0x4f7   : > { %7312 = vmatpush3.bf16.msra.mxu0 %v10010_v48  ;;  %7456 = vmatpush3.bf16.msra.mxu1 %v10023_v9  ;;  %v11331_v48 = vpack.c.bf16 %v9676_v22, %v9671_v59  ;;  %v11336_v9 = vpack.c.bf16 %v9746_v26, %v9744_v17 }
 0x4f8   : > { %7313 = vmatprep.subr.bf16.mxu0 %v11283_v21  ;;  %7457 = vmatprep.subr.bf16.mxu1 %v11283_v21 }
 0x4fb   : > { %7315 = vmatpush3.bf16.msra.mxu0 %v10033_v19  ;;  %7459 = vmatpush3.bf16.msra.mxu1 %v10038_v50  ;;  %v10180_v19 = vld [vmem:[#allocation19 + $0x8] sm:$0xff]  ;;  %v11337_v50 = vpack.c.bf16 %v9758_v13, %v9753_v39 }
 0x4fc   : > { %7316 = vmatprep.subr.bf16.mxu0 %v11283_v21  ;;  %7460 = vmatprep.subr.bf16.mxu1 %v11283_v21 }
 0x4ff   : > { %7318 = vmatpush3.bf16.msra.mxu0 %v10046_v49  ;;  %7462 = vmatpush3.bf16.msra.mxu1 %v10058_v56  ;;  %v11338_v49 = vpack.c.bf16 %v9920_v62, %v9918_v60  ;;  %v11339_v56 = vpack.c.bf16 %v9924_v3, %v9922_v2 }
 0x500   : > { %7319 = vmatprep.subr.bf16.mxu0 %v11283_v21  ;;  %7463 = vmatprep.subr.bf16.mxu1 %v11283_v21 }
 0x503   : > { %7321 = vmatpush3.bf16.msra.mxu0 %v10073_v8  ;;  %7465 = vmatpush3.bf16.msra.mxu1 %v10078_v42  ;;  %v11341_v42 = vpack.c.bf16 %v9933_v53, %v9931_v37 }
 0x504   : > { %7322 = vmatprep.subr.bf16.mxu0 %v11283_v21  ;;  %7466 = vmatprep.subr.bf16.mxu1 %v11283_v21 }
 0x507   : > { %7324 = vmatpush3.bf16.msra.mxu0 %v10086_v14  ;;  %7468 = vmatpush3.bf16.msra.mxu1 %v7467_v32  ;;  %v11343_v14 = vld [vmem:[#allocation43_spill] sm:$0xff]  ;;  %v11344_v32 = vld [vmem:[#allocation49_spill] sm:$0xff] }
 0x508   : > { %7325 = vmatprep.subr.bf16.mxu0 %v11283_v21  ;;  %7469 = vmatprep.subr.bf16.mxu1 %v11283_v21 }
 0x50b   : > { %7327 = vmatpush3.bf16.msra.mxu0 %v7326_v38  ;;  %7471 = vmatpush3.bf16.msra.mxu1 %v7470_v5  ;;  %v3442_v5 = vand.u32 4294901760, %v10178_v33  ;;  %v3445_v38 = vand.u32 4294901760, %v10180_v19 }
 0x50c   : > { %7328 = vmatprep.subr.bf16.mxu0 %v11283_v21  ;;  %7472 = vmatprep.subr.bf16.mxu1 %v11283_v21 }
 0x50d   : > { %v10204_v8 = vsub.f32 %v10180_v19, %v3445_v38  ;;  %v3423_v19 = vld [vmem:[#allocation19 + $0x28] sm:$0xff] }
 0x50e   : > { %6220 = vmatmul.mubr.f32.vlgmr.msra.gmra.mrb[2].mxu0 %v10133_v63  ;;  %6430 = vmatmul.mubr.f32.vlgmr.msra.gmra.mrb[2].mxu1 %v10133_v63 }
 0x50f   : > { %7330 = vmatpush3.bf16.msra.mxu0 %v7329_v34  ;;  %7474 = vmatpush3.bf16.msra.mxu1 %v7473_v15  ;;  %v10199_v34 = vsub.f32 %v10178_v33, %v3442_v5  ;;  %v11340_v15 = vpack.c.bf16 %v9929_v36, %v9927_v35  ;;  %v3422_v33 = vld [vmem:[#allocation19 + $0x20] sm:$0xff] }
 0x510   : > { %7331 = vmatprep.subr.bf16.mxu0 %v11283_v21  ;;  %7475 = vmatprep.subr.bf16.mxu1 %v11283_v21 }
 0x511   : > { %6254 = vmatprep.mubr.msk.f32.mxu0 %vm8684_vm0, %v11288_v29  ;;  %6464 = vmatprep.mubr.msk.f32.mxu1 %vm8684_vm0, %v11288_v29 }
 0x513   : > { %7333 = vmatpush3.bf16.msra.mxu0 %v7332_v31  ;;  %7477 = vmatpush3.bf16.msra.mxu1 %v11331_v48  ;;  %v11342_v31 = vpack.c.bf16 %v9939_v57, %v9937_v27  ;;  %v11353_v48 = vld [vmem:[#allocation54_spill] sm:$0xff] }
 0x514   : > { %7334 = vmatprep.subr.bf16.mxu0 %v11283_v21  ;;  %7478 = vmatprep.subr.bf16.mxu1 %v11283_v21 }
 0x517   : > { %7336 = vmatpush3.bf16.msra.mxu0 %v11332_v20  ;;  %7480 = vmatpush3.bf16.msra.mxu1 %v11333_v23  ;;  %v11354_v20 = vld [vmem:[#allocation55_spill] sm:$0xff]  ;;  %v11355_v23 = vld [vmem:[#allocation56_spill] sm:$0xff] }
 0x518   : > { %7337 = vmatprep.subr.bf16.mxu0 %v11283_v21  ;;  %7481 = vmatprep.subr.bf16.mxu1 %v11283_v21 }
 0x51b   : > { %7339 = vmatpush3.bf16.msra.mxu0 %v11334_v46  ;;  %7483 = vmatpush3.bf16.msra.mxu1 %v11335_v44  ;;  %v11356_v46 = vld [vmem:[#allocation57_spill] sm:$0xff]  ;;  %v11357_v44 = vld [vmem:[#allocation58_spill] sm:$0xff] }
 0x51c   : > { %7340 = vmatprep.subr.bf16.mxu0 %v11283_v21  ;;  %7484 = vmatprep.subr.bf16.mxu1 %v11283_v21 }
 0x51f   : > { %7342 = vmatpush3.bf16.msra.mxu0 %v11336_v9  ;;  %7486 = vmatpush3.bf16.msra.mxu1 %v11337_v50  ;;  %v11358_v9 = vld [vmem:[#allocation59_spill] sm:$0xff]  ;;  %v11359_v50 = vand.u32 4294901760, %v9639_v58  ;;  %v11363_v58 = vand.u32 4294901760, %v9662_v4  ;;  %v11368_v4 = vand.u32 4294901760, %v9692_v40  ;;  %v11374_v40 = vand.u32 4294901760, %v11330_v6 }
 0x520   : > { %7343 = vmatprep.subr.bf16.mxu0 %v11283_v21  ;;  %7487 = vmatprep.subr.bf16.mxu1 %v11283_v21  ;;  %v11380_v6 = vand.u32 4294901760, %v9920_v62  ;;  %v11386_v62 = vand.u32 4294901760, %v9933_v53  ;;  %v3420_v53 = vld [vmem:[#allocation19 + $0x10] sm:$0xff] }
 0x523   : > { %7345 = vmatpush3.bf16.msra.mxu0 %v11338_v49  ;;  %7489 = vmatpush3.bf16.msra.mxu1 %v11339_v56  ;;  %v11360_v49 = vand.u32 4294901760, %v9641_v52  ;;  %v11364_v52 = vand.u32 4294901760, %v9664_v24  ;;  %v11367_v24 = vand.u32 4294901760, %v9684_v18  ;;  %v11373_v18 = vand.u32 4294901760, %v9725_v41 }
 0x524   : > { %7346 = vmatprep.subr.bf16.mxu0 %v11283_v21  ;;  %7490 = vmatprep.subr.bf16.mxu1 %v11283_v21  ;;  %v11379_v41 = vand.u32 4294901760, %v9918_v60  ;;  %v11385_v60 = vand.u32 4294901760, %v9931_v37  ;;  %v10426_v37 = vpack.c.bf16 %v3445_v38, %v3442_v5  ;;  %v3457_v5 = vand.u32 4294901760, %v3423_v19 }
 0x525   : > { %v7377_v56 = vpack.c.bf16 %v11360_v49, %v11359_v50  ;;  %v7380_v50 = vpack.c.bf16 %v11364_v52, %v11363_v58  ;;  %v7530_v58 = vpack.c.bf16 %v11374_v40, %v11373_v18 }
 0x527   : > { %7348 = vmatpush3.bf16.msra.mxu0 %v11340_v15  ;;  %7492 = vmatpush3.bf16.msra.mxu1 %v11341_v42  ;;  %v11361_v15 = vand.u32 4294901760, %v9646_v54  ;;  %v11362_v42 = vand.u32 4294901760, %v9653_v61  ;;  %v11365_v54 = vand.u32 4294901760, %v9671_v59  ;;  %v11366_v61 = vand.u32 4294901760, %v9676_v22 }
 0x528   : > { %7349 = vmatprep.subr.bf16.mxu0 %v11283_v21  ;;  %7493 = vmatprep.subr.bf16.mxu1 %v11283_v21  ;;  %v7383_v59 = vpack.c.bf16 %v11368_v4, %v11367_v24  ;;  %v11369_v22 = vand.u32 4294901760, %v9699_v28  ;;  %v11375_v28 = vand.u32 4294901760, %v9744_v17  ;;  %v11381_v17 = vand.u32 4294901760, %v9922_v2 }
 0x529   : > { %v7524_v49 = vpack.c.bf16 %v11366_v61, %v11365_v54  ;;  %v7392_v54 = vpack.c.bf16 %v11380_v6, %v11379_v41  ;;  %v7539_v24 = vpack.c.bf16 %v11386_v62, %v11385_v60  ;;  %v11387_v2 = vand.u32 4294901760, %v9937_v27  ;;  %v3421_v27 = vld [vmem:[#allocation19 + $0x18] sm:$0xff] }
 0x52b   : > { %7351 = vmatpush3.bf16.msra.mxu0 %v11342_v31  ;;  %7495 = vmatpush3.bf16.msra.mxu1 %v7494_v51  ;;  %v11349_v51 = vld [vmem:[#allocation46_spill] sm:$0xff]  ;;  %v7521_v31 = vpack.c.bf16 %v11362_v42, %v11361_v15  ;;  %v11371_v15 = vand.u32 4294901760, %v9716_v1  ;;  %v11372_v42 = vand.u32 4294901760, %v9718_v55  ;;  %v11377_v1 = vand.u32 4294901760, %v9753_v39 }
 0x52c   : > { %7352 = vmatprep.subr.bf16.mxu0 %v11283_v21  ;;  %7496 = vmatprep.subr.bf16.mxu1 %v11283_v21  ;;  %v11378_v55 = vand.u32 4294901760, %v9758_v13  ;;  %v11383_v39 = vand.u32 4294901760, %v9927_v35  ;;  %v11384_v13 = vand.u32 4294901760, %v9929_v36  ;;  %v11389_v35 = vand.u32 4294901760, %v9943_v7 }
 0x52d   : > { %v11390_v36 = vand.u32 4294901760, %v9945_v30  ;;  %v3451_v7 = vand.u32 4294901760, %v3421_v27 }
 0x52e   : > { %6255 = vmatmul.mubr.f32.vlgmr.msra.gmra.mrb[2].mxu0 %v10136_v11  ;;  %6465 = vmatmul.mubr.f32.vlgmr.msra.gmra.mrb[2].mxu1 %v10136_v11  ;;  %v11352_v11 = vld [vmem:[#allocation53_spill] sm:$0xff] }
 0x52f   : > { %7354 = vmatpush3.bf16.msra.mxu0 %v11343_v14  ;;  %7498 = vmatpush3.bf16.msra.mxu1 %v11344_v32 }
 0x530   : > { %7355 = vmatprep.subr.bf16.mxu0 %v11283_v21  ;;  %7499 = vmatprep.subr.bf16.mxu1 %v11283_v21 }
 0x531   : > { %6289 = vmatprep.mubr.msk.f32.mxu0 %vm8684_vm0, %v11288_v29  ;;  %6499 = vmatprep.mubr.msk.f32.mxu1 %vm8684_vm0, %v11288_v29 }
 0x533   : > { %7357 = vmatpush3.bf16.msra.mxu0 %v11345_v16  ;;  %7501 = vmatpush3.bf16.msra.mxu1 %v11346_v45 }
 0x534   : > { %7358 = vmatprep.subr.bf16.mxu0 %v11283_v21  ;;  %7502 = vmatprep.subr.bf16.mxu1 %v11283_v21 }
 0x537   : > { %7360 = vmatpush3.bf16.msra.mxu0 %v11347_v47  ;;  %7504 = vmatpush3.bf16.msra.mxu1 %v11348_v0 }
 0x538   : > { %7361 = vmatprep.subr.bf16.mxu0 %v11283_v21  ;;  %7505 = vmatprep.subr.bf16.mxu1 %v11283_v21 }
 0x53b   : > { %7363 = vmatpush3.bf16.msra.mxu0 %v11349_v51  ;;  %7507 = vmatpush3.bf16.msra.mxu1 %v11350_v10 }
 0x53c   : > { %7364 = vmatprep.subr.bf16.mxu0 %v11283_v21  ;;  %7508 = vmatprep.subr.bf16.mxu1 %v11283_v21 }
 0x53f   : > { %7366 = vmatpush3.bf16.msra.mxu0 %v11351_v43  ;;  %7510 = vmatpush3.bf16.msra.mxu1 %v11352_v11 }
 0x540   : > { %7367 = vmatprep.subr.bf16.mxu0 %v11283_v21  ;;  %7511 = vmatprep.subr.bf16.mxu1 %v11283_v21 }
 0x543   : > { %7369 = vmatpush3.bf16.msra.mxu0 %v11353_v48  ;;  %7513 = vmatpush3.bf16.msra.mxu1 %v11354_v20 }
 0x544   : > { %7370 = vmatprep.subr.bf16.mxu0 %v11283_v21  ;;  %7514 = vmatprep.subr.bf16.mxu1 %v11283_v21 }
 0x547   : > { %7372 = vmatpush3.bf16.msra.mxu0 %v11355_v23  ;;  %7516 = vmatpush3.bf16.msra.mxu1 %v11356_v46 }
 0x548   : > { %7373 = vmatprep.subr.bf16.mxu0 %v11283_v21  ;;  %7517 = vmatprep.subr.bf16.mxu1 %v11283_v21 }
 0x54b   : > { %7375 = vmatpush3.bf16.msra.mxu0 %v11357_v44  ;;  %7519 = vmatpush3.bf16.msra.mxu1 %v11358_v9 }
 0x54c   : > { %7376 = vmatprep.subr.bf16.mxu0 %v11283_v21  ;;  %7520 = vmatprep.subr.bf16.mxu1 %v11283_v21 }
 0x54e   : > { %6290 = vmatmul.mubr.f32.vlgmr.msra.gmra.mrb[2].mxu0 %v10139_v12  ;;  %6500 = vmatmul.mubr.f32.vlgmr.msra.gmra.mrb[2].mxu1 %v10139_v12  ;;  %v11370_v12 = vand.u32 4294901760, %v9704_v25  ;;  %v11376_v25 = vand.u32 4294901760, %v9746_v26  ;;  %v11382_v26 = vand.u32 4294901760, %v9924_v3  ;;  %v11388_v3 = vand.u32 4294901760, %v9939_v57 }
 0x54f   : > { %7378 = vmatpush3.bf16.msra.mxu0 %v7377_v56  ;;  %7522 = vmatpush3.bf16.msra.mxu1 %v7521_v31  ;;  %v7386_v31 = vpack.c.bf16 %v11372_v42, %v11371_v15  ;;  %v3448_v57 = vand.u32 4294901760, %v3420_v53  ;;  %v3431_v15 = vld [vmem:[#allocation19 + $0x68] sm:$0xff]  ;;  %v3432_v42 = vld [vmem:[#allocation19 + $0x70] sm:$0xff] }
 0x550   : > { %7379 = vmatprep.subr.bf16.mxu0 %v11283_v21  ;;  %7523 = vmatprep.subr.bf16.mxu1 %v11283_v21  ;;  %v7527_v56 = vpack.c.bf16 %v11370_v12, %v11369_v22  ;;  %v7389_v52 = vpack.c.bf16 %v11376_v25, %v11375_v28  ;;  %v7536_v61 = vpack.c.bf16 %v11382_v26, %v11381_v17  ;;  %v3433_v28 = vld [vmem:[#allocation19 + $0x78] sm:$0xff]  ;;  %v3484_v41 = vand.u32 4294901760, %v3432_v42 }
 0x551   : > { %6324 = vmatprep.mubr.msk.f32.mxu0 %vm8684_vm0, %v11288_v29  ;;  %6534 = vmatprep.mubr.msk.f32.mxu1 %vm8684_vm0, %v11288_v29  ;;  %v7398_v4 = vpack.c.bf16 %v11388_v3, %v11387_v2  ;;  %v10438_v30 = vpack.c.bf16 %v3451_v7, %v3448_v57  ;;  %v10460_v12 = vsub.f32 %v3423_v19, %v3457_v5 }
 0x553   : > { %7381 = vmatpush3.bf16.msra.mxu0 %v7380_v50  ;;  %7525 = vmatpush3.bf16.msra.mxu1 %v7524_v49  ;;  %v7533_v50 = vpack.c.bf16 %v11378_v55, %v11377_v1  ;;  %v7395_v49 = vpack.c.bf16 %v11384_v13, %v11383_v39  ;;  %v3535_v13 = vand.u32 4294901760, %v10199_v34 }
 0x554   : > { %7382 = vmatprep.subr.bf16.mxu0 %v11283_v21  ;;  %7526 = vmatprep.subr.bf16.mxu1 %v11283_v21 }
 0x555   : > { %v3536_v62 = vsub.f32 %v10199_v34, %v3535_v13 }
 0x557   : > { %7384 = vmatpush3.bf16.msra.mxu0 %v7383_v59  ;;  %7528 = vmatpush3.bf16.msra.mxu1 %v7527_v56  ;;  %v7542_v59 = vpack.c.bf16 %v11390_v36, %v11389_v35  ;;  %v3430_v56 = vld [vmem:[#allocation19 + $0x60] sm:$0xff]  ;;  %v3537_v2 = vand.u32 4294901760, %v3536_v62 }
 0x558   : > { %7385 = vmatprep.subr.bf16.mxu0 %v11283_v21  ;;  %7529 = vmatprep.subr.bf16.mxu1 %v11283_v21  ;;  %v3478_v55 = vand.u32 4294901760, %v3430_v56 }
 0x55a   : > { %v10477_v6 = vsub.f32 %v3430_v56, %v3478_v55 }
 0x55b   : > { %7387 = vmatpush3.bf16.msra.mxu0 %v7386_v31  ;;  %7531 = vmatpush3.bf16.msra.mxu1 %v7530_v58 }
 0x55c   : > { %7388 = vmatprep.subr.bf16.mxu0 %v11283_v21  ;;  %7532 = vmatprep.subr.bf16.mxu1 %v11283_v21 }
 0x55f   : > { %7390 = vmatpush3.bf16.msra.mxu0 %v7389_v52  ;;  %7534 = vmatpush3.bf16.msra.mxu1 %v7533_v50  ;;  %v3481_v50 = vand.u32 4294901760, %v3431_v15 }
 0x560   : > { %7391 = vmatprep.subr.bf16.mxu0 %v11283_v21  ;;  %7535 = vmatprep.subr.bf16.mxu1 %v11283_v21 }
 0x561   : > { %v10480_v17 = vpack.c.bf16 %v3481_v50, %v3478_v55  ;;  %v10482_v26 = vsub.f32 %v3431_v15, %v3481_v50 }
 0x563   : > { %7393 = vmatpush3.bf16.msra.mxu0 %v7392_v54  ;;  %7537 = vmatpush3.bf16.msra.mxu1 %v7536_v61  ;;  %v3487_v54 = vand.u32 4294901760, %v3433_v28  ;;  %v10484_v61 = vsub.f32 %v3432_v42, %v3484_v41 }
 0x564   : > { %7394 = vmatprep.subr.bf16.mxu0 %v11283_v21  ;;  %7538 = vmatprep.subr.bf16.mxu1 %v11283_v21 }
 0x565   : > { %v10486_v39 = vsub.f32 %v3433_v28, %v3487_v54  ;;  %v10491_v60 = vpack.c.bf16 %v3487_v54, %v3484_v41 }
 0x567   : > { %7396 = vmatpush3.bf16.msra.mxu0 %v7395_v49  ;;  %7540 = vmatpush3.bf16.msra.mxu1 %v7539_v24  ;;  %v3542_v49 = vand.u32 4294901760, %v10204_v8 }
 0x568   : > { %7397 = vmatprep.subr.bf16.mxu0 %v11283_v21  ;;  %7541 = vmatprep.subr.bf16.mxu1 %v11283_v21 }
 0x569   : > { %v3543_v24 = vsub.f32 %v10204_v8, %v3542_v49 }
 0x56b   : > { %7399 = vmatpush3.bf16.msra.mxu0 %v7398_v4  ;;  %7543 = vmatpush3.bf16.msra.mxu1 %v7542_v59  ;;  %v3544_v3 = vand.u32 4294901760, %v3543_v24 }
 0x56c   : > { %7400 = vmatprep.subr.bf16.mxu0 %v11283_v21  ;;  %7544 = vmatprep.subr.bf16.mxu1 %v11283_v21 }
 0x56d   : > { %v10503_v36 = vpack.c.bf16 %v3544_v3, %v3537_v2  ;;  %v11209_v3 = vand.u32 4294901760, %v10477_v6 }
 0x56e   : > { %6325 = vmatmul.mubr.f32.vlgmr.msra.gmra.mrb[2].mxu0 %v10133_v63  ;;  %6535 = vmatmul.mubr.f32.vlgmr.msra.gmra.mrb[2].mxu1 %v10133_v63 }
 0x56f   : > { %7402 = vmatpush3.bf16.msra.mxu0 %v11343_v14  ;;  %7546 = vmatpush3.bf16.msra.mxu1 %v11344_v32  ;;  %v3424_v14 = vld [vmem:[#allocation19 + $0x30] sm:$0xff]  ;;  %v3425_v32 = vld [vmem:[#allocation19 + $0x38] sm:$0xff] }
 0x570   : > { %7403 = vmatprep.subr.bf16.mxu0 %v11283_v21  ;;  %7547 = vmatprep.subr.bf16.mxu1 %v11283_v21 }
 0x571   : > { %6359 = vmatprep.mubr.msk.f32.mxu0 %vm8684_vm0, %v11288_v29  ;;  %6569 = vmatprep.mubr.msk.f32.mxu1 %vm8684_vm0, %v11288_v29 }
 0x573   : > { %7405 = vmatpush3.bf16.msra.mxu0 %v11345_v16  ;;  %7549 = vmatpush3.bf16.msra.mxu1 %v11346_v45  ;;  %v3460_v16 = vand.u32 4294901760, %v3424_v14  ;;  %v3463_v45 = vand.u32 4294901760, %v3425_v32 }
 0x574   : > { %7406 = vmatprep.subr.bf16.mxu0 %v11283_v21  ;;  %7550 = vmatprep.subr.bf16.mxu1 %v11283_v21 }
 0x575   : > { %v10462_v31 = vsub.f32 %v3424_v14, %v3460_v16  ;;  %v10464_v18 = vsub.f32 %v3425_v32, %v3463_v45 }
 0x577   : > { %7408 = vmatpush3.bf16.msra.mxu0 %v11347_v47  ;;  %7552 = vmatpush3.bf16.msra.mxu1 %v11348_v0  ;;  %v10446_v47 = vpack.c.bf16 %v3463_v45, %v3460_v16  ;;  %v3426_v0 = vld [vmem:[#allocation19 + $0x40] sm:$0xff]  ;;  %v11215_v16 = vand.u32 4294901760, %v10462_v31  ;;  %v11214_v45 = vand.u32 4294901760, %v10464_v18 }
 0x578   : > { %7409 = vmatprep.subr.bf16.mxu0 %v11283_v21  ;;  %7553 = vmatprep.subr.bf16.mxu1 %v11283_v21 }
 0x57b   : > { %7411 = vmatpush3.bf16.msra.mxu0 %v11349_v51  ;;  %7555 = vmatpush3.bf16.msra.mxu1 %v11350_v10  ;;  %v3427_v51 = vld [vmem:[#allocation19 + $0x48] sm:$0xff]  ;;  %v3466_v10 = vand.u32 4294901760, %v3426_v0 }
 0x57c   : > { %7412 = vmatprep.subr.bf16.mxu0 %v11283_v21  ;;  %7556 = vmatprep.subr.bf16.mxu1 %v11283_v21 }
 0x57d   : > { %v10466_v40 = vsub.f32 %v3426_v0, %v3466_v10 }
 0x57f   : > { %7414 = vmatpush3.bf16.msra.mxu0 %v11351_v43  ;;  %7558 = vmatpush3.bf16.msra.mxu1 %v11352_v11  ;;  %v3469_v43 = vand.u32 4294901760, %v3427_v51 }
 0x580   : > { %7415 = vmatprep.subr.bf16.mxu0 %v11283_v21  ;;  %7559 = vmatprep.subr.bf16.mxu1 %v11283_v21 }
 0x581   : > { %v10450_v11 = vpack.c.bf16 %v3469_v43, %v3466_v10  ;;  %v10468_v58 = vsub.f32 %v3427_v51, %v3469_v43  ;;  %v3578_v51 = vsub.f32 %v10462_v31, %v11215_v16  ;;  %v3585_v10 = vsub.f32 %v10464_v18, %v11214_v45 }
 0x583   : > { %7417 = vmatpush3.bf16.msra.mxu0 %v11353_v48  ;;  %7561 = vmatpush3.bf16.msra.mxu1 %v11354_v20  ;;  %v3428_v48 = vld [vmem:[#allocation19 + $0x50] sm:$0xff]  ;;  %v3429_v20 = vld [vmem:[#allocation19 + $0x58] sm:$0xff]  ;;  %v3579_v43 = vand.u32 4294901760, %v3578_v51 }
 0x584   : > { %7418 = vmatprep.subr.bf16.mxu0 %v11283_v21  ;;  %7562 = vmatprep.subr.bf16.mxu1 %v11283_v21 }
 0x587   : > { %7420 = vmatpush3.bf16.msra.mxu0 %v11355_v23  ;;  %7564 = vmatpush3.bf16.msra.mxu1 %v11356_v46  ;;  %v3472_v23 = vand.u32 4294901760, %v3428_v48  ;;  %v3475_v46 = vand.u32 4294901760, %v3429_v20 }
 0x588   : > { %7421 = vmatprep.subr.bf16.mxu0 %v11283_v21  ;;  %7565 = vmatprep.subr.bf16.mxu1 %v11283_v21 }
 0x589   : > { %v10470_v25 = vpack.c.bf16 %v3475_v46, %v3472_v23  ;;  %v10472_v52 = vsub.f32 %v3428_v48, %v3472_v23  ;;  %v10474_v1 = vsub.f32 %v3429_v20, %v3475_v46  ;;  %v3586_v48 = vand.u32 4294901760, %v3585_v10 }
 0x58a   : > { %v11213_v20 = vand.u32 4294901760, %v10466_v40  ;;  %v11212_v23 = vand.u32 4294901760, %v10468_v58 }
 0x58b   : > { %7423 = vmatpush3.bf16.msra.mxu0 %v11357_v44  ;;  %7567 = vmatpush3.bf16.msra.mxu1 %v11358_v9  ;;  %v10454_v44 = vsub.f32 %v3420_v53, %v3448_v57  ;;  %v10456_v9 = vsub.f32 %v3421_v27, %v3451_v7  ;;  %v10534_v46 = vpack.c.bf16 %v3586_v48, %v3579_v43  ;;  %v11211_v55 = vand.u32 4294901760, %v10472_v52 }
 0x58c   : > { %7568 = vmatprep.subr.bf16.mxu0 %v11283_v21  ;;  %7712 = vmatprep.subr.bf16.mxu1 %v11283_v21  ;;  %v3592_v56 = vsub.f32 %v10466_v40, %v11213_v20  ;;  %v3599_v15 = vsub.f32 %v10468_v58, %v11212_v23  ;;  %v11210_v50 = vand.u32 4294901760, %v10474_v1 }
 0x58d   : > { %v3549_v4 = vand.u32 4294901760, %v10454_v44  ;;  %v3556_v35 = vand.u32 4294901760, %v10456_v9  ;;  %v3606_v54 = vsub.f32 %v10472_v52, %v11211_v55 }
 0x58e   : > { %6360 = vmatmul.mubr.f32.vlgmr.msra.gmra.mrb[2].mxu0 %v10133_v63  ;;  %6570 = vmatmul.mubr.f32.vlgmr.msra.gmra.mrb[2].mxu1 %v10133_v63  ;;  %v3454_v63 = vand.u32 4294901760, %v3422_v33  ;;  %v3593_v42 = vand.u32 4294901760, %v3592_v56  ;;  %v3600_v28 = vand.u32 4294901760, %v3599_v15  ;;  %v3613_v62 = vsub.f32 %v10474_v1, %v11210_v50 }
 0x58f   : > { %7570 = vmatpush3.bf16.msra.mxu0 %v10426_v37  ;;  %6604 = vmatprep.mubr.msk.f32.mxu0 %vm8684_vm0, %v11288_v29  ;;  %v3550_v59 = vsub.f32 %v10454_v44, %v3549_v4  ;;  %v3557_v53 = vsub.f32 %v10456_v9, %v3556_v35  ;;  %v3607_v24 = vand.u32 4294901760, %v3606_v54 }
 0x590   : > { %7571 = vmatprep.subr.bf16.mxu0 %v11283_v21  ;;  %6814 = vmatprep.mubr.msk.f32.mxu1 %vm8684_vm0, %v11288_v29  ;;  %v10442_v38 = vpack.c.bf16 %v3457_v5, %v3454_v63  ;;  %v10458_v22 = vsub.f32 %v3422_v33, %v3454_v63  ;;  %v11216_v33 = vand.u32 4294901760, %v10460_v12  ;;  %v7605_v41 = vpack.c.bf16 %v3600_v28, %v3593_v42 }
 0x591   : > { %v3551_v27 = vand.u32 4294901760, %v3550_v59  ;;  %v3558_v57 = vand.u32 4294901760, %v3557_v53  ;;  %v3614_v2 = vand.u32 4294901760, %v3613_v62  ;;  %v11208_v59 = vand.u32 4294901760, %v10482_v26 }
 0x592   : > { %v11217_v7 = vand.u32 4294901760, %v10458_v22  ;;  %v3571_v5 = vsub.f32 %v10460_v12, %v11216_v33  ;;  %v7617_v42 = vpack.c.bf16 %v10204_v8, %v10199_v34  ;;  %v7620_v28 = vpack.c.bf16 %v10456_v9, %v10454_v44 }
 0x593   : > { %7573 = vmatpush3.bf16.msra.mxu0 %v10438_v30  ;;  %v10514_v19 = vpack.c.bf16 %v3558_v57, %v3551_v27  ;;  %v7608_v53 = vpack.c.bf16 %v3614_v2, %v3607_v24  ;;  %v3620_v27 = vsub.f32 %v10477_v6, %v11209_v3  ;;  %v3627_v57 = vsub.f32 %v10482_v26, %v11208_v59  ;;  %v3415_v3 = vld [vmem:[%s674_s9] sm:$0xff]  ;;  %s8511_s9 = sshll.u32 %s8686_s6, 4  ;;  %s8512_s9 = int_to_ptr.vmem [resolvable:$false] %s8511_s9 }
 0x594   : > { %7574 = vmatprep.subr.bf16.mxu0 %v11283_v21  ;;  %v3564_v63 = vsub.f32 %v10458_v22, %v11217_v7  ;;  %v3572_v32 = vand.u32 4294901760, %v3571_v5  ;;  %v7623_v54 = vpack.c.bf16 %v10460_v12, %v10458_v22  ;;  %v7626_v62 = vpack.c.bf16 %v10464_v18, %v10462_v31  ;;  %p8514_p1 = scmp.lt.s32.totalorder %s4789_s7, %s8512_s9 }
 0x595   : > { %v3628_v5 = vand.u32 4294901760, %v3627_v57  ;;  %v7629_v24 = vpack.c.bf16 %v10468_v58, %v10466_v40  ;;  %v7632_v2 = vpack.c.bf16 %v10474_v1, %v10472_v52  ;;  %v7638_v57 = vpack.c.bf16 %v10486_v39, %v10484_v61 }
 0x596   : > { %v3565_v14 = vand.u32 4294901760, %v3564_v63  ;;  %v3621_v63 = vand.u32 4294901760, %v3620_v27  ;;  %v7635_v27 = vpack.c.bf16 %v10482_v26, %v10477_v6  ;;  %v11391_v34 = vand.u32 4294901760, %v10458_v22 }
 0x597   : > { %7576 = vmatpush3.bf16.msra.mxu0 %v10442_v38  ;;  %v11392_v8 = vand.u32 4294901760, %v10460_v12  ;;  %v11394_v44 = vand.u32 4294901760, %v10464_v18  ;;  %v11397_v22 = vand.u32 4294901760, %v10472_v52  ;;  %v11398_v12 = vand.u32 4294901760, %v10474_v1  ;;  %v4096_v1 = vld [vmem:[#allocation22 + $0x68] sm:$0xff] }
 0x598   : > { %7577 = vmatprep.subr.bf16.mxu0 %v11283_v21  ;;  %v10524_v0 = vpack.c.bf16 %v3572_v32, %v3565_v14  ;;  %v11207_v14 = vand.u32 4294901760, %v10484_v61  ;;  %v11206_v32 = vand.u32 4294901760, %v10486_v39  ;;  %v7611_v51 = vpack.c.bf16 %v3628_v5, %v3621_v63  ;;  %v5108_v63 = vld [vmem:[#allocation13] ss:$0 sm:$0xff]  ;;  %v5109_v5 = vld [vmem:[#allocation16] ss:$0 sm:$0xff] }
 0x599   : > { %v11400_v18 = vand.u32 4294901760, %v10482_v26  ;;  %v4097_v26 = vld [vmem:[#allocation22 + $0x70] sm:$0xff] }
 0x59a   : > { %v3634_v10 = vsub.f32 %v10484_v61, %v11207_v14  ;;  %v3641_v43 = vsub.f32 %v10486_v39, %v11206_v32 }
 0x59b   : > { %7579 = vmatpush3.bf16.msra.mxu0 %v10446_v47 }
 0x59c   : > { %7580 = vmatprep.subr.bf16.mxu0 %v11283_v21  ;;  %v3635_v48 = vand.u32 4294901760, %v3634_v10  ;;  %v3642_v56 = vand.u32 4294901760, %v3641_v43 }
 0x59e   : > { %v7614_v15 = vpack.c.bf16 %v3642_v56, %v3635_v48 }
 0x59f   : > { %7582 = vmatpush3.bf16.msra.mxu0 %v10450_v11 }
 0x5a0   : > { %7583 = vmatprep.subr.bf16.mxu0 %v11283_v21 }
 0x5a3   : > { %7585 = vmatpush3.bf16.msra.mxu0 %v10470_v25 }
 0x5a4   : > { %7586 = vmatprep.subr.bf16.mxu0 %v11283_v21 }
 0x5a7   : > { %7588 = vmatpush3.bf16.msra.mxu0 %v10480_v17 }
 0x5a8   : > { %7589 = vmatprep.subr.bf16.mxu0 %v11283_v21 }
 0x5ab   : > { %7591 = vmatpush3.bf16.msra.mxu0 %v10491_v60 }
 0x5ac   : > { %7592 = vmatprep.subr.bf16.mxu0 %v11283_v21 }
 0x661   : > { %v2745_v10 = vpop.f32.mrb[2].mxu0  ;;  %v3409_v43 = vpop.f32.mrb[2].mxu1 }
 0x662   : > { %v7858_v48 = vadd.f32 %v5108_v63, %v2745_v10  ;;  %v7859_v56 = vadd.f32 %v5109_v5, %v3409_v43  ;;  %v6361_v32 = vpop.f32.mrb[3].mxu0  ;;  %v6571_v14 = vpop.f32.mrb[3].mxu1  ;;  %v4090_v10 = vld [vmem:[#allocation22 + $0x38] sm:$0xff]  ;;  %v4091_v43 = vld [vmem:[#allocation22 + $0x40] sm:$0xff] }
 0x664   : > { %4749 = vst [vmem:[%s746_s30] sm:$0xff] %v7858_v48  ;;  %v3413_v59 = vmul.f32 1.442695, %v7859_v56  ;;  %4750 = vst [vmem:[%s753_s18] sm:$0xff] %v7859_v56  ;;  %s8513_s30 = scalar_lea.vmem %s8512_s9, 256 }
 0x665   : > { %p8515_p13 = scmp.lt.s32.totalorder %s8513_s30, %s8507_s0 }
 0x666   : > { %8109 = vpow2.f32 %v3413_v59 }
 0x667   : > { %p8516_p0 = por %p8515_p13, %p8514_p1 }
 0x669   : > { %p8517_p2 = pnand %p8516_p0, %p8510_p12 }
 0x670   : > { %v8110_v50 = vpop.eup %8109 }
 0x671   : > { %v3416_v55 = vmul.f32 %v8110_v50, %v3415_v3  ;;  %v4088_v3 = vld [vmem:[#allocation22 + $0x28] sm:$0xff] }
 0x673   : > { %v3417_v23 = vadd.f32 %v7858_v48, %v3416_v55  ;;  %v4086_v55 = vld [vmem:[#allocation22 + $0x18] sm:$0xff] }
 0x674   : > { %v4116_v59 = vand.u32 4294901760, %v4086_v55 }
 0x675   : > { %v10590_v20 = vand.u32 4294901760, %v3417_v23 }
 0x676   : > { %v10627_v16 = vsub.f32 %v4086_v55, %v4116_v59 }
 0x677   : > { %v10593_v63 = vsub.f32 %v3417_v23, %v10590_v20 }
 0x679   : > { %v3524_v14 = vand.u32 4294901760, %v10593_v63 }
 0x67b   : > { %v3525_v32 = vsub.f32 %v10593_v63, %v3524_v14 }
 0x67d   : > { %v3526_v5 = vand.u32 4294901760, %v3525_v32 }
 0x67f   : > { %6605 = vmatmul.mubr.f32.vlgmr.msra.gmra.mrb[4].mxu0 %v3526_v5  ;;  %v4092_v5 = vld [vmem:[#allocation22 + $0x48] sm:$0xff] }
 0x680   : > { %7594 = vmatpush3.bf16.msra.mxu0 %v10503_v36  ;;  %6639 = vmatprep.mubr.msk.f32.mxu0 %vm8684_vm0, %v11288_v29  ;;  %v4083_v36 = vld [vmem:[#allocation22] sm:$0xff] }
 0x681   : > { %7595 = vmatprep.subr.bf16.mxu0 %v11283_v21  ;;  %v4107_v23 = vand.u32 4294901760, %v4083_v36 }
 0x684   : > { %7597 = vmatpush3.bf16.msra.mxu0 %v10514_v19  ;;  %v4084_v19 = vld [vmem:[#allocation22 + $0x8] sm:$0xff] }
 0x685   : > { %7598 = vmatprep.subr.bf16.mxu0 %v11283_v21 }
 0x688   : > { %7600 = vmatpush3.bf16.msra.mxu0 %v10524_v0  ;;  %v4085_v0 = vld [vmem:[#allocation22 + $0x10] sm:$0xff] }
 0x689   : > { %7601 = vmatprep.subr.bf16.mxu0 %v11283_v21  ;;  %v4113_v50 = vand.u32 4294901760, %v4085_v0 }
 0x68b   : > { %v10623_v32 = vsub.f32 %v4085_v0, %v4113_v50  ;;  %v10625_v45 = vpack.c.bf16 %v4116_v59, %v4113_v50  ;;  %v4134_v0 = vand.u32 4294901760, %v4092_v5 }
 0x68c   : > { %7603 = vmatpush3.bf16.msra.mxu0 %v10534_v46  ;;  %v4110_v46 = vand.u32 4294901760, %v4084_v19 }
 0x68d   : > { %7604 = vmatprep.subr.bf16.mxu0 %v11283_v21 }
 0x68e   : > { %v10617_v48 = vpack.c.bf16 %v4110_v46, %v4107_v23  ;;  %v10621_v56 = vsub.f32 %v4084_v19, %v4110_v46  ;;  %v4128_v19 = vand.u32 4294901760, %v4090_v10 }
 0x690   : > { %7606 = vmatpush3.bf16.msra.mxu0 %v7605_v41  ;;  %v4087_v41 = vld [vmem:[#allocation22 + $0x20] sm:$0xff]  ;;  %7714 = vmatpush3.bf16.msra.mxu1 %v10617_v48  ;;  %v10641_v55 = vsub.f32 %v4090_v10, %v4128_v19 }
 0x691   : > { %7607 = vmatprep.subr.bf16.mxu0 %v11283_v21  ;;  %7715 = vmatprep.subr.bf16.mxu1 %v11283_v21 }
 0x694   : > { %7609 = vmatpush3.bf16.msra.mxu0 %v7608_v53  ;;  %v4119_v53 = vand.u32 4294901760, %v4087_v41  ;;  %7717 = vmatpush3.bf16.msra.mxu1 %v10625_v45 }
 0x695   : > { %7610 = vmatprep.subr.bf16.mxu0 %v11283_v21  ;;  %7718 = vmatprep.subr.bf16.mxu1 %v11283_v21 }
 0x696   : > { %v10629_v33 = vsub.f32 %v4087_v41, %v4119_v53  ;;  %v10645_v41 = vsub.f32 %v4092_v5, %v4134_v0 }
 0x698   : > { %7612 = vmatpush3.bf16.msra.mxu0 %v7611_v51  ;;  %v4122_v51 = vand.u32 4294901760, %v4088_v3 }
 0x699   : > { %7613 = vmatprep.subr.bf16.mxu0 %v11283_v21 }
 0x69a   : > { %v10635_v7 = vsub.f32 %v4088_v3, %v4122_v51 }
 0x69c   : > { %7615 = vmatpush3.bf16.msra.mxu0 %v7614_v15  ;;  %v4089_v15 = vld [vmem:[#allocation22 + $0x30] sm:$0xff] }
 0x69d   : > { %7616 = vmatprep.subr.bf16.mxu0 %v11283_v21 }
 0x69f   : > { %6640 = vmatmul.mubr.f32.vlgmr.msra.gmra.mrb[4].mxu0 %v10590_v20 }
 0x6a0   : > { %7618 = vmatpush3.bf16.msra.mxu0 %v7617_v42  ;;  %6674 = vmatprep.mubr.msk.f32.mxu0 %vm8684_vm0, %v11288_v29  ;;  %v10619_v42 = vsub.f32 %v4083_v36, %v4107_v23  ;;  %v4125_v36 = vand.u32 4294901760, %v4089_v15  ;;  %v4131_v23 = vand.u32 4294901760, %v4091_v43 }
 0x6a1   : > { %7619 = vmatprep.subr.bf16.mxu0 %v11283_v21 }
 0x6a2   : > { %v10639_v46 = vsub.f32 %v4089_v15, %v4125_v36  ;;  %v10643_v50 = vsub.f32 %v4091_v43, %v4131_v23  ;;  %v10659_v3 = vpack.c.bf16 %v4128_v19, %v4125_v36 }
 0x6a4   : > { %7621 = vmatpush3.bf16.msra.mxu0 %v7620_v28  ;;  %v10651_v28 = vpack.c.bf16 %v4122_v51, %v4119_v53 }
 0x6a5   : > { %7622 = vmatprep.subr.bf16.mxu0 %v11283_v21 }
 0x6a6   : > { %7720 = vmatpush3.bf16.msra.mxu1 %v10651_v28 }
 0x6a7   : > { %7721 = vmatprep.subr.bf16.mxu1 %v11283_v21 }
 0x6a8   : > { %7624 = vmatpush3.bf16.msra.mxu0 %v7623_v54  ;;  %v10667_v54 = vpack.c.bf16 %v4134_v0, %v4131_v23 }
 0x6a9   : > { %7625 = vmatprep.subr.bf16.mxu0 %v11283_v21 }
 0x6aa   : > { %7723 = vmatpush3.bf16.msra.mxu1 %v10659_v3 }
 0x6ab   : > { %7724 = vmatprep.subr.bf16.mxu1 %v11283_v21 }
 0x6ac   : > { %7627 = vmatpush3.bf16.msra.mxu0 %v7626_v62  ;;  %v7665_v62 = vpack.c.bf16 %v3542_v49, %v3535_v13  ;;  %v7671_v13 = vpack.c.bf16 %v11392_v8, %v11391_v34  ;;  %v11393_v49 = vand.u32 4294901760, %v10462_v31  ;;  %v11399_v31 = vand.u32 4294901760, %v10477_v6 }
 0x6ad   : > { %7628 = vmatprep.subr.bf16.mxu0 %v11283_v21  ;;  %v4146_v6 = vand.u32 4294901760, %v4096_v1 }
 0x6ae   : > { %7726 = vmatpush3.bf16.msra.mxu1 %v10667_v54  ;;  %v7674_v9 = vpack.c.bf16 %v11394_v44, %v11393_v49  ;;  %v4228_v49 = vand.u32 4294901760, %v10629_v33  ;;  %v4235_v44 = vand.u32 4294901760, %v10635_v7 }
 0x6af   : > { %7727 = vmatprep.subr.bf16.mxu1 %v11283_v21  ;;  %v10791_v5 = vsub.f32 %v4096_v1, %v4146_v6 }
 0x6b0   : > { %7630 = vmatpush3.bf16.msra.mxu0 %v7629_v24  ;;  %v7668_v24 = vpack.c.bf16 %v3556_v35, %v3549_v4  ;;  %v11395_v4 = vand.u32 4294901760, %v10466_v40  ;;  %v11396_v35 = vand.u32 4294901760, %v10468_v58  ;;  %v11401_v40 = vand.u32 4294901760, %v10484_v61  ;;  %v4098_v61 = vld [vmem:[#allocation22 + $0x78] sm:$0xff] }
 0x6b1   : > { %7631 = vmatprep.subr.bf16.mxu0 %v11283_v21  ;;  %v11402_v58 = vand.u32 4294901760, %v10486_v39  ;;  %v4149_v39 = vand.u32 4294901760, %v4097_v26 }
 0x6b3   : > { %v10794_v36 = vsub.f32 %v4097_v26, %v4149_v39 }
 0x6b4   : > { %7633 = vmatpush3.bf16.msra.mxu0 %v7632_v2  ;;  %v7677_v2 = vpack.c.bf16 %v11396_v35, %v11395_v4  ;;  %v4229_v35 = vsub.f32 %v10629_v33, %v4228_v49 }
 0x6b5   : > { %7634 = vmatprep.subr.bf16.mxu0 %v11283_v21 }
 0x6b8   : > { %7636 = vmatpush3.bf16.msra.mxu0 %v7635_v27  ;;  %v7680_v27 = vpack.c.bf16 %v11398_v12, %v11397_v22  ;;  %v4230_v12 = vand.u32 4294901760, %v4229_v35 }
 0x6b9   : > { %7637 = vmatprep.subr.bf16.mxu0 %v11283_v21 }
 0x6bc   : > { %7639 = vmatpush3.bf16.msra.mxu0 %v7638_v57  ;;  %v7683_v57 = vpack.c.bf16 %v11400_v18, %v11399_v31  ;;  %v4242_v31 = vand.u32 4294901760, %v10639_v46  ;;  %v4249_v18 = vand.u32 4294901760, %v10641_v55 }
 0x6bd   : > { %7640 = vmatprep.subr.bf16.mxu0 %v11283_v21 }
 0x6bf   : > { %6675 = vmatmul.mubr.f32.vlgmr.msra.gmra.mrb[4].mxu0 %v10593_v63  ;;  %v7686_v63 = vpack.c.bf16 %v11402_v58, %v11401_v40  ;;  %v4243_v40 = vsub.f32 %v10639_v46, %v4242_v31  ;;  %v4250_v58 = vsub.f32 %v10641_v55, %v4249_v18 }
 0x6c0   : > { %7642 = vmatpush3.bf16.msra.mxu0 %v10426_v37  ;;  %6709 = vmatprep.mubr.msk.f32.mxu0 %vm8684_vm0, %v11288_v29 }
 0x6c1   : > { %7643 = vmatprep.subr.bf16.mxu0 %v11283_v21 }
 0x6c4   : > { %7645 = vmatpush3.bf16.msra.mxu0 %v10438_v30 }
 0x6c5   : > { %7646 = vmatprep.subr.bf16.mxu0 %v11283_v21 }
 0x6c8   : > { %7648 = vmatpush3.bf16.msra.mxu0 %v10442_v38 }
 0x6c9   : > { %7649 = vmatprep.subr.bf16.mxu0 %v11283_v21 }
 0x6cc   : > { %7651 = vmatpush3.bf16.msra.mxu0 %v10446_v47 }
 0x6cd   : > { %7652 = vmatprep.subr.bf16.mxu0 %v11283_v21 }
 0x6d0   : > { %7654 = vmatpush3.bf16.msra.mxu0 %v10450_v11 }
 0x6d1   : > { %7655 = vmatprep.subr.bf16.mxu0 %v11283_v21 }
 0x6d4   : > { %7657 = vmatpush3.bf16.msra.mxu0 %v10470_v25 }
 0x6d5   : > { %7658 = vmatprep.subr.bf16.mxu0 %v11283_v21 }
 0x6d8   : > { %7660 = vmatpush3.bf16.msra.mxu0 %v10480_v17 }
 0x6d9   : > { %7661 = vmatprep.subr.bf16.mxu0 %v11283_v21 }
 0x6dc   : > { %7663 = vmatpush3.bf16.msra.mxu0 %v10491_v60 }
 0x6dd   : > { %7664 = vmatprep.subr.bf16.mxu0 %v11283_v21 }
 0x6df   : > { %6710 = vmatmul.mubr.f32.vlgmr.msra.gmra.mrb[4].mxu0 %v3524_v14  ;;  %v4207_v14 = vand.u32 4294901760, %v10621_v56 }
 0x6e0   : > { %7666 = vmatpush3.bf16.msra.mxu0 %v7665_v62  ;;  %6744 = vmatprep.mubr.msk.f32.mxu0 %vm8684_vm0, %v11288_v29  ;;  %v4214_v62 = vand.u32 4294901760, %v10623_v32 }
 0x6e1   : > { %7667 = vmatprep.subr.bf16.mxu0 %v11283_v21  ;;  %v4208_v51 = vsub.f32 %v10621_v56, %v4207_v14 }
 0x6e2   : > { %v4215_v8 = vsub.f32 %v10623_v32, %v4214_v62 }
 0x6e3   : > { %v4209_v0 = vand.u32 4294901760, %v4208_v51 }
 0x6e4   : > { %7669 = vmatpush3.bf16.msra.mxu0 %v7668_v24  ;;  %v4221_v24 = vand.u32 4294901760, %v10627_v16 }
 0x6e5   : > { %7670 = vmatprep.subr.bf16.mxu0 %v11283_v21 }
 0x6e8   : > { %7672 = vmatpush3.bf16.msra.mxu0 %v7671_v13  ;;  %v4222_v13 = vsub.f32 %v10627_v16, %v4221_v24 }
 0x6e9   : > { %7673 = vmatprep.subr.bf16.mxu0 %v11283_v21 }
 0x6ea   : > { %v4223_v4 = vand.u32 4294901760, %v4222_v13 }
 0x6ec   : > { %7675 = vmatpush3.bf16.msra.mxu0 %v7674_v9  ;;  %v4216_v9 = vand.u32 4294901760, %v4215_v8  ;;  %v11220_v8 = vand.u32 4294901760, %v10791_v5 }
 0x6ed   : > { %7676 = vmatprep.subr.bf16.mxu0 %v11283_v21 }
 0x6ee   : > { %v7740_v22 = vpack.c.bf16 %v4223_v4, %v4216_v9  ;;  %v4292_v4 = vsub.f32 %v10791_v5, %v11220_v8 }
 0x6f0   : > { %7678 = vmatpush3.bf16.msra.mxu0 %v7677_v2  ;;  %v4236_v2 = vsub.f32 %v10635_v7, %v4235_v44 }
 0x6f1   : > { %7679 = vmatprep.subr.bf16.mxu0 %v11283_v21 }
 0x6f4   : > { %7681 = vmatpush3.bf16.msra.mxu0 %v7680_v27  ;;  %v4237_v27 = vand.u32 4294901760, %v4236_v2  ;;  %v4293_v2 = vand.u32 4294901760, %v4292_v4 }
 0x6f5   : > { %7682 = vmatprep.subr.bf16.mxu0 %v11283_v21 }
 0x6f8   : > { %7684 = vmatpush3.bf16.msra.mxu0 %v7683_v57  ;;  %v7743_v57 = vpack.c.bf16 %v4237_v27, %v4230_v12  ;;  %v11219_v12 = vand.u32 4294901760, %v10794_v36 }
 0x6f9   : > { %7685 = vmatprep.subr.bf16.mxu0 %v11283_v21 }
 0x6fc   : > { %7687 = vmatpush3.bf16.msra.mxu0 %v7686_v63  ;;  %v4244_v63 = vand.u32 4294901760, %v4243_v40 }
 0x6fd   : > { %7688 = vmatprep.subr.bf16.mxu0 %v11283_v21 }
 0x6ff   : > { %6745 = vmatmul.mubr.f32.vlgmr.msra.gmra.mrb[4].mxu0 %v10590_v20 }
 0x700   : > { %7690 = vmatpush3.bf16.msra.mxu0 %v10426_v37  ;;  %6779 = vmatprep.mubr.msk.f32.mxu0 %vm8684_vm0, %v11288_v29  ;;  %v4093_v37 = vld [vmem:[#allocation22 + $0x50] sm:$0xff] }
 0x701   : > { %7691 = vmatprep.subr.bf16.mxu0 %v11283_v21 }
 0x704   : > { %7693 = vmatpush3.bf16.msra.mxu0 %v10438_v30  ;;  %v4094_v30 = vld [vmem:[#allocation22 + $0x58] sm:$0xff] }
 0x705   : > { %7694 = vmatprep.subr.bf16.mxu0 %v11283_v21 }
 0x708   : > { %7696 = vmatpush3.bf16.msra.mxu0 %v10442_v38  ;;  %v4137_v38 = vand.u32 4294901760, %v4093_v37 }
 0x709   : > { %7697 = vmatprep.subr.bf16.mxu0 %v11283_v21 }
 0x70a   : > { %v10785_v15 = vsub.f32 %v4093_v37, %v4137_v38  ;;  %v4251_v37 = vand.u32 4294901760, %v4250_v58  ;;  %v4299_v58 = vsub.f32 %v10794_v36, %v11219_v12 }
 0x70c   : > { %7699 = vmatpush3.bf16.msra.mxu0 %v10446_v47  ;;  %v4140_v47 = vand.u32 4294901760, %v4094_v30  ;;  %v4270_v26 = vand.u32 4294901760, %v10785_v15 }
 0x70d   : > { %7700 = vmatprep.subr.bf16.mxu0 %v11283_v21 }
 0x70e   : > { %v10767_v52 = vpack.c.bf16 %v4140_v47, %v4137_v38  ;;  %v10787_v10 = vsub.f32 %v4094_v30, %v4140_v47  ;;  %v4256_v30 = vand.u32 4294901760, %v10643_v50  ;;  %v4263_v38 = vand.u32 4294901760, %v10645_v41 }
 0x70f   : > { %v7746_v47 = vpack.c.bf16 %v4251_v37, %v4244_v63  ;;  %v4300_v37 = vand.u32 4294901760, %v4299_v58 }
 0x710   : > { %7702 = vmatpush3.bf16.msra.mxu0 %v10450_v11  ;;  %v4095_v11 = vld [vmem:[#allocation22 + $0x60] sm:$0xff]  ;;  %7729 = vmatpush3.bf16.msra.mxu1 %v10767_v52  ;;  %v4264_v1 = vsub.f32 %v10645_v41, %v4263_v38 }
 0x711   : > { %7703 = vmatprep.subr.bf16.mxu0 %v11283_v21  ;;  %7730 = vmatprep.subr.bf16.mxu1 %v11283_v21 }
 0x714   : > { %7705 = vmatpush3.bf16.msra.mxu0 %v10470_v25  ;;  %v4143_v25 = vand.u32 4294901760, %v4095_v11 }
 0x715   : > { %7706 = vmatprep.subr.bf16.mxu0 %v11283_v21 }
 0x716   : > { %v10789_v43 = vsub.f32 %v4095_v11, %v4143_v25  ;;  %v4257_v11 = vsub.f32 %v10643_v50, %v4256_v30 }
 0x718   : > { %7708 = vmatpush3.bf16.msra.mxu0 %v10480_v17  ;;  %v10771_v17 = vpack.c.bf16 %v4146_v6, %v4143_v25  ;;  %v4258_v25 = vand.u32 4294901760, %v4257_v11  ;;  %v4265_v6 = vand.u32 4294901760, %v4264_v1 }
 0x719   : > { %7709 = vmatprep.subr.bf16.mxu0 %v11283_v21 }
 0x71a   : > { %7732 = vmatpush3.bf16.msra.mxu1 %v10771_v17 }
 0x71b   : > { %7733 = vmatprep.subr.bf16.mxu1 %v11283_v21 }
 0x71c   : > { %7711 = vmatpush3.bf16.msra.mxu0 %v10491_v60  ;;  %v4152_v60 = vand.u32 4294901760, %v4098_v61 }
 0x71e   : > { %v10777_v59 = vpack.c.bf16 %v4152_v60, %v4149_v39  ;;  %v10796_v19 = vsub.f32 %v4098_v61, %v4152_v60  ;;  %v4277_v61 = vand.u32 4294901760, %v10787_v10  ;;  %v7749_v39 = vpack.c.bf16 %v4265_v6, %v4258_v25 }
 0x71f   : > { %6780 = vmatmul.mubr.f32.vlgmr.msra.gmra.mrb[4].mxu0 %v10590_v20  ;;  %v4200_v20 = vand.u32 4294901760, %v10619_v42  ;;  %v4271_v60 = vsub.f32 %v10785_v15, %v4270_v26  ;;  %v7761_v25 = vpack.c.bf16 %v10621_v56, %v10619_v42  ;;  %v7764_v6 = vpack.c.bf16 %v10627_v16, %v10623_v32 }
 0x720   : > { %7735 = vmatpush3.bf16.msra.mxu1 %v10777_v59  ;;  %v11218_v27 = vand.u32 4294901760, %v10796_v19  ;;  %v7782_v4 = vpack.c.bf16 %v10796_v19, %v10794_v36  ;;  %v7818_v16 = vpack.c.bf16 %v4249_v18, %v4242_v31  ;;  %v7821_v56 = vpack.c.bf16 %v4263_v38, %v4256_v30 }
 0x721   : > { %v4201_v53 = vsub.f32 %v10619_v42, %v4200_v20  ;;  %7736 = vmatprep.subr.bf16.mxu1 %v11283_v21  ;;  %v4272_v51 = vand.u32 4294901760, %v4271_v60  ;;  %v7767_v60 = vpack.c.bf16 %v10635_v7, %v10629_v33  ;;  %v7815_v42 = vpack.c.bf16 %v4235_v44, %v4228_v49 }
 0x722   : > { %v4306_v63 = vsub.f32 %v10796_v19, %v11218_v27  ;;  %v7824_v7 = vpack.c.bf16 %v4277_v61, %v4270_v26  ;;  %v11403_v33 = vand.u32 4294901760, %v10789_v43  ;;  %v11404_v32 = vand.u32 4294901760, %v10791_v5 }
 0x723   : > { %v4202_v23 = vand.u32 4294901760, %v4201_v53  ;;  %v4278_v53 = vsub.f32 %v10787_v10, %v4277_v61 }
 0x724   : > { %v4307_v11 = vand.u32 4294901760, %v4306_v63 }
 0x725   : > { %v10801_v34 = vpack.c.bf16 %v4209_v0, %v4202_v23  ;;  %v4279_v23 = vand.u32 4294901760, %v4278_v53  ;;  %v11221_v0 = vand.u32 4294901760, %v10789_v43  ;;  %v7770_v53 = vpack.c.bf16 %v10641_v55, %v10639_v46 }
 0x726   : > { %v7758_v1 = vpack.c.bf16 %v4307_v11, %v4300_v37  ;;  %v7827_v46 = vpack.c.bf16 %v11404_v32, %v11403_v33  ;;  %v11405_v55 = vand.u32 4294901760, %v10794_v36 }
 0x727   : > { %v7752_v13 = vpack.c.bf16 %v4279_v23, %v4272_v51  ;;  %v4285_v9 = vsub.f32 %v10789_v43, %v11221_v0  ;;  %v7773_v51 = vpack.c.bf16 %v10645_v41, %v10643_v50  ;;  %v7776_v23 = vpack.c.bf16 %v10787_v10, %v10785_v15 }
 0x728   : > { %v11406_v50 = vand.u32 4294901760, %v10796_v19 }
 0x729   : > { %v4286_v35 = vand.u32 4294901760, %v4285_v9  ;;  %v7779_v9 = vpack.c.bf16 %v10791_v5, %v10789_v43 }
 0x72a   : > { %v7830_v41 = vpack.c.bf16 %v11406_v50, %v11405_v55 }
 0x72b   : > { %v7755_v40 = vpack.c.bf16 %v4293_v2, %v4286_v35  ;;  %v5110_v35 = vld [vmem:[#allocation20] ss:$0 sm:$0xff] }
 0x7f2   : > { %v4078_v2 = vpop.f32.mrb[4].mxu0 }
 0x7f3   : > { %v7860_v58 = vadd.f32 %v5110_v35, %v4078_v2  ;;  %v6781_v63 = vpop.f32.mrb[5].mxu0 }
 0x7f5   : > { %v4082_v37 = vmax.f32 %v7860_v58, 0.0 }
 0x7f7   : > { %v10873_v11 = vand.u32 4294901760, %v4082_v37 }
 0x7f9   : > { %v4188_v27 = vsub.f32 %v4082_v37, %v10873_v11 }
 0x7fb   : > { %v4189_v12 = vand.u32 4294901760, %v4188_v27 }
 0x7fd   : > { %v4190_v8 = vsub.f32 %v4188_v27, %v4189_v12 }
 0x7ff   : > { %v4191_v0 = vand.u32 4294901760, %v4190_v8 }
 0x801   : > { %6815 = vmatmul.mubr.f32.vlgmr.msra.gmra.mrb[4].mxu1 %v4191_v0 }
 0x802   : > { %7738 = vmatpush3.bf16.msra.mxu1 %v10801_v34  ;;  %6849 = vmatprep.mubr.msk.f32.mxu1 %vm8684_vm0, %v11288_v29  ;;  %v7809_v34 = vpack.c.bf16 %v4207_v14, %v4200_v20 }
 0x803   : > { %7739 = vmatprep.subr.bf16.mxu1 %v11283_v21 }
 0x806   : > { %7741 = vmatpush3.bf16.msra.mxu1 %v7740_v22  ;;  %v7812_v22 = vpack.c.bf16 %v4221_v24, %v4214_v62 }
 0x807   : > { %7742 = vmatprep.subr.bf16.mxu1 %v11283_v21 }
 0x80a   : > { %7744 = vmatpush3.bf16.msra.mxu1 %v7743_v57 }
 0x80b   : > { %7745 = vmatprep.subr.bf16.mxu1 %v11283_v21 }
 0x80e   : > { %7747 = vmatpush3.bf16.msra.mxu1 %v7746_v47 }
 0x80f   : > { %7748 = vmatprep.subr.bf16.mxu1 %v11283_v21 }
 0x812   : > { %7750 = vmatpush3.bf16.msra.mxu1 %v7749_v39 }
 0x813   : > { %7751 = vmatprep.subr.bf16.mxu1 %v11283_v21 }
 0x816   : > { %7753 = vmatpush3.bf16.msra.mxu1 %v7752_v13 }
 0x817   : > { %7754 = vmatprep.subr.bf16.mxu1 %v11283_v21 }
 0x81a   : > { %7756 = vmatpush3.bf16.msra.mxu1 %v7755_v40 }
 0x81b   : > { %7757 = vmatprep.subr.bf16.mxu1 %v11283_v21 }
 0x81e   : > { %7759 = vmatpush3.bf16.msra.mxu1 %v7758_v1 }
 0x81f   : > { %7760 = vmatprep.subr.bf16.mxu1 %v11283_v21 }
 0x821   : > { %6850 = vmatmul.mubr.f32.vlgmr.msra.gmra.mrb[4].mxu1 %v10873_v11 }
 0x822   : > { %7762 = vmatpush3.bf16.msra.mxu1 %v7761_v25  ;;  %6884 = vmatprep.mubr.msk.f32.mxu1 %vm8684_vm0, %v11288_v29 }
 0x823   : > { %7763 = vmatprep.subr.bf16.mxu1 %v11283_v21 }
 0x826   : > { %7765 = vmatpush3.bf16.msra.mxu1 %v7764_v6 }
 0x827   : > { %7766 = vmatprep.subr.bf16.mxu1 %v11283_v21 }
 0x82a   : > { %7768 = vmatpush3.bf16.msra.mxu1 %v7767_v60 }
 0x82b   : > { %7769 = vmatprep.subr.bf16.mxu1 %v11283_v21 }
 0x82e   : > { %7771 = vmatpush3.bf16.msra.mxu1 %v7770_v53 }
 0x82f   : > { %7772 = vmatprep.subr.bf16.mxu1 %v11283_v21 }
 0x832   : > { %7774 = vmatpush3.bf16.msra.mxu1 %v7773_v51 }
 0x833   : > { %7775 = vmatprep.subr.bf16.mxu1 %v11283_v21 }
 0x836   : > { %7777 = vmatpush3.bf16.msra.mxu1 %v7776_v23 }
 0x837   : > { %7778 = vmatprep.subr.bf16.mxu1 %v11283_v21 }
 0x83a   : > { %7780 = vmatpush3.bf16.msra.mxu1 %v7779_v9 }
 0x83b   : > { %7781 = vmatprep.subr.bf16.mxu1 %v11283_v21 }
 0x83e   : > { %7783 = vmatpush3.bf16.msra.mxu1 %v7782_v4 }
 0x83f   : > { %7784 = vmatprep.subr.bf16.mxu1 %v11283_v21 }
 0x841   : > { %6885 = vmatmul.mubr.f32.vlgmr.msra.gmra.mrb[4].mxu1 %v4188_v27 }
 0x842   : > { %7786 = vmatpush3.bf16.msra.mxu1 %v10617_v48  ;;  %6919 = vmatprep.mubr.msk.f32.mxu1 %vm8684_vm0, %v11288_v29 }
 0x843   : > { %7787 = vmatprep.subr.bf16.mxu1 %v11283_v21 }
 0x846   : > { %7789 = vmatpush3.bf16.msra.mxu1 %v10625_v45 }
 0x847   : > { %7790 = vmatprep.subr.bf16.mxu1 %v11283_v21 }
 0x84a   : > { %7792 = vmatpush3.bf16.msra.mxu1 %v10651_v28 }
 0x84b   : > { %7793 = vmatprep.subr.bf16.mxu1 %v11283_v21 }
 0x84e   : > { %7795 = vmatpush3.bf16.msra.mxu1 %v10659_v3 }
 0x84f   : > { %7796 = vmatprep.subr.bf16.mxu1 %v11283_v21 }
 0x852   : > { %7798 = vmatpush3.bf16.msra.mxu1 %v10667_v54 }
 0x853   : > { %7799 = vmatprep.subr.bf16.mxu1 %v11283_v21 }
 0x856   : > { %7801 = vmatpush3.bf16.msra.mxu1 %v10767_v52 }
 0x857   : > { %7802 = vmatprep.subr.bf16.mxu1 %v11283_v21 }
 0x85a   : > { %7804 = vmatpush3.bf16.msra.mxu1 %v10771_v17 }
 0x85b   : > { %7805 = vmatprep.subr.bf16.mxu1 %v11283_v21 }
 0x85e   : > { %7807 = vmatpush3.bf16.msra.mxu1 %v10777_v59 }
 0x85f   : > { %7808 = vmatprep.subr.bf16.mxu1 %v11283_v21 }
 0x861   : > { %6920 = vmatmul.mubr.f32.vlgmr.msra.gmra.mrb[4].mxu1 %v4189_v12 }
 0x862   : > { %7810 = vmatpush3.bf16.msra.mxu1 %v7809_v34  ;;  %6954 = vmatprep.mubr.msk.f32.mxu1 %vm8684_vm0, %v11288_v29 }
 0x863   : > { %7811 = vmatprep.subr.bf16.mxu1 %v11283_v21 }
 0x866   : > { %7813 = vmatpush3.bf16.msra.mxu1 %v7812_v22 }
 0x867   : > { %7814 = vmatprep.subr.bf16.mxu1 %v11283_v21 }
 0x86a   : > { %7816 = vmatpush3.bf16.msra.mxu1 %v7815_v42 }
 0x86b   : > { %7817 = vmatprep.subr.bf16.mxu1 %v11283_v21 }
 0x86e   : > { %7819 = vmatpush3.bf16.msra.mxu1 %v7818_v16 }
 0x86f   : > { %7820 = vmatprep.subr.bf16.mxu1 %v11283_v21 }
 0x872   : > { %7822 = vmatpush3.bf16.msra.mxu1 %v7821_v56 }
 0x873   : > { %7823 = vmatprep.subr.bf16.mxu1 %v11283_v21 }
 0x876   : > { %7825 = vmatpush3.bf16.msra.mxu1 %v7824_v7 }
 0x877   : > { %7826 = vmatprep.subr.bf16.mxu1 %v11283_v21 }
 0x87a   : > { %7828 = vmatpush3.bf16.msra.mxu1 %v7827_v46 }
 0x87b   : > { %7829 = vmatprep.subr.bf16.mxu1 %v11283_v21 }
 0x87e   : > { %7831 = vmatpush3.bf16.msra.mxu1 %v7830_v41 }
 0x87f   : > { %7832 = vmatprep.subr.bf16.mxu1 %v11283_v21 }
 0x881   : > { %6955 = vmatmul.mubr.f32.vlgmr.msra.gmra.mrb[4].mxu1 %v10873_v11 }
 0x882   : > { %7834 = vmatpush3.bf16.msra.mxu1 %v10617_v48  ;;  %6989 = vmatprep.mubr.msk.f32.mxu1 %vm8684_vm0, %v11288_v29 }
 0x883   : > { %7835 = vmatprep.subr.bf16.mxu1 %v11283_v21 }
 0x886   : > { %7837 = vmatpush3.bf16.msra.mxu1 %v10625_v45 }
 0x887   : > { %7838 = vmatprep.subr.bf16.mxu1 %v11283_v21 }
 0x88a   : > { %7840 = vmatpush3.bf16.msra.mxu1 %v10651_v28 }
 0x88b   : > { %7841 = vmatprep.subr.bf16.mxu1 %v11283_v21 }
 0x88e   : > { %7843 = vmatpush3.bf16.msra.mxu1 %v10659_v3 }
 0x88f   : > { %7844 = vmatprep.subr.bf16.mxu1 %v11283_v21 }
 0x892   : > { %7846 = vmatpush3.bf16.msra.mxu1 %v10667_v54 }
 0x893   : > { %7847 = vmatprep.subr.bf16.mxu1 %v11283_v21 }
 0x896   : > { %7849 = vmatpush3.bf16.msra.mxu1 %v10767_v52 }
 0x897   : > { %7850 = vmatprep.subr.bf16.mxu1 %v11283_v21 }
 0x89a   : > { %7852 = vmatpush3.bf16.msra.mxu1 %v10771_v17 }
 0x89b   : > { %7853 = vmatprep.subr.bf16.mxu1 %v11283_v21 }
 0x89e   : > { %7855 = vmatpush3.bf16.msra.mxu1 %v10777_v59 }
 0x8a1   : > { %6990 = vmatmul.mubr.f32.vlgmr.msra.gmra.mrb[4].mxu1 %v10873_v11 }
 0x8a2   : > { %8520 = shalt.err (!%p8517_p2)
}
 0x8a3   : > { %s8521_s27 = scalar_lea.hbm %s10986_s25, 128  ;;  %s8525_s4 = scalar_lea.hbm %s11407_s29, 256 }
 0x8a4   : > { %p8522_p4 = scmp.ne.s32.totalorder %s10986_s25, %s8521_s27  ;;  %p8526_p7 = scmp.lt.u32.totalorder %s10986_s25, %s11407_s29 }
 0x8a5   : > { %p8527_p3 = scmp.lt.u32.totalorder %s8525_s4, %s8521_s27  ;;  %p8529_p6 = scmp.lt.u32.totalorder %s8521_s27, %s10986_s25 }
 0x8a6   : > { %p8523_p10 = pnand %p8522_p4, %p11408_p8 }
 0x8a7   : > { %p8528_p11 = por %p8527_p3, %p8526_p7 }
 0x8a8   : > { %p8524_p5 = pneg %p8523_p10 }
 0x8a9   : > { %p8530_p9 = por %p8529_p6, %p8528_p11 }
 0x8ab   : > { %p8531_p12 = pnand %p8530_p9, %p8524_p5 }
 0x8ad   : > { %8534 = shalt.err (!%p8531_p12)
}
 0x8ae   : > { %7975 = dma.vmem_to_hbm [thread:$0]  (%p11408_p8), %s4789_s7, 128, %s10986_s25, %s10994_s2  }
 0x8af   : > { %s11409_s30 = sld [smem:[#allocation71_spill]]  ;;  %s8535_s18 = scalar_lea.vmem %s4802_s26, 128 }
 0x8b0   : > { %p8536_p1 = scmp.ne.s32.totalorder %s4802_s26, %s8535_s18  ;;  %s8687_s27 = smov [#allocation28]  }
 0x8b1   : > { %s8539_s4 = sshll.u32 %s8687_s27, 4  ;;  %s8540_s4 = int_to_ptr.vmem [resolvable:$false] %s8539_s4 }
 0x8b2   : > { %p8537_p13 = pnand %p8536_p1, %p11408_p8  ;;  %s8541_s1 = scalar_lea.vmem %s8540_s4, 256 }
 0x8b3   : > { %p8542_p2 = scmp.lt.s32.totalorder %s4802_s26, %s8540_s4  ;;  %p8543_p4 = scmp.lt.s32.totalorder %s8541_s1, %s8535_s18 }
 0x8b4   : > { %p8538_p0 = pneg %p8537_p13 }
 0x8b5   : > { %s4799_s15 = scalar_lea.hbm %s11409_s30, %s10978_s16  ;;  %p8544_p10 = por %p8543_p4, %p8542_p2 }
 0x8b7   : > { %p8545_p5 = pnand %p8544_p10, %p8538_p0 }
 0x8b9   : > { %8548 = shalt.err (!%p8545_p5)
}
 0x8ba   : > { %s8549_s7 = scalar_lea.hbm %s4799_s15, 128  ;;  %s8553_s0 = scalar_lea.hbm %s11409_s30, 256 }
 0x8bb   : > { %p8550_p7 = scmp.ne.s32.totalorder %s4799_s15, %s8549_s7  ;;  %p8554_p6 = scmp.lt.u32.totalorder %s4799_s15, %s11409_s30 }
 0x8bc   : > { %p8555_p9 = scmp.lt.u32.totalorder %s8553_s0, %s8549_s7  ;;  %p8557_p1 = scmp.lt.u32.totalorder %s8549_s7, %s4799_s15 }
 0x8bd   : > { %p8551_p3 = pnand %p8550_p7, %p11408_p8 }
 0x8be   : > { %p8556_p12 = por %p8555_p9, %p8554_p6 }
 0x8bf   : > { %p8552_p11 = pneg %p8551_p3 }
 0x8c0   : > { %p8558_p13 = por %p8557_p1, %p8556_p12 }
 0x8c2   : > { %p8559_p0 = pnand %p8558_p13, %p8552_p11 }
 0x8c4   : > { %8562 = shalt.err (!%p8559_p0)
}
 0x8c5   : > { %7976 = dma.vmem_to_hbm [thread:$0]  (%p11408_p8), %s4802_s26, 128, %s4799_s15, %s10994_s2   ;;  %v5111_v21 = vld [vmem:[#allocation23] ss:$0 sm:$0xff] }
 0x8c6   : > { %s739_s18 = scalar_lea.vmem [#allocation25], %s9188_s14  ;;  %s11410_s1 = sld [smem:[#allocation69_spill]] }
 0x8c7   : > { %s4775_s27 = sshll.u32 %s739_s18, 4  ;;  %s4752_s25 = scalar_lea.sflag [#allocation4], %s9185_s5  ;;  %s11039_s27 = int_to_ptr.vmem [resolvable:$true] %s4775_s27 }
 0x8c8   : > { %s8563_s26 = scalar_lea.vmem %s11039_s27, 128  ;;  %s8688_s14 = smov [#allocation25]  }
 0x8c9   : > { %p8564_p2 = scmp.ne.s32.totalorder %s11039_s27, %s8563_s26  ;;  %s8567_s2 = sshll.u32 %s8688_s14, 4  ;;  %s8568_s2 = int_to_ptr.vmem [resolvable:$false] %s8567_s2 }
 0x8ca   : > { %s8569_s15 = scalar_lea.vmem %s8568_s2, 256  ;;  %p8570_p5 = scmp.lt.s32.totalorder %s11039_s27, %s8568_s2 }
 0x8cb   : > { %p8565_p4 = pnand %p8564_p2, %p11408_p8  ;;  %p8571_p7 = scmp.lt.s32.totalorder %s8569_s15, %s8563_s26 }
 0x8cc   : > { %s11037_s7 = scalar_lea.hbm %s11410_s1, %s10978_s16 }
 0x8cd   : > { %p8566_p10 = pneg %p8565_p4  ;;  %p8572_p3 = por %p8571_p7, %p8570_p5 }
 0x8cf   : > { %p8573_p11 = pnand %p8572_p3, %p8566_p10 }
 0x974   : > { %v4743_v29 = vpop.f32.mrb[4].mxu1 }
 0x975   : > { %v7861_v45 = vadd.f32 %v5111_v21, %v4743_v29  ;;  %v6991_v48 = vpop.f32.mrb[5].mxu1 }
 0x977   : > { %v4747_v28 = vmax.f32 %v7861_v45, 0.0 }
 0x979   : > { %4748 = vst [vmem:[%s739_s18] sm:$0xff] %v4747_v28 }
 0x97a   : > { %8576 = shalt.err (!%p8573_p11)
}
 0x97b   : > { %s8577_s5 = scalar_lea.hbm %s11037_s7, 128  ;;  %s8581_s0 = scalar_lea.hbm %s11410_s1, 256 }
 0x97c   : > { %p8578_p6 = scmp.ne.s32.totalorder %s11037_s7, %s8577_s5  ;;  %p8582_p1 = scmp.lt.u32.totalorder %s11037_s7, %s11410_s1 }
 0x97d   : > { %p8583_p13 = scmp.lt.u32.totalorder %s8581_s0, %s8577_s5  ;;  %p8585_p2 = scmp.lt.u32.totalorder %s8577_s5, %s11037_s7 }
 0x97e   : > { %p8579_p9 = pnand %p8578_p6, %p11408_p8 }
 0x97f   : > { %p8584_p0 = por %p8583_p13, %p8582_p1 }
 0x980   : > { %p8580_p12 = pneg %p8579_p9 }
 0x981   : > { %p8586_p4 = por %p8585_p2, %p8584_p0 }
 0x983   : > { %p8587_p10 = pnand %p8586_p4, %p8580_p12 }
 0x985   : > { %8590 = shalt.err (!%p8587_p10)
}
 0x986   : > { %7974 = dma.vmem_to_hbm [thread:$0]  (%p11408_p8), %s11039_s27, 128, %s11037_s7, %s4752_s25  }
 0x987 PF: > { %s11411_s3 = sld [smem:[#allocation40_spill]]  ;;  %p11412_p5 = scmp.ne.s32.totalorder %s11254_s20, 0 }
 0x988   : > { %p11413_p7 = scmp.ge.s32.totalorder %s8665_s24, 2 }
 0x98a   : > { %p8025_p3 = pnand %p11413_p7, %p11412_p5 }
 0x98d   : > { %s4813_s4 = sand.u32 1, %s11411_s3  }
 0x98e   : > { %s4814_s26 = scalar_lea.sflag [#allocation4], %s4813_s4 }
 0x98f   : > { %8644 = dma.done.wait (!%p8025_p3), %s4814_s26, 128  }
 0x990   : > { %8646 = vsyncadd (!%p8025_p3), %s4814_s26, 4294967168  ;;  %s11414_s14 = sadd.s32 4294967294, %s8665_s24  }
 0x991   : > { %s4822_s2 = sand.u32 1, %s11414_s14  }
 0x992   : > { %s4823_s15 = scalar_lea.sflag [#allocation27], %s4822_s2 }
 0x993   : > { %8648 = dma.done.wait (!%p8025_p3), %s4823_s15, 256  }
 0x994   : > { %8650 = vsyncadd (!%p8025_p3), %s4823_s15, 4294967040  ;;  %s11415_s28 = smov %s9076_s21  ;;  %p42_p8 = scmp.ge.s32.totalorder %s9076_s21, 4  }
 0x995   : > { %s11416_s21 = smov %s8657_s22  ;;  %s11417_s22 = smov %s8661_s23 }
 0x996   : > { %s11418_s23 = smov %s9087_s19  ;;  %s11419_s24 = smov %s11415_s28 }
 0x997   :  { %44 = sbr.rel (!%p42_p8) target bundleno = 28 (0x1c), region = 214 }
 0x99e   :  { %4837 = vsyncpa [#allocation3], 1 }
 0x99f   :  { %4839 = vsyncpa [#allocation3 + $0x1], 1 }
 0x9a0   :  { %4840 = vsyncpa [#allocation6], 1 }
 0x9a1   :  { %4841 = vsyncpa [#allocation9], 1 }
 0x9a2   :  { %4842 = vsyncpa [#allocation12], 1 }
 0x9a3   :  { %4843 = vsyncpa [#allocation15], 1 }
 0x9a4   :  { %4844 = vsyncpa [#allocation18], 1 }
 0x9a5   :  { %4846 = vsyncpa [#allocation18 + $0x1], 1 }
 0x9a6   :  { %4847 = vsyncpa [#allocation21], 1 }
 0x9a7   :  { %4848 = vsyncpa [#allocation24], 1 }
 0x9a8   :  { %4849 = vsyncpa [#allocation4], 1 }
 0x9a9   :  { %4851 = vsyncpa [#allocation4 + $0x1], 1 }
 0x9aa   :  { %4852 = vsyncpa [#allocation27], 1 }
 0x9ab   :  { %4854 = vsyncpa [#allocation27 + $0x1], 1 }

</bundles_post_ra>
